<compile_context>
chip_gen: v7x
topology: tpu7x:2x2x1
jax: 0.10.0
libtpu: 0.0.40
codegen_flags: <defaults>
</compile_context>

<pallas_src>
import functools

import jax
import jax.numpy as jnp
from jax import lax
from jax.experimental import pallas as pl
from jax.experimental.pallas import tpu as pltpu

EPS = 1e-5       # nn.InstanceNorm2d default eps (affine=False, biased var)
SLOPE = 0.2      # nn.LeakyReLU(0.2)
VMEM_LIMIT = 40 * 1024 * 1024   # explicit scoped-VMEM budget (fits v7x 64 MiB)

# (cout, kernel, stride, pad, followed_by_instance_norm) — matches the PyTorch model
CFG = [
    (64,  4, 2, 1, False),
    (128, 4, 2, 1, True),
    (256, 4, 2, 1, True),
    (512, 4, 1, 1, True),
    (1,   4, 1, 1, False),
]


def _round_up(x, m):
    return ((x + m - 1) // m) * m


# ----------------------------- Pallas kernels ------------------------------

def _conv_matmul_kernel(p_ref, w_ref, b_ref, o_ref, acc_ref, *, negative_slope):
    """One (TM, TK)x(TK, Cout) MXU step of out = act(patches @ W + b).

    K-reduction accumulates into an f32 VMEM scratch; bias + LeakyReLU are
    applied in f32 on the last K step only (lane-dense writeback).
    """
    kk = pl.program_id(1)

    @pl.when(kk == 0)
    def _():
        acc_ref[...] = jnp.zeros_like(acc_ref)

    acc_ref[...] += jnp.dot(p_ref[...], w_ref[...],
                            preferred_element_type=jnp.float32)

    @pl.when(kk == pl.num_programs(1) - 1)
    def _():
        acc = acc_ref[...] + b_ref[...]                       # f32 epilogue
        if negative_slope is not None:
            acc = jnp.where(acc >= 0.0, acc, acc * negative_slope)
        o_ref[...] = acc.astype(o_ref.dtype)


def _instnorm_lrelu_kernel(x_ref, o_ref, *, eps, negative_slope, inv_hw):
    """Block is (1, H*W, TC): spatial on sublanes, channels on lanes.

    Single-pass statistics (E[x^2] - mean^2), biased variance, eps=1e-5,
    fused LeakyReLU — matches PyTorch InstanceNorm2d + LeakyReLU(0.2).
    """
    x = x_ref[...]                                            # (1, HW, TC) f32
    s1 = jnp.sum(x, axis=1, keepdims=True)
    s2 = jnp.sum(x * x, axis=1, keepdims=True)
    mean = s1 * inv_hw
    var = jnp.maximum(s2 * inv_hw - mean * mean, 0.0)
    y = (x - mean) * lax.rsqrt(var + eps)
    o_ref[...] = jnp.where(y >= 0.0, y, y * negative_slope)


# ------------------------------- glue (JAX) --------------------------------

def _im2col(x_nhwc, k, stride, pad, out_dtype):
    """(N,H,W,C) -> (N*Ho*Wo, k*k*C) patches, flattened in HWIO order."""
    n, h, w, c = x_nhwc.shape
    xp = jnp.pad(x_nhwc.astype(out_dtype),
                 ((0, 0), (pad, pad), (pad, pad), (0, 0)))
    ho = (h + 2 * pad - k) // stride + 1
    wo = (w + 2 * pad - k) // stride + 1
    cols = []
    for i in range(k):
        for j in range(k):
            cols.append(
                xp[:, i:i + stride * ho:stride, j:j + stride * wo:stride, :])
    patches = jnp.stack(cols, axis=3)                    # (N, Ho, Wo, k*k, C)
    patches = patches.reshape(n * ho * wo, k * k * c)    # matches HWIO flatten
    return patches, (n, ho, wo)


def _pallas_conv(x_nhwc, w_hwio, b, stride, pad, negative_slope):
    k, _, cin, cout = w_hwio.shape

    # bf16 patches/weights for the MXU (f32 accumulation in the kernel).
    patches, (n, ho, wo) = _im2col(x_nhwc, k, stride, pad, jnp.bfloat16)
    m, k_dim = patches.shape

    # Lane-dense / MXU-friendly padding.
    cout_p = _round_up(cout, 128)                     # Cout=1 and 64 -> 128
    kp = _round_up(k_dim, 128)                        # K=48 -> 128
    tk = kp if kp <= 1024 else 1024                   # K reduction tile
    kp = _round_up(kp, tk)
    if m > 256:
        tm = 256
        mp = _round_up(m, tm)
    else:
        tm = mp = _round_up(m, 8)

    patches_p = jnp.pad(patches, ((0, mp - m), (0, kp - k_dim)))
    w2d = w_hwio.reshape(k * k * cin, cout).astype(jnp.bfloat16)
    w_p = jnp.pad(w2d, ((0, kp - k_dim), (0, cout_p - cout)))
    b_p = jnp.pad(b.astype(jnp.float32).reshape(1, cout),
                  ((0, 0), (0, cout_p - cout)))

    grid = (mp // tm, kp // tk)
    out = pl.pallas_call(
        functools.partial(_conv_matmul_kernel, negative_slope=negative_slope),
        out_shape=jax.ShapeDtypeStruct((mp, cout_p), jnp.float32),
        grid_spec=pltpu.PrefetchScalarGridSpec(
            num_scalar_prefetch=0,
            grid=grid,
            in_specs=[
                pl.BlockSpec((tm, tk), lambda i, kk: (i, kk)),       # patches
                pl.BlockSpec((tk, cout_p), lambda i, kk: (kk, 0)),   # weights
                pl.BlockSpec((1, cout_p), lambda i, kk: (0, 0)),     # bias
            ],
            out_specs=pl.BlockSpec((tm, cout_p), lambda i, kk: (i, 0)),
            scratch_shapes=[pltpu.VMEM((tm, cout_p), jnp.float32)],
        ),
        compiler_params=pltpu.CompilerParams(
            dimension_semantics=("parallel", "arbitrary"),
            vmem_limit_bytes=VMEM_LIMIT,
        ),
    )(patches_p, w_p, b_p)

    return out[:m, :cout].reshape(n, ho, wo, cout)


def _pallas_instnorm_lrelu(x_nhwc):
    n, h, w, c = x_nhwc.shape
    hw = h * w
    x2 = x_nhwc.reshape(n, hw, c)                   # channels stay on lanes
    tc = c if c <= 256 else 256                     # 128 / 256 / 256 (C=512)
    grid = (n, c // tc)
    out = pl.pallas_call(
        functools.partial(_instnorm_lrelu_kernel, eps=EPS,
                          negative_slope=SLOPE, inv_hw=1.0 / hw),
        out_shape=jax.ShapeDtypeStruct((n, hw, c), jnp.float32),
        grid_spec=pltpu.PrefetchScalarGridSpec(
            num_scalar_prefetch=0,
            grid=grid,
            in_specs=[pl.BlockSpec((1, hw, tc), lambda i, j: (i, 0, j))],
            out_specs=pl.BlockSpec((1, hw, tc), lambda i, j: (i, 0, j)),
        ),
        compiler_params=pltpu.CompilerParams(
            dimension_semantics=("parallel", "parallel"),
            vmem_limit_bytes=VMEM_LIMIT,
        ),
    )(x2)
    return out.reshape(n, h, w, c)


# ------------------------------ model params -------------------------------

def init_params(key, input_nc):
    params = []
    cin = input_nc
    for cout, k, _, _, _ in CFG:
        key, kw, kb = jax.random.split(key, 3)
        fan_in = cin * k * k
        bound = 1.0 / float(fan_in) ** 0.5        # PyTorch Conv2d default init
        w = jax.random.uniform(kw, (k, k, cin, cout), jnp.float32, -bound, bound)
        b = jax.random.uniform(kb, (cout,), jnp.float32, -bound, bound)
        params.append((w, b))
        cin = cout
    return params


def discriminator_forward(params, x_nchw):
    x = jnp.transpose(x_nchw, (0, 2, 3, 1)).astype(jnp.float32)  # NCHW -> NHWC
    n_layers = len(CFG)
    for idx, ((w, b), (_, _, s, p, norm)) in enumerate(zip(params, CFG)):
        last = idx == n_layers - 1
        # Fuse LeakyReLU into the conv epilogue only when no InstanceNorm follows.
        slope = None if (norm or last) else SLOPE
        x = _pallas_conv(x, w, b, s, p, slope)
        if norm:
            x = _pallas_instnorm_lrelu(x)
    return jnp.transpose(x, (0, 3, 1, 2))                        # NHWC -> NCHW


# --------------------------- pure-JAX reference ----------------------------

def reference_forward(params, x_nchw, matmul_dtype=jnp.float32):
    x = jnp.transpose(x_nchw, (0, 2, 3, 1)).astype(jnp.float32)
    for idx, ((w, b), (_, _, s, p, norm)) in enumerate(zip(params, CFG)):
        last = idx == len(CFG) - 1
        x = lax.conv_general_dilated(
            x.astype(matmul_dtype), w.astype(matmul_dtype),
            (s, s), [(p, p), (p, p)],
            dimension_numbers=("NHWC", "HWIO", "NHWC"),
            preferred_element_type=jnp.float32) + b
        if norm:
            mean = jnp.mean(x, axis=(1, 2), keepdims=True)
            var = jnp.mean((x - mean) ** 2, axis=(1, 2), keepdims=True)
            x = (x - mean) * lax.rsqrt(var + EPS)
        if not last:
            x = jnp.where(x >= 0, x, x * SLOPE)
    return jnp.transpose(x, (0, 3, 1, 2))


# ----------------------------------- main -----------------------------------

if __name__ == "__main__":
    key = jax.random.PRNGKey(0)
    kx, kp = jax.random.split(key)
    input_nc = 3
    # 32x32 keeps all five convs valid and small: final output is (2, 1, 2, 2).
    x = jax.random.normal(kx, (2, input_nc, 32, 32), jnp.float32)
    params = init_params(kp, input_nc)

    fwd = jax.jit(discriminator_forward)
    out = jax.block_until_ready(fwd(params, x))
    assert out.shape == (2, 1, 2, 2), out.shape

    # Tight check against a reference that uses the same bf16-operand / f32-acc
    # matmul numerics policy as the kernel.
    ref_bf16 = reference_forward(params, x, jnp.bfloat16)
    err_bf16 = float(jnp.max(jnp.abs(out - ref_bf16)))
    assert jnp.allclose(out, ref_bf16, atol=1e-3, rtol=1e-3), err_bf16

    # Looser sanity check against the pure-f32 (PyTorch-equivalent) reference:
    # the only drift is the bf16 cast of the MXU operands.
    ref_f32 = reference_forward(params, x, jnp.float32)
    err_f32 = float(jnp.max(jnp.abs(out - ref_f32)))
    assert jnp.allclose(out, ref_f32, atol=5e-2, rtol=5e-2), err_f32

    print("KERNEL_OK")
</pallas_src>

<mosaic_0001>
module attributes {stable_mosaic.version = 11 : i64} {
  func.func @_conv_matmul_kernel(%arg0: i32, %arg1: i32, %arg2: memref<256x128xbf16, #tpu.memory_space<vmem>>, %arg3: memref<128x128xbf16, #tpu.memory_space<vmem>>, %arg4: memref<1x128xf32, #tpu.memory_space<vmem>>, %arg5: memref<256x128xf32, #tpu.memory_space<vmem>>, %arg6: memref<256x128xf32, #tpu.memory_space<vmem>>) attributes {dimension_semantics = [#tpu.dimension_semantics<parallel>, #tpu.dimension_semantics<arbitrary>], iteration_bounds = array<i64: 2, 1>, scalar_prefetch = 0 : i64, scratch_operands = 1 : i64, tpu.core_type = #tpu.core_type<tc>, window_params = [{transform_indices = @transform_0, window_bounds = array<i64: 256, 128>}, {transform_indices = @transform_1, window_bounds = array<i64: 128, 128>}, {pipeline_mode = #tpu.pipeline_mode<synchronous>, transform_indices = @transform_2, window_bounds = array<i64: 1, 128>}, {transform_indices = @transform_3, window_bounds = array<i64: 256, 128>}]} {
    %c0_i32 = arith.constant 0 : i32
    %0 = arith.cmpi eq, %arg1, %c0_i32 : i32
    %1 = arith.extui %0 : i1 to i32
    %c0_i32_0 = arith.constant 0 : i32
    %2 = arith.cmpi ne, %1, %c0_i32_0 : i32
    scf.if %2 {
      %cst_10 = arith.constant 0.000000e+00 : f32
      %12 = vector.broadcast %cst_10 : f32 to vector<256x128xf32>
      %c0_11 = arith.constant 0 : index
      %c0_12 = arith.constant 0 : index
      %13 = vector.load %arg6[%c0_11, %c0_12] : memref<256x128xf32, #tpu.memory_space<vmem>>, vector<256x128xf32>
      tpu.vector_store %arg6[%c0_11, %c0_12], %12 {strides = array<i32>} : memref<256x128xf32, #tpu.memory_space<vmem>>, vector<256x128xf32>,
    } else {
    }
    %c0 = arith.constant 0 : index
    %c0_1 = arith.constant 0 : index
    %3 = vector.load %arg6[%c0, %c0_1] : memref<256x128xf32, #tpu.memory_space<vmem>>, vector<256x128xf32>
    %c0_2 = arith.constant 0 : index
    %c0_3 = arith.constant 0 : index
    %4 = vector.load %arg2[%c0_2, %c0_3] : memref<256x128xbf16, #tpu.memory_space<vmem>>, vector<256x128xbf16>
    %c0_4 = arith.constant 0 : index
    %c0_5 = arith.constant 0 : index
    %5 = vector.load %arg3[%c0_4, %c0_5] : memref<128x128xbf16, #tpu.memory_space<vmem>>, vector<128x128xbf16>
    %cst = arith.constant dense<0.000000e+00> : vector<256x128xf32>
    %6 = tpu.matmul %4, %5, %cst {dimension_numbers = #tpu.dot_dimension_numbers<[1], [0], [0], [1], [0, 0, 1, 1], [], []>} : vector<256x128xbf16>, vector<128x128xbf16>, vector<256x128xf32> -> vector<256x128xf32>
    %7 = arith.addf %3, %6 : vector<256x128xf32>
    %c0_6 = arith.constant 0 : index
    %c0_7 = arith.constant 0 : index
    %8 = vector.load %arg6[%c0_6, %c0_7] : memref<256x128xf32, #tpu.memory_space<vmem>>, vector<256x128xf32>
    tpu.vector_store %arg6[%c0_6, %c0_7], %7 {strides = array<i32>} : memref<256x128xf32, #tpu.memory_space<vmem>>, vector<256x128xf32>,
    %c0_i32_8 = arith.constant 0 : i32
    %9 = arith.cmpi eq, %arg1, %c0_i32_8 : i32
    %10 = arith.extui %9 : i1 to i32
    %c0_i32_9 = arith.constant 0 : i32
    %11 = arith.cmpi ne, %10, %c0_i32_9 : i32
    scf.if %11 {
      %c0_10 = arith.constant 0 : index
      %c0_11 = arith.constant 0 : index
      %12 = vector.load %arg6[%c0_10, %c0_11] : memref<256x128xf32, #tpu.memory_space<vmem>>, vector<256x128xf32>
      %c0_12 = arith.constant 0 : index
      %c0_13 = arith.constant 0 : index
      %13 = vector.load %arg4[%c0_12, %c0_13] : memref<1x128xf32, #tpu.memory_space<vmem>>, vector<1x128xf32>
      %14 = vector.broadcast %13 : vector<1x128xf32> to vector<256x128xf32>
      %15 = arith.addf %12, %14 : vector<256x128xf32>
      %cst_14 = arith.constant 0.000000e+00 : f32
      %16 = vector.broadcast %cst_14 : f32 to vector<256x128xf32>
      %17 = arith.cmpf oge, %15, %16 : vector<256x128xf32>
      %cst_15 = arith.constant 2.000000e-01 : f32
      %18 = vector.broadcast %cst_15 : f32 to vector<256x128xf32>
      %19 = arith.mulf %15, %18 : vector<256x128xf32>
      %20 = arith.select %17, %15, %19 : vector<256x128xi1>, vector<256x128xf32>
      %c0_16 = arith.constant 0 : index
      %c0_17 = arith.constant 0 : index
      %21 = vector.load %arg5[%c0_16, %c0_17] : memref<256x128xf32, #tpu.memory_space<vmem>>, vector<256x128xf32>
      tpu.vector_store %arg5[%c0_16, %c0_17], %20 {strides = array<i32>} : memref<256x128xf32, #tpu.memory_space<vmem>>, vector<256x128xf32>,
    } else {
    }
    return
  }
  func.func @transform_0(%arg0: i32, %arg1: i32) -> (i32, i32) {
    %c0_i32 = arith.constant 0 : i32
    return %arg0, %arg1 : i32, i32
  }
  func.func @transform_1(%arg0: i32, %arg1: i32) -> (i32, i32) {
    %c0_i32 = arith.constant 0 : i32
    %c0_i32_0 = arith.constant 0 : i32
    return %arg1, %c0_i32 : i32, i32
  }
  func.func @transform_2(%arg0: i32, %arg1: i32) -> (i32, i32) {
    %c0_i32 = arith.constant 0 : i32
    %c0_i32_0 = arith.constant 0 : i32
    %c0_i32_1 = arith.constant 0 : i32
    return %c0_i32, %c0_i32_0 : i32, i32
  }
  func.func @transform_3(%arg0: i32, %arg1: i32) -> (i32, i32) {
    %c0_i32 = arith.constant 0 : i32
    %c0_i32_0 = arith.constant 0 : i32
    return %arg0, %c0_i32 : i32, i32
  }
}

module attributes {stable_mosaic.version = 11 : i64} {
  func.func @_conv_matmul_kernel(%arg0: i32, %arg1: i32, %arg2: memref<128x1024xbf16, #tpu.memory_space<vmem>>, %arg3: memref<1024x128xbf16, #tpu.memory_space<vmem>>, %arg4: memref<1x128xf32, #tpu.memory_space<vmem>>, %arg5: memref<128x128xf32, #tpu.memory_space<vmem>>, %arg6: memref<128x128xf32, #tpu.memory_space<vmem>>) attributes {dimension_semantics = [#tpu.dimension_semantics<parallel>, #tpu.dimension_semantics<arbitrary>], iteration_bounds = array<i64: 1, 1>, scalar_prefetch = 0 : i64, scratch_operands = 1 : i64, tpu.core_type = #tpu.core_type<tc>, window_params = [{transform_indices = @transform_0, window_bounds = array<i64: 128, 1024>}, {transform_indices = @transform_1, window_bounds = array<i64: 1024, 128>}, {pipeline_mode = #tpu.pipeline_mode<synchronous>, transform_indices = @transform_2, window_bounds = array<i64: 1, 128>}, {transform_indices = @transform_3, window_bounds = array<i64: 128, 128>}]} {
    %c0_i32 = arith.constant 0 : i32
    %0 = arith.cmpi eq, %arg1, %c0_i32 : i32
    %1 = arith.extui %0 : i1 to i32
    %c0_i32_0 = arith.constant 0 : i32
    %2 = arith.cmpi ne, %1, %c0_i32_0 : i32
    scf.if %2 {
      %cst_10 = arith.constant 0.000000e+00 : f32
      %12 = vector.broadcast %cst_10 : f32 to vector<128x128xf32>
      %c0_11 = arith.constant 0 : index
      %c0_12 = arith.constant 0 : index
      %13 = vector.load %arg6[%c0_11, %c0_12] : memref<128x128xf32, #tpu.memory_space<vmem>>, vector<128x128xf32>
      tpu.vector_store %arg6[%c0_11, %c0_12], %12 {strides = array<i32>} : memref<128x128xf32, #tpu.memory_space<vmem>>, vector<128x128xf32>,
    } else {
    }
    %c0 = arith.constant 0 : index
    %c0_1 = arith.constant 0 : index
    %3 = vector.load %arg6[%c0, %c0_1] : memref<128x128xf32, #tpu.memory_space<vmem>>, vector<128x128xf32>
    %c0_2 = arith.constant 0 : index
    %c0_3 = arith.constant 0 : index
    %4 = vector.load %arg2[%c0_2, %c0_3] : memref<128x1024xbf16, #tpu.memory_space<vmem>>, vector<128x1024xbf16>
    %c0_4 = arith.constant 0 : index
    %c0_5 = arith.constant 0 : index
    %5 = vector.load %arg3[%c0_4, %c0_5] : memref<1024x128xbf16, #tpu.memory_space<vmem>>, vector<1024x128xbf16>
    %cst = arith.constant dense<0.000000e+00> : vector<128x128xf32>
    %6 = tpu.matmul %4, %5, %cst {dimension_numbers = #tpu.dot_dimension_numbers<[1], [0], [0], [1], [0, 0, 1, 1], [], []>} : vector<128x1024xbf16>, vector<1024x128xbf16>, vector<128x128xf32> -> vector<128x128xf32>
    %7 = arith.addf %3, %6 : vector<128x128xf32>
    %c0_6 = arith.constant 0 : index
    %c0_7 = arith.constant 0 : index
    %8 = vector.load %arg6[%c0_6, %c0_7] : memref<128x128xf32, #tpu.memory_space<vmem>>, vector<128x128xf32>
    tpu.vector_store %arg6[%c0_6, %c0_7], %7 {strides = array<i32>} : memref<128x128xf32, #tpu.memory_space<vmem>>, vector<128x128xf32>,
    %c0_i32_8 = arith.constant 0 : i32
    %9 = arith.cmpi eq, %arg1, %c0_i32_8 : i32
    %10 = arith.extui %9 : i1 to i32
    %c0_i32_9 = arith.constant 0 : i32
    %11 = arith.cmpi ne, %10, %c0_i32_9 : i32
    scf.if %11 {
      %c0_10 = arith.constant 0 : index
      %c0_11 = arith.constant 0 : index
      %12 = vector.load %arg6[%c0_10, %c0_11] : memref<128x128xf32, #tpu.memory_space<vmem>>, vector<128x128xf32>
      %c0_12 = arith.constant 0 : index
      %c0_13 = arith.constant 0 : index
      %13 = vector.load %arg4[%c0_12, %c0_13] : memref<1x128xf32, #tpu.memory_space<vmem>>, vector<1x128xf32>
      %14 = vector.broadcast %13 : vector<1x128xf32> to vector<128x128xf32>
      %15 = arith.addf %12, %14 : vector<128x128xf32>
      %c0_14 = arith.constant 0 : index
      %c0_15 = arith.constant 0 : index
      %16 = vector.load %arg5[%c0_14, %c0_15] : memref<128x128xf32, #tpu.memory_space<vmem>>, vector<128x128xf32>
      tpu.vector_store %arg5[%c0_14, %c0_15], %15 {strides = array<i32>} : memref<128x128xf32, #tpu.memory_space<vmem>>, vector<128x128xf32>,
    } else {
    }
    return
  }
  func.func @transform_0(%arg0: i32, %arg1: i32) -> (i32, i32) {
    %c0_i32 = arith.constant 0 : i32
    return %arg0, %arg1 : i32, i32
  }
  func.func @transform_1(%arg0: i32, %arg1: i32) -> (i32, i32) {
    %c0_i32 = arith.constant 0 : i32
    %c0_i32_0 = arith.constant 0 : i32
    return %arg1, %c0_i32 : i32, i32
  }
  func.func @transform_2(%arg0: i32, %arg1: i32) -> (i32, i32) {
    %c0_i32 = arith.constant 0 : i32
    %c0_i32_0 = arith.constant 0 : i32
    %c0_i32_1 = arith.constant 0 : i32
    return %c0_i32, %c0_i32_0 : i32, i32
  }
  func.func @transform_3(%arg0: i32, %arg1: i32) -> (i32, i32) {
    %c0_i32 = arith.constant 0 : i32
    %c0_i32_0 = arith.constant 0 : i32
    return %arg0, %c0_i32 : i32, i32
  }
}

module attributes {stable_mosaic.version = 11 : i64} {
  func.func @_instnorm_lrelu_kernel(%arg0: i32, %arg1: i32, %arg2: memref<1x64x128xf32, #tpu.memory_space<vmem>>, %arg3: memref<1x64x128xf32, #tpu.memory_space<vmem>>) attributes {dimension_semantics = [#tpu.dimension_semantics<parallel>, #tpu.dimension_semantics<parallel>], iteration_bounds = array<i64: 2, 1>, scalar_prefetch = 0 : i64, scratch_operands = 0 : i64, tpu.core_type = #tpu.core_type<tc>, window_params = [{transform_indices = @transform_0, window_bounds = array<i64: 1, 64, 128>}, {transform_indices = @transform_1, window_bounds = array<i64: 1, 64, 128>}]} {
    %c0 = arith.constant 0 : index
    %c0_0 = arith.constant 0 : index
    %c0_1 = arith.constant 0 : index
    %0 = vector.load %arg2[%c0, %c0_0, %c0_1] : memref<1x64x128xf32, #tpu.memory_space<vmem>>, vector<1x64x128xf32>
    %cst = arith.constant dense<0.000000e+00> : vector<1x128xf32>
    %1 = vector.multi_reduction <add>, %0, %cst [1] : vector<1x64x128xf32> to vector<1x128xf32>
    %2 = vector.shape_cast %1 : vector<1x128xf32> to vector<1x1x128xf32>
    %3 = arith.mulf %0, %0 : vector<1x64x128xf32>
    %cst_2 = arith.constant dense<0.000000e+00> : vector<1x128xf32>
    %4 = vector.multi_reduction <add>, %3, %cst_2 [1] : vector<1x64x128xf32> to vector<1x128xf32>
    %5 = vector.shape_cast %4 : vector<1x128xf32> to vector<1x1x128xf32>
    %cst_3 = arith.constant 1.562500e-02 : f32
    %6 = vector.broadcast %cst_3 : f32 to vector<1x1x128xf32>
    %7 = arith.mulf %2, %6 : vector<1x1x128xf32>
    %cst_4 = arith.constant 1.562500e-02 : f32
    %8 = vector.broadcast %cst_4 : f32 to vector<1x1x128xf32>
    %9 = arith.mulf %5, %8 : vector<1x1x128xf32>
    %10 = arith.mulf %7, %7 : vector<1x1x128xf32>
    %11 = arith.subf %9, %10 : vector<1x1x128xf32>
    %cst_5 = arith.constant 0.000000e+00 : f32
    %12 = vector.broadcast %cst_5 : f32 to vector<1x1x128xf32>
    %13 = arith.maximumf %11, %12 : vector<1x1x128xf32>
    %14 = vector.broadcast %7 : vector<1x1x128xf32> to vector<1x64x128xf32>
    %15 = arith.subf %0, %14 : vector<1x64x128xf32>
    %cst_6 = arith.constant 9.99999974E-6 : f32
    %16 = vector.broadcast %cst_6 : f32 to vector<1x1x128xf32>
    %17 = arith.addf %13, %16 : vector<1x1x128xf32>
    %18 = math.rsqrt %17 : vector<1x1x128xf32>
    %19 = vector.broadcast %18 : vector<1x1x128xf32> to vector<1x64x128xf32>
    %20 = arith.mulf %15, %19 : vector<1x64x128xf32>
    %cst_7 = arith.constant 0.000000e+00 : f32
    %21 = vector.broadcast %cst_7 : f32 to vector<1x64x128xf32>
    %22 = arith.cmpf oge, %20, %21 : vector<1x64x128xf32>
    %cst_8 = arith.constant 2.000000e-01 : f32
    %23 = vector.broadcast %cst_8 : f32 to vector<1x64x128xf32>
    %24 = arith.mulf %20, %23 : vector<1x64x128xf32>
    %25 = arith.select %22, %20, %24 : vector<1x64x128xi1>, vector<1x64x128xf32>
    %c0_9 = arith.constant 0 : index
    %c0_10 = arith.constant 0 : index
    %c0_11 = arith.constant 0 : index
    %26 = vector.load %arg3[%c0_9, %c0_10, %c0_11] : memref<1x64x128xf32, #tpu.memory_space<vmem>>, vector<1x64x128xf32>
    tpu.vector_store %arg3[%c0_9, %c0_10, %c0_11], %25 {strides = array<i32>} : memref<1x64x128xf32, #tpu.memory_space<vmem>>, vector<1x64x128xf32>,
    return
  }
  func.func @transform_0(%arg0: i32, %arg1: i32) -> (i32, i32, i32) {
    %c0_i32 = arith.constant 0 : i32
    %c0_i32_0 = arith.constant 0 : i32
    return %arg0, %c0_i32, %arg1 : i32, i32, i32
  }
  func.func @transform_1(%arg0: i32, %arg1: i32) -> (i32, i32, i32) {
    %c0_i32 = arith.constant 0 : i32
    %c0_i32_0 = arith.constant 0 : i32
    return %arg0, %c0_i32, %arg1 : i32, i32, i32
  }
}

module attributes {stable_mosaic.version = 11 : i64} {
  func.func @_conv_matmul_kernel(%arg0: i32, %arg1: i32, %arg2: memref<32x1024xbf16, #tpu.memory_space<vmem>>, %arg3: memref<1024x256xbf16, #tpu.memory_space<vmem>>, %arg4: memref<1x256xf32, #tpu.memory_space<vmem>>, %arg5: memref<32x256xf32, #tpu.memory_space<vmem>>, %arg6: memref<32x256xf32, #tpu.memory_space<vmem>>) attributes {dimension_semantics = [#tpu.dimension_semantics<parallel>, #tpu.dimension_semantics<arbitrary>], iteration_bounds = array<i64: 1, 2>, scalar_prefetch = 0 : i64, scratch_operands = 1 : i64, tpu.core_type = #tpu.core_type<tc>, window_params = [{transform_indices = @transform_0, window_bounds = array<i64: 32, 1024>}, {transform_indices = @transform_1, window_bounds = array<i64: 1024, 256>}, {pipeline_mode = #tpu.pipeline_mode<synchronous>, transform_indices = @transform_2, window_bounds = array<i64: 1, 256>}, {transform_indices = @transform_3, window_bounds = array<i64: 32, 256>}]} {
    %c0_i32 = arith.constant 0 : i32
    %0 = arith.cmpi eq, %arg1, %c0_i32 : i32
    %1 = arith.extui %0 : i1 to i32
    %c0_i32_0 = arith.constant 0 : i32
    %2 = arith.cmpi ne, %1, %c0_i32_0 : i32
    scf.if %2 {
      %cst_9 = arith.constant 0.000000e+00 : f32
      %12 = vector.broadcast %cst_9 : f32 to vector<32x256xf32>
      %c0_10 = arith.constant 0 : index
      %c0_11 = arith.constant 0 : index
      %13 = vector.load %arg6[%c0_10, %c0_11] : memref<32x256xf32, #tpu.memory_space<vmem>>, vector<32x256xf32>
      tpu.vector_store %arg6[%c0_10, %c0_11], %12 {strides = array<i32>} : memref<32x256xf32, #tpu.memory_space<vmem>>, vector<32x256xf32>,
    } else {
    }
    %c0 = arith.constant 0 : index
    %c0_1 = arith.constant 0 : index
    %3 = vector.load %arg6[%c0, %c0_1] : memref<32x256xf32, #tpu.memory_space<vmem>>, vector<32x256xf32>
    %c0_2 = arith.constant 0 : index
    %c0_3 = arith.constant 0 : index
    %4 = vector.load %arg2[%c0_2, %c0_3] : memref<32x1024xbf16, #tpu.memory_space<vmem>>, vector<32x1024xbf16>
    %c0_4 = arith.constant 0 : index
    %c0_5 = arith.constant 0 : index
    %5 = vector.load %arg3[%c0_4, %c0_5] : memref<1024x256xbf16, #tpu.memory_space<vmem>>, vector<1024x256xbf16>
    %cst = arith.constant dense<0.000000e+00> : vector<32x256xf32>
    %6 = tpu.matmul %4, %5, %cst {dimension_numbers = #tpu.dot_dimension_numbers<[1], [0], [0], [1], [0, 0, 1, 1], [], []>} : vector<32x1024xbf16>, vector<1024x256xbf16>, vector<32x256xf32> -> vector<32x256xf32>
    %7 = arith.addf %3, %6 : vector<32x256xf32>
    %c0_6 = arith.constant 0 : index
    %c0_7 = arith.constant 0 : index
    %8 = vector.load %arg6[%c0_6, %c0_7] : memref<32x256xf32, #tpu.memory_space<vmem>>, vector<32x256xf32>
    tpu.vector_store %arg6[%c0_6, %c0_7], %7 {strides = array<i32>} : memref<32x256xf32, #tpu.memory_space<vmem>>, vector<32x256xf32>,
    %c1_i32 = arith.constant 1 : i32
    %9 = arith.cmpi eq, %arg1, %c1_i32 : i32
    %10 = arith.extui %9 : i1 to i32
    %c0_i32_8 = arith.constant 0 : i32
    %11 = arith.cmpi ne, %10, %c0_i32_8 : i32
    scf.if %11 {
      %c0_9 = arith.constant 0 : index
      %c0_10 = arith.constant 0 : index
      %12 = vector.load %arg6[%c0_9, %c0_10] : memref<32x256xf32, #tpu.memory_space<vmem>>, vector<32x256xf32>
      %c0_11 = arith.constant 0 : index
      %c0_12 = arith.constant 0 : index
      %13 = vector.load %arg4[%c0_11, %c0_12] : memref<1x256xf32, #tpu.memory_space<vmem>>, vector<1x256xf32>
      %14 = vector.broadcast %13 : vector<1x256xf32> to vector<32x256xf32>
      %15 = arith.addf %12, %14 : vector<32x256xf32>
      %c0_13 = arith.constant 0 : index
      %c0_14 = arith.constant 0 : index
      %16 = vector.load %arg5[%c0_13, %c0_14] : memref<32x256xf32, #tpu.memory_space<vmem>>, vector<32x256xf32>
      tpu.vector_store %arg5[%c0_13, %c0_14], %15 {strides = array<i32>} : memref<32x256xf32, #tpu.memory_space<vmem>>, vector<32x256xf32>,
    } else {
    }
    return
  }
  func.func @transform_0(%arg0: i32, %arg1: i32) -> (i32, i32) {
    %c0_i32 = arith.constant 0 : i32
    return %arg0, %arg1 : i32, i32
  }
  func.func @transform_1(%arg0: i32, %arg1: i32) -> (i32, i32) {
    %c0_i32 = arith.constant 0 : i32
    %c0_i32_0 = arith.constant 0 : i32
    return %arg1, %c0_i32 : i32, i32
  }
  func.func @transform_2(%arg0: i32, %arg1: i32) -> (i32, i32) {
    %c0_i32 = arith.constant 0 : i32
    %c0_i32_0 = arith.constant 0 : i32
    %c0_i32_1 = arith.constant 0 : i32
    return %c0_i32, %c0_i32_0 : i32, i32
  }
  func.func @transform_3(%arg0: i32, %arg1: i32) -> (i32, i32) {
    %c0_i32 = arith.constant 0 : i32
    %c0_i32_0 = arith.constant 0 : i32
    return %arg0, %c0_i32 : i32, i32
  }
}

module attributes {stable_mosaic.version = 11 : i64} {
  func.func @_instnorm_lrelu_kernel(%arg0: i32, %arg1: i32, %arg2: memref<1x16x256xf32, #tpu.memory_space<vmem>>, %arg3: memref<1x16x256xf32, #tpu.memory_space<vmem>>) attributes {dimension_semantics = [#tpu.dimension_semantics<parallel>, #tpu.dimension_semantics<parallel>], iteration_bounds = array<i64: 2, 1>, scalar_prefetch = 0 : i64, scratch_operands = 0 : i64, tpu.core_type = #tpu.core_type<tc>, window_params = [{transform_indices = @transform_0, window_bounds = array<i64: 1, 16, 256>}, {transform_indices = @transform_1, window_bounds = array<i64: 1, 16, 256>}]} {
    %c0 = arith.constant 0 : index
    %c0_0 = arith.constant 0 : index
    %c0_1 = arith.constant 0 : index
    %0 = vector.load %arg2[%c0, %c0_0, %c0_1] : memref<1x16x256xf32, #tpu.memory_space<vmem>>, vector<1x16x256xf32>
    %cst = arith.constant dense<0.000000e+00> : vector<1x256xf32>
    %1 = vector.multi_reduction <add>, %0, %cst [1] : vector<1x16x256xf32> to vector<1x256xf32>
    %2 = vector.shape_cast %1 : vector<1x256xf32> to vector<1x1x256xf32>
    %3 = arith.mulf %0, %0 : vector<1x16x256xf32>
    %cst_2 = arith.constant dense<0.000000e+00> : vector<1x256xf32>
    %4 = vector.multi_reduction <add>, %3, %cst_2 [1] : vector<1x16x256xf32> to vector<1x256xf32>
    %5 = vector.shape_cast %4 : vector<1x256xf32> to vector<1x1x256xf32>
    %cst_3 = arith.constant 6.250000e-02 : f32
    %6 = vector.broadcast %cst_3 : f32 to vector<1x1x256xf32>
    %7 = arith.mulf %2, %6 : vector<1x1x256xf32>
    %cst_4 = arith.constant 6.250000e-02 : f32
    %8 = vector.broadcast %cst_4 : f32 to vector<1x1x256xf32>
    %9 = arith.mulf %5, %8 : vector<1x1x256xf32>
    %10 = arith.mulf %7, %7 : vector<1x1x256xf32>
    %11 = arith.subf %9, %10 : vector<1x1x256xf32>
    %cst_5 = arith.constant 0.000000e+00 : f32
    %12 = vector.broadcast %cst_5 : f32 to vector<1x1x256xf32>
    %13 = arith.maximumf %11, %12 : vector<1x1x256xf32>
    %14 = vector.broadcast %7 : vector<1x1x256xf32> to vector<1x16x256xf32>
    %15 = arith.subf %0, %14 : vector<1x16x256xf32>
    %cst_6 = arith.constant 9.99999974E-6 : f32
    %16 = vector.broadcast %cst_6 : f32 to vector<1x1x256xf32>
    %17 = arith.addf %13, %16 : vector<1x1x256xf32>
    %18 = math.rsqrt %17 : vector<1x1x256xf32>
    %19 = vector.broadcast %18 : vector<1x1x256xf32> to vector<1x16x256xf32>
    %20 = arith.mulf %15, %19 : vector<1x16x256xf32>
    %cst_7 = arith.constant 0.000000e+00 : f32
    %21 = vector.broadcast %cst_7 : f32 to vector<1x16x256xf32>
    %22 = arith.cmpf oge, %20, %21 : vector<1x16x256xf32>
    %cst_8 = arith.constant 2.000000e-01 : f32
    %23 = vector.broadcast %cst_8 : f32 to vector<1x16x256xf32>
    %24 = arith.mulf %20, %23 : vector<1x16x256xf32>
    %25 = arith.select %22, %20, %24 : vector<1x16x256xi1>, vector<1x16x256xf32>
    %c0_9 = arith.constant 0 : index
    %c0_10 = arith.constant 0 : index
    %c0_11 = arith.constant 0 : index
    %26 = vector.load %arg3[%c0_9, %c0_10, %c0_11] : memref<1x16x256xf32, #tpu.memory_space<vmem>>, vector<1x16x256xf32>
    tpu.vector_store %arg3[%c0_9, %c0_10, %c0_11], %25 {strides = array<i32>} : memref<1x16x256xf32, #tpu.memory_space<vmem>>, vector<1x16x256xf32>,
    return
  }
  func.func @transform_0(%arg0: i32, %arg1: i32) -> (i32, i32, i32) {
    %c0_i32 = arith.constant 0 : i32
    %c0_i32_0 = arith.constant 0 : i32
    return %arg0, %c0_i32, %arg1 : i32, i32, i32
  }
  func.func @transform_1(%arg0: i32, %arg1: i32) -> (i32, i32, i32) {
    %c0_i32 = arith.constant 0 : i32
    %c0_i32_0 = arith.constant 0 : i32
    return %arg0, %c0_i32, %arg1 : i32, i32, i32
  }
}

module attributes {stable_mosaic.version = 11 : i64} {
  func.func @_conv_matmul_kernel(%arg0: i32, %arg1: i32, %arg2: memref<24x1024xbf16, #tpu.memory_space<vmem>>, %arg3: memref<1024x512xbf16, #tpu.memory_space<vmem>>, %arg4: memref<1x512xf32, #tpu.memory_space<vmem>>, %arg5: memref<24x512xf32, #tpu.memory_space<vmem>>, %arg6: memref<24x512xf32, #tpu.memory_space<vmem>>) attributes {dimension_semantics = [#tpu.dimension_semantics<parallel>, #tpu.dimension_semantics<arbitrary>], iteration_bounds = array<i64: 1, 4>, scalar_prefetch = 0 : i64, scratch_operands = 1 : i64, tpu.core_type = #tpu.core_type<tc>, window_params = [{transform_indices = @transform_0, window_bounds = array<i64: 24, 1024>}, {transform_indices = @transform_1, window_bounds = array<i64: 1024, 512>}, {pipeline_mode = #tpu.pipeline_mode<synchronous>, transform_indices = @transform_2, window_bounds = array<i64: 1, 512>}, {transform_indices = @transform_3, window_bounds = array<i64: 24, 512>}]} {
    %c0_i32 = arith.constant 0 : i32
    %0 = arith.cmpi eq, %arg1, %c0_i32 : i32
    %1 = arith.extui %0 : i1 to i32
    %c0_i32_0 = arith.constant 0 : i32
    %2 = arith.cmpi ne, %1, %c0_i32_0 : i32
    scf.if %2 {
      %cst_9 = arith.constant 0.000000e+00 : f32
      %12 = vector.broadcast %cst_9 : f32 to vector<24x512xf32>
      %c0_10 = arith.constant 0 : index
      %c0_11 = arith.constant 0 : index
      %13 = vector.load %arg6[%c0_10, %c0_11] : memref<24x512xf32, #tpu.memory_space<vmem>>, vector<24x512xf32>
      tpu.vector_store %arg6[%c0_10, %c0_11], %12 {strides = array<i32>} : memref<24x512xf32, #tpu.memory_space<vmem>>, vector<24x512xf32>,
    } else {
    }
    %c0 = arith.constant 0 : index
    %c0_1 = arith.constant 0 : index
    %3 = vector.load %arg6[%c0, %c0_1] : memref<24x512xf32, #tpu.memory_space<vmem>>, vector<24x512xf32>
    %c0_2 = arith.constant 0 : index
    %c0_3 = arith.constant 0 : index
    %4 = vector.load %arg2[%c0_2, %c0_3] : memref<24x1024xbf16, #tpu.memory_space<vmem>>, vector<24x1024xbf16>
    %c0_4 = arith.constant 0 : index
    %c0_5 = arith.constant 0 : index
    %5 = vector.load %arg3[%c0_4, %c0_5] : memref<1024x512xbf16, #tpu.memory_space<vmem>>, vector<1024x512xbf16>
    %cst = arith.constant dense<0.000000e+00> : vector<24x512xf32>
    %6 = tpu.matmul %4, %5, %cst {dimension_numbers = #tpu.dot_dimension_numbers<[1], [0], [0], [1], [0, 0, 1, 1], [], []>} : vector<24x1024xbf16>, vector<1024x512xbf16>, vector<24x512xf32> -> vector<24x512xf32>
    %7 = arith.addf %3, %6 : vector<24x512xf32>
    %c0_6 = arith.constant 0 : index
    %c0_7 = arith.constant 0 : index
    %8 = vector.load %arg6[%c0_6, %c0_7] : memref<24x512xf32, #tpu.memory_space<vmem>>, vector<24x512xf32>
    tpu.vector_store %arg6[%c0_6, %c0_7], %7 {strides = array<i32>} : memref<24x512xf32, #tpu.memory_space<vmem>>, vector<24x512xf32>,
    %c3_i32 = arith.constant 3 : i32
    %9 = arith.cmpi eq, %arg1, %c3_i32 : i32
    %10 = arith.extui %9 : i1 to i32
    %c0_i32_8 = arith.constant 0 : i32
    %11 = arith.cmpi ne, %10, %c0_i32_8 : i32
    scf.if %11 {
      %c0_9 = arith.constant 0 : index
      %c0_10 = arith.constant 0 : index
      %12 = vector.load %arg6[%c0_9, %c0_10] : memref<24x512xf32, #tpu.memory_space<vmem>>, vector<24x512xf32>
      %c0_11 = arith.constant 0 : index
      %c0_12 = arith.constant 0 : index
      %13 = vector.load %arg4[%c0_11, %c0_12] : memref<1x512xf32, #tpu.memory_space<vmem>>, vector<1x512xf32>
      %14 = vector.broadcast %13 : vector<1x512xf32> to vector<24x512xf32>
      %15 = arith.addf %12, %14 : vector<24x512xf32>
      %c0_13 = arith.constant 0 : index
      %c0_14 = arith.constant 0 : index
      %16 = vector.load %arg5[%c0_13, %c0_14] : memref<24x512xf32, #tpu.memory_space<vmem>>, vector<24x512xf32>
      tpu.vector_store %arg5[%c0_13, %c0_14], %15 {strides = array<i32>} : memref<24x512xf32, #tpu.memory_space<vmem>>, vector<24x512xf32>,
    } else {
    }
    return
  }
  func.func @transform_0(%arg0: i32, %arg1: i32) -> (i32, i32) {
    %c0_i32 = arith.constant 0 : i32
    return %arg0, %arg1 : i32, i32
  }
  func.func @transform_1(%arg0: i32, %arg1: i32) -> (i32, i32) {
    %c0_i32 = arith.constant 0 : i32
    %c0_i32_0 = arith.constant 0 : i32
    return %arg1, %c0_i32 : i32, i32
  }
  func.func @transform_2(%arg0: i32, %arg1: i32) -> (i32, i32) {
    %c0_i32 = arith.constant 0 : i32
    %c0_i32_0 = arith.constant 0 : i32
    %c0_i32_1 = arith.constant 0 : i32
    return %c0_i32, %c0_i32_0 : i32, i32
  }
  func.func @transform_3(%arg0: i32, %arg1: i32) -> (i32, i32) {
    %c0_i32 = arith.constant 0 : i32
    %c0_i32_0 = arith.constant 0 : i32
    return %arg0, %c0_i32 : i32, i32
  }
}

module attributes {stable_mosaic.version = 11 : i64} {
  func.func @_instnorm_lrelu_kernel(%arg0: i32, %arg1: i32, %arg2: memref<1x9x256xf32, #tpu.memory_space<vmem>>, %arg3: memref<1x9x256xf32, #tpu.memory_space<vmem>>) attributes {dimension_semantics = [#tpu.dimension_semantics<parallel>, #tpu.dimension_semantics<parallel>], iteration_bounds = array<i64: 2, 2>, scalar_prefetch = 0 : i64, scratch_operands = 0 : i64, tpu.core_type = #tpu.core_type<tc>, window_params = [{transform_indices = @transform_0, window_bounds = array<i64: 1, 9, 256>}, {transform_indices = @transform_1, window_bounds = array<i64: 1, 9, 256>}]} {
    %c0 = arith.constant 0 : index
    %c0_0 = arith.constant 0 : index
    %c0_1 = arith.constant 0 : index
    %0 = vector.load %arg2[%c0, %c0_0, %c0_1] : memref<1x9x256xf32, #tpu.memory_space<vmem>>, vector<1x9x256xf32>
    %cst = arith.constant dense<0.000000e+00> : vector<1x256xf32>
    %1 = vector.multi_reduction <add>, %0, %cst [1] : vector<1x9x256xf32> to vector<1x256xf32>
    %2 = vector.shape_cast %1 : vector<1x256xf32> to vector<1x1x256xf32>
    %3 = arith.mulf %0, %0 : vector<1x9x256xf32>
    %cst_2 = arith.constant dense<0.000000e+00> : vector<1x256xf32>
    %4 = vector.multi_reduction <add>, %3, %cst_2 [1] : vector<1x9x256xf32> to vector<1x256xf32>
    %5 = vector.shape_cast %4 : vector<1x256xf32> to vector<1x1x256xf32>
    %cst_3 = arith.constant 0.111111112 : f32
    %6 = vector.broadcast %cst_3 : f32 to vector<1x1x256xf32>
    %7 = arith.mulf %2, %6 : vector<1x1x256xf32>
    %cst_4 = arith.constant 0.111111112 : f32
    %8 = vector.broadcast %cst_4 : f32 to vector<1x1x256xf32>
    %9 = arith.mulf %5, %8 : vector<1x1x256xf32>
    %10 = arith.mulf %7, %7 : vector<1x1x256xf32>
    %11 = arith.subf %9, %10 : vector<1x1x256xf32>
    %cst_5 = arith.constant 0.000000e+00 : f32
    %12 = vector.broadcast %cst_5 : f32 to vector<1x1x256xf32>
    %13 = arith.maximumf %11, %12 : vector<1x1x256xf32>
    %14 = vector.broadcast %7 : vector<1x1x256xf32> to vector<1x9x256xf32>
    %15 = arith.subf %0, %14 : vector<1x9x256xf32>
    %cst_6 = arith.constant 9.99999974E-6 : f32
    %16 = vector.broadcast %cst_6 : f32 to vector<1x1x256xf32>
    %17 = arith.addf %13, %16 : vector<1x1x256xf32>
    %18 = math.rsqrt %17 : vector<1x1x256xf32>
    %19 = vector.broadcast %18 : vector<1x1x256xf32> to vector<1x9x256xf32>
    %20 = arith.mulf %15, %19 : vector<1x9x256xf32>
    %cst_7 = arith.constant 0.000000e+00 : f32
    %21 = vector.broadcast %cst_7 : f32 to vector<1x9x256xf32>
    %22 = arith.cmpf oge, %20, %21 : vector<1x9x256xf32>
    %cst_8 = arith.constant 2.000000e-01 : f32
    %23 = vector.broadcast %cst_8 : f32 to vector<1x9x256xf32>
    %24 = arith.mulf %20, %23 : vector<1x9x256xf32>
    %25 = arith.select %22, %20, %24 : vector<1x9x256xi1>, vector<1x9x256xf32>
    %c0_9 = arith.constant 0 : index
    %c0_10 = arith.constant 0 : index
    %c0_11 = arith.constant 0 : index
    %26 = vector.load %arg3[%c0_9, %c0_10, %c0_11] : memref<1x9x256xf32, #tpu.memory_space<vmem>>, vector<1x9x256xf32>
    tpu.vector_store %arg3[%c0_9, %c0_10, %c0_11], %25 {strides = array<i32>} : memref<1x9x256xf32, #tpu.memory_space<vmem>>, vector<1x9x256xf32>,
    return
  }
  func.func @transform_0(%arg0: i32, %arg1: i32) -> (i32, i32, i32) {
    %c0_i32 = arith.constant 0 : i32
    %c0_i32_0 = arith.constant 0 : i32
    return %arg0, %c0_i32, %arg1 : i32, i32, i32
  }
  func.func @transform_1(%arg0: i32, %arg1: i32) -> (i32, i32, i32) {
    %c0_i32 = arith.constant 0 : i32
    %c0_i32_0 = arith.constant 0 : i32
    return %arg0, %c0_i32, %arg1 : i32, i32, i32
  }
}

module attributes {stable_mosaic.version = 11 : i64} {
  func.func @_conv_matmul_kernel(%arg0: i32, %arg1: i32, %arg2: memref<8x1024xbf16, #tpu.memory_space<vmem>>, %arg3: memref<1024x128xbf16, #tpu.memory_space<vmem>>, %arg4: memref<1x128xf32, #tpu.memory_space<vmem>>, %arg5: memref<8x128xf32, #tpu.memory_space<vmem>>, %arg6: memref<8x128xf32, #tpu.memory_space<vmem>>) attributes {dimension_semantics = [#tpu.dimension_semantics<parallel>, #tpu.dimension_semantics<arbitrary>], iteration_bounds = array<i64: 1, 8>, scalar_prefetch = 0 : i64, scratch_operands = 1 : i64, tpu.core_type = #tpu.core_type<tc>, window_params = [{transform_indices = @transform_0, window_bounds = array<i64: 8, 1024>}, {transform_indices = @transform_1, window_bounds = array<i64: 1024, 128>}, {pipeline_mode = #tpu.pipeline_mode<synchronous>, transform_indices = @transform_2, window_bounds = array<i64: 1, 128>}, {transform_indices = @transform_3, window_bounds = array<i64: 8, 128>}]} {
    %c0_i32 = arith.constant 0 : i32
    %0 = arith.cmpi eq, %arg1, %c0_i32 : i32
    %1 = arith.extui %0 : i1 to i32
    %c0_i32_0 = arith.constant 0 : i32
    %2 = arith.cmpi ne, %1, %c0_i32_0 : i32
    scf.if %2 {
      %cst_9 = arith.constant 0.000000e+00 : f32
      %12 = vector.broadcast %cst_9 : f32 to vector<8x128xf32>
      %c0_10 = arith.constant 0 : index
      %c0_11 = arith.constant 0 : index
      %13 = vector.load %arg6[%c0_10, %c0_11] : memref<8x128xf32, #tpu.memory_space<vmem>>, vector<8x128xf32>
      tpu.vector_store %arg6[%c0_10, %c0_11], %12 {strides = array<i32>} : memref<8x128xf32, #tpu.memory_space<vmem>>, vector<8x128xf32>,
    } else {
    }
    %c0 = arith.constant 0 : index
    %c0_1 = arith.constant 0 : index
    %3 = vector.load %arg6[%c0, %c0_1] : memref<8x128xf32, #tpu.memory_space<vmem>>, vector<8x128xf32>
    %c0_2 = arith.constant 0 : index
    %c0_3 = arith.constant 0 : index
    %4 = vector.load %arg2[%c0_2, %c0_3] : memref<8x1024xbf16, #tpu.memory_space<vmem>>, vector<8x1024xbf16>
    %c0_4 = arith.constant 0 : index
    %c0_5 = arith.constant 0 : index
    %5 = vector.load %arg3[%c0_4, %c0_5] : memref<1024x128xbf16, #tpu.memory_space<vmem>>, vector<1024x128xbf16>
    %cst = arith.constant dense<0.000000e+00> : vector<8x128xf32>
    %6 = tpu.matmul %4, %5, %cst {dimension_numbers = #tpu.dot_dimension_numbers<[1], [0], [0], [1], [0, 0, 1, 1], [], []>} : vector<8x1024xbf16>, vector<1024x128xbf16>, vector<8x128xf32> -> vector<8x128xf32>
    %7 = arith.addf %3, %6 : vector<8x128xf32>
    %c0_6 = arith.constant 0 : index
    %c0_7 = arith.constant 0 : index
    %8 = vector.load %arg6[%c0_6, %c0_7] : memref<8x128xf32, #tpu.memory_space<vmem>>, vector<8x128xf32>
    tpu.vector_store %arg6[%c0_6, %c0_7], %7 {strides = array<i32>} : memref<8x128xf32, #tpu.memory_space<vmem>>, vector<8x128xf32>,
    %c7_i32 = arith.constant 7 : i32
    %9 = arith.cmpi eq, %arg1, %c7_i32 : i32
    %10 = arith.extui %9 : i1 to i32
    %c0_i32_8 = arith.constant 0 : i32
    %11 = arith.cmpi ne, %10, %c0_i32_8 : i32
    scf.if %11 {
      %c0_9 = arith.constant 0 : index
      %c0_10 = arith.constant 0 : index
      %12 = vector.load %arg6[%c0_9, %c0_10] : memref<8x128xf32, #tpu.memory_space<vmem>>, vector<8x128xf32>
      %c0_11 = arith.constant 0 : index
      %c0_12 = arith.constant 0 : index
      %13 = vector.load %arg4[%c0_11, %c0_12] : memref<1x128xf32, #tpu.memory_space<vmem>>, vector<1x128xf32>
      %14 = vector.broadcast %13 : vector<1x128xf32> to vector<8x128xf32>
      %15 = arith.addf %12, %14 : vector<8x128xf32>
      %c0_13 = arith.constant 0 : index
      %c0_14 = arith.constant 0 : index
      %16 = vector.load %arg5[%c0_13, %c0_14] : memref<8x128xf32, #tpu.memory_space<vmem>>, vector<8x128xf32>
      tpu.vector_store %arg5[%c0_13, %c0_14], %15 {strides = array<i32>} : memref<8x128xf32, #tpu.memory_space<vmem>>, vector<8x128xf32>,
    } else {
    }
    return
  }
  func.func @transform_0(%arg0: i32, %arg1: i32) -> (i32, i32) {
    %c0_i32 = arith.constant 0 : i32
    return %arg0, %arg1 : i32, i32
  }
  func.func @transform_1(%arg0: i32, %arg1: i32) -> (i32, i32) {
    %c0_i32 = arith.constant 0 : i32
    %c0_i32_0 = arith.constant 0 : i32
    return %arg1, %c0_i32 : i32, i32
  }
  func.func @transform_2(%arg0: i32, %arg1: i32) -> (i32, i32) {
    %c0_i32 = arith.constant 0 : i32
    %c0_i32_0 = arith.constant 0 : i32
    %c0_i32_1 = arith.constant 0 : i32
    return %c0_i32, %c0_i32_0 : i32, i32
  }
  func.func @transform_3(%arg0: i32, %arg1: i32) -> (i32, i32) {
    %c0_i32 = arith.constant 0 : i32
    %c0_i32_0 = arith.constant 0 : i32
    return %arg0, %c0_i32 : i32, i32
  }
}

</mosaic_0001>

<bundles_post_ra>
// kernel: discriminator_forward.8
= control target key start
LH: loop header
LB: loop body
LE: loop exit
PB: predicated region body
PF: predicated region fallthrough
CT: control target
= control target key end

     0   :  { %s1207_s12 = smov 0   ;;  %s1209_s13 = smov 0   ;;  %s1357_s0 = inlined_call_operand.vmem [shape: bf16[512,128], index: 0, kind: input, shape index: {}]   ;;  %s1358_s1 = inlined_call_operand.vmem [shape: bf16[128,128], index: 1, kind: input, shape index: {}]   ;;  %s1359_s2 = inlined_call_operand.vmem [shape: f32[1,128], index: 2, kind: input, shape index: {}]   ;;  %s1360_s3 = inlined_call_operand.vmem [shape: f32[512,128], index: 3, kind: output, shape index: {}]  }
   0x1   :  { %s1211_s14 = smov 0  }
   0x2 LB: > { %s25_s15 = sadd.s32 1, %s1181_s13  ;;  %p995_p0 = scmp.ge.s32.totalorder %s1185_s14, 1  ;;  %s1185_s14 = sphi %s1211_s14, %s13_s14   ;;  %s1181_s13 = sphi %s1209_s13, %s1362_s13   ;;  %s1177_s12 = sphi %s1207_s12, %s1361_s12  }
   0x3   : > { %p27_p1 = scmp.ge.s32.totalorder %s25_s15, 2  ;;  %p166_p2 = scmp.lt.s32.totalorder %s1185_s14, 3 }
   0x5   : > { %s1364_s15 = smov (%p27_p1, %s25_s15), 0  ;;  %p167_p3 = pnand %p995_p0, %p166_p2 }
   0x6   : > { %v1139_v0 = vld [vmem:[%s1358_s1] sm:$0xff] (!%p167_p3)   ;;  %s996_s18 = sshll.u32 (!%p167_p3), %s1177_s12, 5  ;;  %v1140_v1 = vld [vmem:[%s1358_s1 + $0x8] sm:$0xff] (!%p167_p3)   ;;  %v1141_v2 = vld [vmem:[%s1358_s1 + $0x10] sm:$0xff] (!%p167_p3)  }
   0x7   : > { %170 = sbr.rel (%p167_p3) target bundleno = 288 (0x120), region = 32  ;;  %p199_p4 = scmp.lt.s32.totalorder (!%p167_p3), %s996_s18, 63  ;;  %1051 = vmatprep.subr.bf16.mxu0 (!%p167_p3), %v1139_v0  ;;  %1099 = vmatprep.subr.bf16.mxu1 (!%p167_p3), %v1139_v0  ;;  %v1142_v3 = vld [vmem:[%s1358_s1 + $0x18] sm:$0xff] (!%p167_p3)   ;;  %v1143_v6 = vld [vmem:[%s1358_s1 + $0x20] sm:$0xff] (!%p167_p3)   ;;  %v1144_v7 = vld [vmem:[%s1358_s1 + $0x28] sm:$0xff] (!%p167_p3)  }
   0x8   : > { %1052 = vmatpush3.bf16.msra.mxu0 (!%p167_p3), %v1139_v0  ;;  %1107 = vmatpush3.bf16.msra.mxu1 (!%p167_p3), %v1139_v0  ;;  %v1145_v8 = vld [vmem:[%s1358_s1 + $0x30] sm:$0xff] (!%p167_p3)   ;;  %v1146_v9 = vld [vmem:[%s1358_s1 + $0x38] sm:$0xff] (!%p167_p3)   ;;  %v1276_v24 = vld [vmem:[%s1359_s2] ss:$0 sm:$0xff] (!%p167_p3) }
   0x9   : > { %1053 = vmatprep.subr.bf16.mxu0 (!%p167_p3), %v1140_v1  ;;  %1100 = vmatprep.subr.bf16.mxu1 (!%p167_p3), %v1140_v1 }
   0xc   : > { %1054 = vmatpush3.bf16.msra.mxu0 (!%p167_p3), %v1140_v1  ;;  %1108 = vmatpush3.bf16.msra.mxu1 (!%p167_p3), %v1140_v1 }
   0xd   : > { %1055 = vmatprep.subr.bf16.mxu0 (!%p167_p3), %v1141_v2  ;;  %1101 = vmatprep.subr.bf16.mxu1 (!%p167_p3), %v1141_v2 }
   0xe   : > { %s1366_s18 = smov (!%p199_p4, %s996_s18), 63 }
   0xf   : > { %s997_s23 = sshll.u32 %s1366_s18, 2  ;;  %s999_s12 = sshll.u32 %s1366_s18, 3 }
  0x10   : > { %s1240_s26 = scalar_lea.vmem %s1357_s0, %s997_s23  ;;  %1056 = vmatpush3.bf16.msra.mxu0 %v1141_v2  ;;  %1109 = vmatpush3.bf16.msra.mxu1 %v1141_v2  ;;  %s1286_s19 = scalar_lea.vmem %s1360_s3, %s999_s12 }
  0x11   : > { %v1147_v4 = vld [vmem:[%s1240_s26] sm:$0xff]   ;;  %1057 = vmatprep.subr.bf16.mxu0 %v1142_v3  ;;  %1102 = vmatprep.subr.bf16.mxu1 %v1142_v3  ;;  %v1149_v10 = vld [vmem:[%s1240_s26 + $0x8] sm:$0xff]   ;;  %v1151_v12 = vld [vmem:[%s1240_s26 + $0x10] sm:$0xff]  }
  0x12   : > { %v1148_v5 = vld [vmem:[%s1240_s26 + $0x40] sm:$0xff]   ;;  %1067 = vmatprep.mubr.bf16.mxu0 %v1147_v4  ;;  %v1150_v11 = vld [vmem:[%s1240_s26 + $0x48] sm:$0xff]   ;;  %v1152_v13 = vld [vmem:[%s1240_s26 + $0x50] sm:$0xff]  }
  0x13   : > { %1083 = vmatprep.mubr.bf16.mxu1 %v1148_v5  ;;  %v1153_v14 = vld [vmem:[%s1240_s26 + $0x18] sm:$0xff]   ;;  %v1155_v16 = vld [vmem:[%s1240_s26 + $0x20] sm:$0xff]   ;;  %v1157_v18 = vld [vmem:[%s1240_s26 + $0x28] sm:$0xff]  }
  0x14   : > { %1058 = vmatpush3.bf16.msra.mxu0 %v1142_v3  ;;  %1110 = vmatpush3.bf16.msra.mxu1 %v1142_v3  ;;  %v1154_v15 = vld [vmem:[%s1240_s26 + $0x58] sm:$0xff]   ;;  %v1156_v17 = vld [vmem:[%s1240_s26 + $0x60] sm:$0xff]   ;;  %v1158_v19 = vld [vmem:[%s1240_s26 + $0x68] sm:$0xff]  }
  0x15   : > { %1059 = vmatprep.subr.bf16.mxu0 %v1143_v6  ;;  %1103 = vmatprep.subr.bf16.mxu1 %v1143_v6  ;;  %v1159_v20 = vld [vmem:[%s1240_s26 + $0x30] sm:$0xff]   ;;  %v1161_v22 = vld [vmem:[%s1240_s26 + $0x38] sm:$0xff]  }
  0x16   : > { %v1160_v21 = vld [vmem:[%s1240_s26 + $0x70] sm:$0xff]   ;;  %v1162_v23 = vld [vmem:[%s1240_s26 + $0x78] sm:$0xff]  }
  0x18   : > { %1060 = vmatpush3.bf16.msra.mxu0 %v1143_v6  ;;  %1111 = vmatpush3.bf16.msra.mxu1 %v1143_v6 }
  0x19   : > { %1061 = vmatprep.subr.bf16.mxu0 %v1144_v7  ;;  %1104 = vmatprep.subr.bf16.mxu1 %v1144_v7 }
  0x1c   : > { %1062 = vmatpush3.bf16.msra.mxu0 %v1144_v7  ;;  %1112 = vmatpush3.bf16.msra.mxu1 %v1144_v7 }
  0x1d   : > { %1063 = vmatprep.subr.bf16.mxu0 %v1145_v8  ;;  %1105 = vmatprep.subr.bf16.mxu1 %v1145_v8 }
  0x20   : > { %1064 = vmatpush3.bf16.msra.mxu0 %v1145_v8  ;;  %1113 = vmatpush3.bf16.msra.mxu1 %v1145_v8 }
  0x21   : > { %1065 = vmatprep.subr.bf16.mxu0 %v1146_v9  ;;  %1106 = vmatprep.subr.bf16.mxu1 %v1146_v9 }
  0x24   : > { %1066 = vmatpush3.bf16.msra.mxu0 %v1146_v9  ;;  %1114 = vmatpush3.bf16.msra.mxu1 %v1146_v9 }
  0x27   : > { %1068 = vmatmul.mubr.bf16.vlgmr.msra.gmra.mrb[0].mxu0 %v1149_v10  ;;  %1084 = vmatmul.mubr.bf16.vlgmr.msra.gmra.mrb[0].mxu1 %v1150_v11 }
  0x28   : > { %1071 = vmatprep.mubr.bf16.mxu0 %v1151_v12  ;;  %1087 = vmatprep.mubr.bf16.mxu1 %v1152_v13 }
  0x2f   : > { %1072 = vmatmul.mubr.bf16.gmra.mrb[4].mxu0 %v1153_v14  ;;  %1088 = vmatmul.mubr.bf16.gmra.mrb[4].mxu1 %v1154_v15 }
  0x30   : > { %1075 = vmatprep.mubr.bf16.mxu0 %v1155_v16  ;;  %1091 = vmatprep.mubr.bf16.mxu1 %v1156_v17 }
  0x37   : > { %1076 = vmatmul.mubr.bf16.gmra.mrb[8].mxu0 %v1157_v18  ;;  %1092 = vmatmul.mubr.bf16.gmra.mrb[8].mxu1 %v1158_v19 }
  0x38   : > { %1079 = vmatprep.mubr.bf16.mxu0 %v1159_v20  ;;  %1095 = vmatprep.mubr.bf16.mxu1 %v1160_v21 }
  0x3f   : > { %1080 = vmatmul.mubr.bf16.gmra.mrb[12].mxu0 %v1161_v22  ;;  %1096 = vmatmul.mubr.bf16.gmra.mrb[12].mxu1 %v1162_v23 }
  0xfa   : > { %v1069_v25 = vpop.f32.mrb[0].mxu0  ;;  %v1085_v26 = vpop.f32.mrb[0].mxu1 }
  0xfb   : > { %v749_v27 = vadd.f32 %v1069_v25, %v1276_v24  ;;  %v765_v28 = vadd.f32 %v1085_v26, %v1276_v24  ;;  %v514_v29 = vpop.f32.mrb[1].mxu0  ;;  %v578_v30 = vpop.f32.mrb[1].mxu1 }
  0xfc   : > { %v747_v31 = vadd.f32 %v1276_v24, %v514_v29  ;;  %v763_v32 = vadd.f32 %v1276_v24, %v578_v30  ;;  %v1070_v33 = vpop.f32.mrb[2].mxu0  ;;  %v1086_v34 = vpop.f32.mrb[2].mxu1 }
  0xfd   : > { %vm781_vm0 = vcmp.ge.f32.partialorder %v749_v27, 0.0  ;;  %v813_v35 = vmul.f32 0.2, %v749_v27  ;;  %vm797_vm1 = vcmp.ge.f32.partialorder %v765_v28, 0.0  ;;  %v829_v36 = vmul.f32 0.2, %v765_v28 }
  0xfe   : > { %vm779_vm2 = vcmp.ge.f32.partialorder %v747_v31, 0.0  ;;  %v811_v37 = vmul.f32 0.2, %v747_v31  ;;  %vm795_vm3 = vcmp.ge.f32.partialorder %v763_v32, 0.0  ;;  %v827_v38 = vmul.f32 0.2, %v763_v32 }
  0xff   : > { %v845_v39 = vsel %vm781_vm0, %v749_v27, %v813_v35  ;;  %v861_v40 = vsel %vm797_vm1, %v765_v28, %v829_v36  ;;  %v750_v41 = vadd.f32 %v1070_v33, %v1276_v24  ;;  %v766_v42 = vadd.f32 %v1086_v34, %v1276_v24  ;;  %v517_v43 = vpop.f32.mrb[3].mxu0  ;;  %v581_v44 = vpop.f32.mrb[3].mxu1 }
 0x100   : > { %877 = vst [vmem:[%s1286_s19 + $0x10] sm:$0xff] %v845_v39  ;;  %893 = vst [vmem:[%s1286_s19 + $0x90] sm:$0xff] %v861_v40  ;;  %v843_v45 = vsel %vm779_vm2, %v747_v31, %v811_v37  ;;  %v859_v46 = vsel %vm795_vm3, %v763_v32, %v827_v38  ;;  %v748_v47 = vadd.f32 %v1276_v24, %v517_v43 }
 0x101   : > { %v764_v48 = vadd.f32 %v1276_v24, %v581_v44  ;;  %875 = vst [vmem:[%s1286_s19] sm:$0xff] %v843_v45  ;;  %891 = vst [vmem:[%s1286_s19 + $0x80] sm:$0xff] %v859_v46  ;;  %vm782_vm4 = vcmp.ge.f32.partialorder %v750_v41, 0.0  ;;  %v814_v49 = vmul.f32 0.2, %v750_v41  ;;  %vm798_vm5 = vcmp.ge.f32.partialorder %v766_v42, 0.0 }
 0x102   : > { %v830_v50 = vmul.f32 0.2, %v766_v42  ;;  %vm780_vm6 = vcmp.ge.f32.partialorder %v748_v47, 0.0  ;;  %v812_v51 = vmul.f32 0.2, %v748_v47  ;;  %v1073_v55 = vpop.f32.mrb[4].mxu0 }
 0x103   : > { %vm796_vm7 = vcmp.ge.f32.partialorder %v764_v48, 0.0  ;;  %v828_v52 = vmul.f32 0.2, %v764_v48  ;;  %v846_v53 = vsel %vm782_vm4, %v750_v41, %v814_v49  ;;  %v1089_v56 = vpop.f32.mrb[4].mxu1  ;;  %v753_v59 = vadd.f32 %v1073_v55, %v1276_v24  ;;  %v530_v61 = vpop.f32.mrb[5].mxu0 }
 0x104   : > { %v862_v54 = vsel %vm798_vm5, %v766_v42, %v830_v50  ;;  %878 = vst [vmem:[%s1286_s19 + $0x18] sm:$0xff] %v846_v53  ;;  %v844_v57 = vsel %vm780_vm6, %v748_v47, %v812_v51  ;;  %v769_v60 = vadd.f32 %v1089_v56, %v1276_v24  ;;  %v594_v62 = vpop.f32.mrb[5].mxu1  ;;  %v751_v63 = vadd.f32 %v1276_v24, %v530_v61  ;;  %v1074_v1 = vpop.f32.mrb[6].mxu0 }
 0x105   : > { %894 = vst [vmem:[%s1286_s19 + $0x98] sm:$0xff] %v862_v54  ;;  %v860_v58 = vsel %vm796_vm7, %v764_v48, %v828_v52  ;;  %876 = vst [vmem:[%s1286_s19 + $0x8] sm:$0xff] %v844_v57  ;;  %v767_v0 = vadd.f32 %v1276_v24, %v594_v62  ;;  %v1090_v2 = vpop.f32.mrb[6].mxu1  ;;  %vm785_vm8 = vcmp.ge.f32.partialorder %v753_v59, 0.0  ;;  %v817_v3 = vmul.f32 0.2, %v753_v59 }
 0x106   : > { %892 = vst [vmem:[%s1286_s19 + $0x88] sm:$0xff] %v860_v58  ;;  %vm801_vm9 = vcmp.ge.f32.partialorder %v769_v60, 0.0  ;;  %v833_v4 = vmul.f32 0.2, %v769_v60  ;;  %vm783_vm10 = vcmp.ge.f32.partialorder %v751_v63, 0.0  ;;  %v754_v9 = vadd.f32 %v1074_v1, %v1276_v24  ;;  %v533_v11 = vpop.f32.mrb[7].mxu0 }
 0x107   : > { %v815_v5 = vmul.f32 0.2, %v751_v63  ;;  %vm799_vm11 = vcmp.ge.f32.partialorder %v767_v0, 0.0  ;;  %v831_v6 = vmul.f32 0.2, %v767_v0  ;;  %v849_v7 = vsel %vm785_vm8, %v753_v59, %v817_v3  ;;  %v597_v12 = vpop.f32.mrb[7].mxu1 }
 0x108   : > { %v865_v8 = vsel %vm801_vm9, %v769_v60, %v833_v4  ;;  %v770_v10 = vadd.f32 %v1090_v2, %v1276_v24  ;;  %881 = vst [vmem:[%s1286_s19 + $0x30] sm:$0xff] %v849_v7  ;;  %v752_v15 = vadd.f32 %v1276_v24, %v533_v11  ;;  %v768_v16 = vadd.f32 %v1276_v24, %v597_v12 }
 0x109   : > { %897 = vst [vmem:[%s1286_s19 + $0xb0] sm:$0xff] %v865_v8  ;;  %v847_v13 = vsel %vm783_vm10, %v751_v63, %v815_v5  ;;  %v863_v14 = vsel %vm799_vm11, %v767_v0, %v831_v6  ;;  %vm786_vm12 = vcmp.ge.f32.partialorder %v754_v9, 0.0  ;;  %v818_v17 = vmul.f32 0.2, %v754_v9 }
 0x10a   : > { %879 = vst [vmem:[%s1286_s19 + $0x20] sm:$0xff] %v847_v13  ;;  %895 = vst [vmem:[%s1286_s19 + $0xa0] sm:$0xff] %v863_v14  ;;  %vm802_vm13 = vcmp.ge.f32.partialorder %v770_v10, 0.0  ;;  %v834_v18 = vmul.f32 0.2, %v770_v10  ;;  %vm784_vm14 = vcmp.ge.f32.partialorder %v752_v15, 0.0 }
 0x10b   : > { %v816_v19 = vmul.f32 0.2, %v752_v15  ;;  %vm800_vm15 = vcmp.ge.f32.partialorder %v768_v16, 0.0  ;;  %v832_v20 = vmul.f32 0.2, %v768_v16  ;;  %v850_v21 = vsel %vm786_vm12, %v754_v9, %v818_v17  ;;  %v1077_v23 = vpop.f32.mrb[8].mxu0 }
 0x10c   : > { %v866_v22 = vsel %vm802_vm13, %v770_v10, %v834_v18  ;;  %v1093_v25 = vpop.f32.mrb[8].mxu1  ;;  %882 = vst [vmem:[%s1286_s19 + $0x38] sm:$0xff] %v850_v21  ;;  %v757_v28 = vadd.f32 %v1077_v23, %v1276_v24  ;;  %v546_v30 = vpop.f32.mrb[9].mxu0 }
 0x10d   : > { %898 = vst [vmem:[%s1286_s19 + $0xb8] sm:$0xff] %v866_v22  ;;  %v848_v26 = vsel %vm784_vm14, %v752_v15, %v816_v19  ;;  %v864_v27 = vsel %vm800_vm15, %v768_v16, %v832_v20  ;;  %v773_v29 = vadd.f32 %v1093_v25, %v1276_v24  ;;  %v610_v31 = vpop.f32.mrb[9].mxu1  ;;  %v755_v32 = vadd.f32 %v1276_v24, %v546_v30  ;;  %v1078_v34 = vpop.f32.mrb[10].mxu0 }
 0x10e   : > { %880 = vst [vmem:[%s1286_s19 + $0x28] sm:$0xff] %v848_v26  ;;  %896 = vst [vmem:[%s1286_s19 + $0xa8] sm:$0xff] %v864_v27  ;;  %v771_v33 = vadd.f32 %v1276_v24, %v610_v31  ;;  %v1094_v35 = vpop.f32.mrb[10].mxu1  ;;  %vm789_vm0 = vcmp.ge.f32.partialorder %v757_v28, 0.0  ;;  %v821_v36 = vmul.f32 0.2, %v757_v28  ;;  %v758_v42 = vadd.f32 %v1078_v34, %v1276_v24 }
 0x10f   : > { %vm805_vm1 = vcmp.ge.f32.partialorder %v773_v29, 0.0  ;;  %v837_v37 = vmul.f32 0.2, %v773_v29  ;;  %vm787_vm2 = vcmp.ge.f32.partialorder %v755_v32, 0.0  ;;  %v819_v38 = vmul.f32 0.2, %v755_v32 }
 0x110   : > { %vm803_vm3 = vcmp.ge.f32.partialorder %v771_v33, 0.0  ;;  %v835_v39 = vmul.f32 0.2, %v771_v33  ;;  %v853_v40 = vsel %vm789_vm0, %v757_v28, %v821_v36  ;;  %v774_v43 = vadd.f32 %v1094_v35, %v1276_v24  ;;  %v549_v44 = vpop.f32.mrb[11].mxu0  ;;  %v613_v45 = vpop.f32.mrb[11].mxu1 }
 0x111   : > { %v869_v41 = vsel %vm805_vm1, %v773_v29, %v837_v37  ;;  %885 = vst [vmem:[%s1286_s19 + $0x50] sm:$0xff] %v853_v40  ;;  %v851_v46 = vsel %vm787_vm2, %v755_v32, %v819_v38  ;;  %v756_v48 = vadd.f32 %v1276_v24, %v549_v44  ;;  %v772_v49 = vadd.f32 %v1276_v24, %v613_v45 }
 0x112   : > { %901 = vst [vmem:[%s1286_s19 + $0xd0] sm:$0xff] %v869_v41  ;;  %v867_v47 = vsel %vm803_vm3, %v771_v33, %v835_v39  ;;  %v1081_v50 = vpop.f32.mrb[12].mxu0  ;;  %v1097_v51 = vpop.f32.mrb[12].mxu1  ;;  %883 = vst [vmem:[%s1286_s19 + $0x40] sm:$0xff] %v851_v46  ;;  %vm790_vm4 = vcmp.ge.f32.partialorder %v758_v42, 0.0  ;;  %vm806_vm5 = vcmp.ge.f32.partialorder %v774_v43, 0.0 }
 0x113   : > { %899 = vst [vmem:[%s1286_s19 + $0xc0] sm:$0xff] %v867_v47  ;;  %v822_v52 = vmul.f32 0.2, %v758_v42  ;;  %v838_v53 = vmul.f32 0.2, %v774_v43  ;;  %vm788_vm6 = vcmp.ge.f32.partialorder %v756_v48, 0.0  ;;  %v761_v58 = vadd.f32 %v1081_v50, %v1276_v24 }
 0x114   : > { %v820_v54 = vmul.f32 0.2, %v756_v48  ;;  %vm804_vm7 = vcmp.ge.f32.partialorder %v772_v49, 0.0  ;;  %v836_v55 = vmul.f32 0.2, %v772_v49  ;;  %v777_v59 = vadd.f32 %v1097_v51, %v1276_v24  ;;  %v562_v60 = vpop.f32.mrb[13].mxu0 }
 0x115   : > { %v854_v56 = vsel %vm790_vm4, %v758_v42, %v822_v52  ;;  %v870_v57 = vsel %vm806_vm5, %v774_v43, %v838_v53  ;;  %v626_v61 = vpop.f32.mrb[13].mxu1  ;;  %v759_v0 = vadd.f32 %v1276_v24, %v562_v60  ;;  %v1082_v2 = vpop.f32.mrb[14].mxu0  ;;  %vm793_vm8 = vcmp.ge.f32.partialorder %v761_v58, 0.0 }
 0x116   : > { %886 = vst [vmem:[%s1286_s19 + $0x58] sm:$0xff] %v854_v56  ;;  %902 = vst [vmem:[%s1286_s19 + $0xd8] sm:$0xff] %v870_v57  ;;  %v852_v62 = vsel %vm788_vm6, %v756_v48, %v820_v54  ;;  %v868_v63 = vsel %vm804_vm7, %v772_v49, %v836_v55  ;;  %v775_v1 = vadd.f32 %v1276_v24, %v626_v61  ;;  %v1098_v3 = vpop.f32.mrb[14].mxu1  ;;  %v825_v4 = vmul.f32 0.2, %v761_v58  ;;  %v565_v12 = vpop.f32.mrb[15].mxu0 }
 0x117   : > { %884 = vst [vmem:[%s1286_s19 + $0x48] sm:$0xff] %v852_v62  ;;  %900 = vst [vmem:[%s1286_s19 + $0xc8] sm:$0xff] %v868_v63  ;;  %vm809_vm9 = vcmp.ge.f32.partialorder %v777_v59, 0.0  ;;  %v841_v5 = vmul.f32 0.2, %v777_v59  ;;  %vm791_vm10 = vcmp.ge.f32.partialorder %v759_v0, 0.0  ;;  %v762_v10 = vadd.f32 %v1082_v2, %v1276_v24 }
 0x118   : > { %v823_v6 = vmul.f32 0.2, %v759_v0  ;;  %vm807_vm11 = vcmp.ge.f32.partialorder %v775_v1, 0.0  ;;  %v839_v7 = vmul.f32 0.2, %v775_v1  ;;  %v857_v8 = vsel %vm793_vm8, %v761_v58, %v825_v4  ;;  %v629_v13 = vpop.f32.mrb[15].mxu1 }
 0x119   : > { %v873_v9 = vsel %vm809_vm9, %v777_v59, %v841_v5  ;;  %v778_v11 = vadd.f32 %v1098_v3, %v1276_v24  ;;  %889 = vst [vmem:[%s1286_s19 + $0x70] sm:$0xff] %v857_v8  ;;  %v760_v16 = vadd.f32 %v1276_v24, %v565_v12  ;;  %v776_v17 = vadd.f32 %v1276_v24, %v629_v13 }
 0x11a   : > { %905 = vst [vmem:[%s1286_s19 + $0xf0] sm:$0xff] %v873_v9  ;;  %v855_v14 = vsel %vm791_vm10, %v759_v0, %v823_v6  ;;  %v871_v15 = vsel %vm807_vm11, %v775_v1, %v839_v7  ;;  %vm794_vm12 = vcmp.ge.f32.partialorder %v762_v10, 0.0  ;;  %v826_v18 = vmul.f32 0.2, %v762_v10 }
 0x11b   : > { %887 = vst [vmem:[%s1286_s19 + $0x60] sm:$0xff] %v855_v14  ;;  %903 = vst [vmem:[%s1286_s19 + $0xe0] sm:$0xff] %v871_v15  ;;  %vm810_vm13 = vcmp.ge.f32.partialorder %v778_v11, 0.0  ;;  %v842_v19 = vmul.f32 0.2, %v778_v11  ;;  %vm792_vm14 = vcmp.ge.f32.partialorder %v760_v16, 0.0 }
 0x11c   : > { %v824_v20 = vmul.f32 0.2, %v760_v16  ;;  %vm808_vm15 = vcmp.ge.f32.partialorder %v776_v17, 0.0  ;;  %v840_v21 = vmul.f32 0.2, %v776_v17  ;;  %v858_v22 = vsel %vm794_vm12, %v762_v10, %v826_v18 }
 0x11d   : > { %v874_v23 = vsel %vm810_vm13, %v778_v11, %v842_v19  ;;  %890 = vst [vmem:[%s1286_s19 + $0x78] sm:$0xff] %v858_v22 }
 0x11e   : > { %906 = vst [vmem:[%s1286_s19 + $0xf8] sm:$0xff] %v874_v23  ;;  %v856_v25 = vsel %vm792_vm14, %v760_v16, %v824_v20  ;;  %v872_v26 = vsel %vm808_vm15, %v776_v17, %v840_v21 }
 0x11f   : > { %888 = vst [vmem:[%s1286_s19 + $0x68] sm:$0xff] %v856_v25  ;;  %904 = vst [vmem:[%s1286_s19 + $0xe8] sm:$0xff] %v872_v26 }
 0x120 PF: > { %s13_s14 = sadd.s32 1, %s1185_s14   ;;  %s1361_s12 = smov %s1181_s13 }
 0x121   : > { %p10_p5 = scmp.ge.s32.totalorder %s13_s14, 4   ;;  %s1362_s13 = smov %s1364_s15 }
 0x123   :  { %12 = sbr.rel (!%p10_p5) target bundleno = 2 (0x2), region = 73 }

// kernel: discriminator_forward.9
= control target key start
LH: loop header
LB: loop body
LE: loop exit
PB: predicated region body
PF: predicated region fallthrough
CT: control target
= control target key end

     0   :  { %s2399_s1 = inlined_call_operand.vmem [shape: bf16[1024,128], index: 1, kind: input, shape index: {}]   ;;  %s2400_s0 = inlined_call_operand.vmem [shape: bf16[128,1024], index: 0, kind: input, shape index: {}]   ;;  %s2401_s2 = inlined_call_operand.vmem [shape: f32[1,128], index: 2, kind: input, shape index: {}]   ;;  %s2402_s3 = inlined_call_operand.vmem [shape: f32[128,128], index: 3, kind: output, shape index: {}]  }
   0x1   :  { %v1814_v0 = vld [vmem:[%s2399_s1 + $0x40] sm:$0xff]   ;;  %v1818_v4 = vld [vmem:[%s2399_s1 + $0x48] sm:$0xff]   ;;  %v1822_v8 = vld [vmem:[%s2399_s1 + $0x50] sm:$0xff]  }
   0x2   :  { %v1815_v1 = vld [vmem:[%s2399_s1 + $0xc0] sm:$0xff]   ;;  %1558 = vmatprep.subr.bf16.mxu0 %v1814_v0  ;;  %v1819_v5 = vld [vmem:[%s2399_s1 + $0xc8] sm:$0xff]   ;;  %v1823_v9 = vld [vmem:[%s2399_s1 + $0xd0] sm:$0xff]  }
   0x3   :  { %v1816_v2 = vld [vmem:[%s2399_s1] sm:$0xff]   ;;  %1622 = vmatprep.subr.bf16.mxu1 %v1815_v1  ;;  %v1820_v6 = vld [vmem:[%s2399_s1 + $0x8] sm:$0xff]   ;;  %v1824_v10 = vld [vmem:[%s2399_s1 + $0x10] sm:$0xff]  }
   0x4   :  { %v1817_v3 = vld [vmem:[%s2399_s1 + $0x80] sm:$0xff]   ;;  %1559 = vmatpush3.bf16.msra.mxu0 %v1816_v2  ;;  %v1821_v7 = vld [vmem:[%s2399_s1 + $0x88] sm:$0xff]   ;;  %v1825_v11 = vld [vmem:[%s2399_s1 + $0x90] sm:$0xff]  }
   0x5   :  { %1623 = vmatpush3.bf16.msra.mxu1 %v1817_v3  ;;  %1560 = vmatprep.subr.bf16.mxu0 %v1818_v4  ;;  %v1826_v12 = vld [vmem:[%s2399_s1 + $0x58] sm:$0xff]   ;;  %v1830_v16 = vld [vmem:[%s2399_s1 + $0x60] sm:$0xff]   ;;  %v1834_v20 = vld [vmem:[%s2399_s1 + $0x68] sm:$0xff]  }
   0x6   :  { %1624 = vmatprep.subr.bf16.mxu1 %v1819_v5  ;;  %v1827_v13 = vld [vmem:[%s2399_s1 + $0xd8] sm:$0xff]   ;;  %v1831_v17 = vld [vmem:[%s2399_s1 + $0xe0] sm:$0xff]   ;;  %v1835_v21 = vld [vmem:[%s2399_s1 + $0xe8] sm:$0xff]  }
   0x7   :  { %v1828_v14 = vld [vmem:[%s2399_s1 + $0x18] sm:$0xff]   ;;  %v1832_v18 = vld [vmem:[%s2399_s1 + $0x20] sm:$0xff]   ;;  %v1836_v22 = vld [vmem:[%s2399_s1 + $0x28] sm:$0xff]  }
   0x8   :  { %1561 = vmatpush3.bf16.msra.mxu0 %v1820_v6  ;;  %v1829_v15 = vld [vmem:[%s2399_s1 + $0x98] sm:$0xff]   ;;  %v1833_v19 = vld [vmem:[%s2399_s1 + $0xa0] sm:$0xff]   ;;  %v1837_v23 = vld [vmem:[%s2399_s1 + $0xa8] sm:$0xff]  }
   0x9   :  { %1625 = vmatpush3.bf16.msra.mxu1 %v1821_v7  ;;  %1562 = vmatprep.subr.bf16.mxu0 %v1822_v8  ;;  %v1838_v24 = vld [vmem:[%s2399_s1 + $0x70] sm:$0xff]   ;;  %v1842_v28 = vld [vmem:[%s2399_s1 + $0x78] sm:$0xff]   ;;  %v51_v32 = vld [vmem:[%s2400_s0] sm:$0xff] }
   0xa   :  { %1626 = vmatprep.subr.bf16.mxu1 %v1823_v9  ;;  %v1839_v25 = vld [vmem:[%s2399_s1 + $0xf0] sm:$0xff]   ;;  %v1843_v29 = vld [vmem:[%s2399_s1 + $0xf8] sm:$0xff]   ;;  %v55_v33 = vld [vmem:[%s2400_s0 + $0x20] sm:$0xff] }
   0xb   :  { %v1840_v26 = vld [vmem:[%s2399_s1 + $0x30] sm:$0xff]   ;;  %v1844_v30 = vld [vmem:[%s2399_s1 + $0x38] sm:$0xff]   ;;  %v52_v34 = vld [vmem:[%s2400_s0 + $0x8] sm:$0xff]  ;;  %v1429_v35 = vcombine.low %v51_v32, %v55_v33  ;;  %v1430_v36 = vcombine.high %v51_v32, %v55_v33 }
   0xc   :  { %1563 = vmatpush3.bf16.msra.mxu0 %v1824_v10  ;;  %v1841_v27 = vld [vmem:[%s2399_s1 + $0xb0] sm:$0xff]   ;;  %v1845_v31 = vld [vmem:[%s2399_s1 + $0xb8] sm:$0xff]   ;;  %v56_v37 = vld [vmem:[%s2400_s0 + $0x28] sm:$0xff] }
   0xd   :  { %1627 = vmatpush3.bf16.msra.mxu1 %v1825_v11  ;;  %1564 = vmatprep.subr.bf16.mxu0 %v1826_v12  ;;  %v1431_v38 = vcombine.low %v52_v34, %v56_v37  ;;  %v1432_v39 = vcombine.high %v52_v34, %v56_v37  ;;  %v1846_v40 = vld [vmem:[%s2399_s1 + $0x140] sm:$0xff]   ;;  %v60_v47 = vld [vmem:[%s2400_s0 + $0x48] sm:$0xff]  ;;  %v1854_v62 = vld [vmem:[%s2399_s1 + $0x150] sm:$0xff]  }
   0xe   :  { %1628 = vmatprep.subr.bf16.mxu1 %v1827_v13  ;;  %979 = vmatprep.mubr.bf16.mxu0 %v1430_v36  ;;  %v1847_v41 = vld [vmem:[%s2399_s1 + $0x100] sm:$0xff]   ;;  %v64_v48 = vld [vmem:[%s2400_s0 + $0x68] sm:$0xff]  ;;  %v1855_v63 = vld [vmem:[%s2399_s1 + $0x110] sm:$0xff]  }
   0xf   :  { %1076 = vmatprep.mubr.bf16.mxu1 %v1432_v39  ;;  %v1848_v42 = vld [vmem:[%s2399_s1 + $0x1c0] sm:$0xff]   ;;  %v1440_v49 = vcombine.high %v60_v47, %v64_v48  ;;  %v1850_v50 = vld [vmem:[%s2399_s1 + $0x148] sm:$0xff]   ;;  %v1439_v53 = vcombine.low %v60_v47, %v64_v48  ;;  %v1856_v0 = vld [vmem:[%s2399_s1 + $0x1d0] sm:$0xff]  }
  0x10   :  { %1565 = vmatpush3.bf16.msra.mxu0 %v1828_v14  ;;  %v1849_v43 = vld [vmem:[%s2399_s1 + $0x180] sm:$0xff]   ;;  %v1851_v52 = vld [vmem:[%s2399_s1 + $0x108] sm:$0xff]   ;;  %v1857_v1 = vld [vmem:[%s2399_s1 + $0x190] sm:$0xff]  }
  0x11   :  { %1629 = vmatpush3.bf16.msra.mxu1 %v1829_v15  ;;  %1566 = vmatprep.subr.bf16.mxu0 %v1830_v16  ;;  %v59_v44 = vld [vmem:[%s2400_s0 + $0x40] sm:$0xff]  ;;  %v1852_v54 = vld [vmem:[%s2399_s1 + $0x1c8] sm:$0xff]   ;;  %v1858_v10 = vld [vmem:[%s2399_s1 + $0x158] sm:$0xff]  }
  0x12   :  { %1630 = vmatprep.subr.bf16.mxu1 %v1831_v17  ;;  %v63_v45 = vld [vmem:[%s2400_s0 + $0x60] sm:$0xff]  ;;  %v1853_v55 = vld [vmem:[%s2399_s1 + $0x188] sm:$0xff]   ;;  %v1859_v11 = vld [vmem:[%s2399_s1 + $0x118] sm:$0xff]  }
  0x13   :  { %v1438_v46 = vcombine.high %v59_v44, %v63_v45  ;;  %v1437_v51 = vcombine.low %v59_v44, %v63_v45  ;;  %v67_v56 = vld [vmem:[%s2400_s0 + $0x80] sm:$0xff]  ;;  %v68_v58 = vld [vmem:[%s2400_s0 + $0x88] sm:$0xff]  ;;  %v1860_v12 = vld [vmem:[%s2399_s1 + $0x1d8] sm:$0xff]  }
  0x14   :  { %1567 = vmatpush3.bf16.msra.mxu0 %v1832_v18  ;;  %v71_v57 = vld [vmem:[%s2400_s0 + $0xa0] sm:$0xff]  ;;  %v72_v59 = vld [vmem:[%s2400_s0 + $0xa8] sm:$0xff]  ;;  %v1861_v13 = vld [vmem:[%s2399_s1 + $0x198] sm:$0xff]  }
  0x15   :  { %1631 = vmatpush3.bf16.msra.mxu1 %v1833_v19  ;;  %1568 = vmatprep.subr.bf16.mxu0 %v1834_v20  ;;  %v1446_v60 = vcombine.high %v67_v56, %v71_v57  ;;  %v1448_v61 = vcombine.high %v68_v58, %v72_v59  ;;  %v1445_v2 = vcombine.low %v67_v56, %v71_v57  ;;  %v75_v3 = vld [vmem:[%s2400_s0 + $0xc0] sm:$0xff]  ;;  %v76_v5 = vld [vmem:[%s2400_s0 + $0xc8] sm:$0xff]  ;;  %v1871_v39 = vld [vmem:[%s2399_s1 + $0x130] sm:$0xff]  }
  0x16   :  { %1632 = vmatprep.subr.bf16.mxu1 %v1835_v21  ;;  %v79_v4 = vld [vmem:[%s2400_s0 + $0xe0] sm:$0xff]  ;;  %v1447_v6 = vcombine.low %v68_v58, %v72_v59  ;;  %v80_v8 = vld [vmem:[%s2400_s0 + $0xe8] sm:$0xff]  ;;  %v1875_v48 = vld [vmem:[%s2399_s1 + $0x138] sm:$0xff]  }
  0x17   :  { %v1454_v7 = vcombine.high %v75_v3, %v79_v4  ;;  %v1456_v9 = vcombine.high %v76_v5, %v80_v8  ;;  %v83_v14 = vld [vmem:[%s2400_s0 + $0x100] sm:$0xff]  ;;  %v84_v16 = vld [vmem:[%s2400_s0 + $0x108] sm:$0xff]  ;;  %v1453_v19 = vcombine.low %v75_v3, %v79_v4  ;;  %v1455_v21 = vcombine.low %v76_v5, %v80_v8  ;;  %v62_v8 = vld [vmem:[%s2400_s0 + $0x58] sm:$0xff] }
  0x18   :  { %1569 = vmatpush3.bf16.msra.mxu0 %v1836_v22  ;;  %v87_v15 = vld [vmem:[%s2400_s0 + $0x120] sm:$0xff]  ;;  %v88_v17 = vld [vmem:[%s2400_s0 + $0x128] sm:$0xff] }
  0x19   :  { %1633 = vmatpush3.bf16.msra.mxu1 %v1837_v23  ;;  %1570 = vmatprep.subr.bf16.mxu0 %v1838_v24  ;;  %v1862_v18 = vld [vmem:[%s2399_s1 + $0x160] sm:$0xff]   ;;  %v1462_v22 = vcombine.high %v83_v14, %v87_v15  ;;  %v1464_v24 = vcombine.high %v84_v16, %v88_v17  ;;  %v1868_v32 = vld [vmem:[%s2399_s1 + $0x1e8] sm:$0xff]   ;;  %v1461_v34 = vcombine.low %v83_v14, %v87_v15  ;;  %v69_v14 = vld [vmem:[%s2400_s0 + $0x90] sm:$0xff] }
  0x1a   :  { %1634 = vmatprep.subr.bf16.mxu1 %v1839_v25  ;;  %v1863_v20 = vld [vmem:[%s2399_s1 + $0x120] sm:$0xff]   ;;  %v1869_v33 = vld [vmem:[%s2399_s1 + $0x1a8] sm:$0xff]   ;;  %v73_v15 = vld [vmem:[%s2400_s0 + $0xb0] sm:$0xff] }
  0x1b   :  { %v1864_v23 = vld [vmem:[%s2399_s1 + $0x1e0] sm:$0xff]   ;;  %v100_v44 = vld [vmem:[%s2400_s0 + $0x188] sm:$0xff] }
  0x1c   :  { %1571 = vmatpush3.bf16.msra.mxu0 %v1840_v26  ;;  %v1865_v25 = vld [vmem:[%s2399_s1 + $0x1a0] sm:$0xff]   ;;  %v104_v45 = vld [vmem:[%s2400_s0 + $0x1a8] sm:$0xff] }
  0x1d   :  { %1635 = vmatpush3.bf16.msra.mxu1 %v1841_v27  ;;  %1572 = vmatprep.subr.bf16.mxu0 %v1842_v28  ;;  %v91_v26 = vld [vmem:[%s2400_s0 + $0x140] sm:$0xff]  ;;  %v1866_v28 = vld [vmem:[%s2399_s1 + $0x168] sm:$0xff]   ;;  %v1479_v59 = vcombine.low %v100_v44, %v104_v45 }
  0x1e   :  { %1636 = vmatprep.subr.bf16.mxu1 %v1843_v29  ;;  %v95_v27 = vld [vmem:[%s2400_s0 + $0x160] sm:$0xff]  ;;  %v92_v29 = vld [vmem:[%s2400_s0 + $0x148] sm:$0xff] }
  0x1f   :  { %v1470_v36 = vcombine.high %v91_v26, %v95_v27  ;;  %v1469_v47 = vcombine.low %v91_v26, %v95_v27  ;;  %v108_v56 = vld [vmem:[%s2400_s0 + $0x1c8] sm:$0xff]  ;;  %v1449_v26 = vcombine.low %v69_v14, %v73_v15 }
  0x20   :  { %1573 = vmatpush3.bf16.msra.mxu0 %v1844_v30  ;;  %v96_v30 = vld [vmem:[%s2400_s0 + $0x168] sm:$0xff] }
  0x21   :  { %1637 = vmatpush3.bf16.msra.mxu1 %v1845_v31  ;;  %1686 = vmatprep.subr.bf16.mxu0 %v1846_v40  ;;  %v1867_v31 = vld [vmem:[%s2399_s1 + $0x128] sm:$0xff]   ;;  %v1472_v37 = vcombine.high %v92_v29, %v96_v30  ;;  %v1872_v40 = vld [vmem:[%s2399_s1 + $0x1f0] sm:$0xff]  }
  0x22   :  { %1750 = vmatprep.subr.bf16.mxu1 %v1848_v42  ;;  %v103_v42 = vld [vmem:[%s2400_s0 + $0x1a0] sm:$0xff]  ;;  %v112_v57 = vld [vmem:[%s2400_s0 + $0x1e8] sm:$0xff] }
  0x23   :  { %980 = vmatmul.mubr.bf16.vlgmr.msra.gmra.mrb[0].mxu0 %v1429_v35  ;;  %v1463_v35 = vcombine.low %v84_v16, %v88_v17  ;;  %v1487_v3 = vcombine.low %v108_v56, %v112_v57  ;;  %v70_v16 = vld [vmem:[%s2400_s0 + $0x98] sm:$0xff] }
  0x24   :  { %1077 = vmatmul.mubr.bf16.vlgmr.msra.gmra.mrb[0].mxu1 %v1431_v38  ;;  %1687 = vmatpush3.bf16.msra.mxu0 %v1847_v41  ;;  %v1870_v38 = vld [vmem:[%s2399_s1 + $0x170] sm:$0xff]   ;;  %v99_v41 = vld [vmem:[%s2400_s0 + $0x180] sm:$0xff]  ;;  %v74_v17 = vld [vmem:[%s2400_s0 + $0xb8] sm:$0xff] }
  0x25   :  { %1751 = vmatpush3.bf16.msra.mxu1 %v1849_v43  ;;  %987 = vmatprep.mubr.bf16.mxu0 %v1438_v46  ;;  %v1873_v43 = vld [vmem:[%s2399_s1 + $0x1b0] sm:$0xff]   ;;  %v1874_v46 = vld [vmem:[%s2399_s1 + $0x178] sm:$0xff]   ;;  %v1477_v58 = vcombine.low %v99_v41, %v103_v42  ;;  %v1451_v27 = vcombine.low %v70_v16, %v74_v17 }
  0x26   :  { %1084 = vmatprep.mubr.bf16.mxu1 %v1440_v49  ;;  %1688 = vmatprep.subr.bf16.mxu0 %v1850_v50  ;;  %v1471_v49 = vcombine.low %v92_v29, %v96_v30  ;;  %v1478_v50 = vcombine.high %v99_v41, %v103_v42  ;;  %v85_v30 = vld [vmem:[%s2400_s0 + $0x110] sm:$0xff]  ;;  %v98_v41 = vld [vmem:[%s2400_s0 + $0x178] sm:$0xff] }
  0x27   :  { %1752 = vmatprep.subr.bf16.mxu1 %v1852_v54  ;;  %v107_v54 = vld [vmem:[%s2400_s0 + $0x1c0] sm:$0xff] }
  0x28   :  { %1689 = vmatpush3.bf16.msra.mxu0 %v1851_v52  ;;  %v1480_v52 = vcombine.high %v100_v44, %v104_v45 }
  0x29   :  { %1753 = vmatpush3.bf16.msra.mxu1 %v1853_v55  ;;  %1690 = vmatprep.subr.bf16.mxu0 %v1854_v62  ;;  %v111_v55 = vld [vmem:[%s2400_s0 + $0x1e0] sm:$0xff]  ;;  %v53_v62 = vld [vmem:[%s2400_s0 + $0x10] sm:$0xff] }
  0x2a   :  { %1754 = vmatprep.subr.bf16.mxu1 %v1856_v0  ;;  %v54_v0 = vld [vmem:[%s2400_s0 + $0x18] sm:$0xff] }
  0x2b   :  { %988 = vmatmul.mubr.bf16.gmra.mrb[4].mxu0 %v1437_v51  ;;  %v1876_v51 = vld [vmem:[%s2399_s1 + $0x1f8] sm:$0xff]  }
  0x2c   :  { %1085 = vmatmul.mubr.bf16.gmra.mrb[4].mxu1 %v1439_v53  ;;  %995 = vmatprep.mubr.bf16.mxu0 %v1446_v60  ;;  %v1877_v53 = vld [vmem:[%s2399_s1 + $0x1b8] sm:$0xff]   ;;  %v1486_v60 = vcombine.high %v107_v54, %v111_v55 }
  0x2d   :  { %1092 = vmatprep.mubr.bf16.mxu1 %v1448_v61  ;;  %1691 = vmatpush3.bf16.msra.mxu0 %v1855_v63  ;;  %v1488_v61 = vcombine.high %v108_v56, %v112_v57  ;;  %v57_v63 = vld [vmem:[%s2400_s0 + $0x30] sm:$0xff]  ;;  %v110_v56 = vld [vmem:[%s2400_s0 + $0x1d8] sm:$0xff] }
  0x2e   :  { %1755 = vmatpush3.bf16.msra.mxu1 %v1857_v1  ;;  %1692 = vmatprep.subr.bf16.mxu0 %v1858_v10  ;;  %v58_v1 = vld [vmem:[%s2400_s0 + $0x38] sm:$0xff]  ;;  %v1434_v4 = vcombine.high %v53_v62, %v57_v63  ;;  %v1433_v10 = vcombine.low %v53_v62, %v57_v63 }
  0x2f   :  { %1756 = vmatprep.subr.bf16.mxu1 %v1860_v12  ;;  %v1436_v5 = vcombine.high %v54_v0, %v58_v1  ;;  %v114_v57 = vld [vmem:[%s2400_s0 + $0x1f8] sm:$0xff] }
  0x30   :  { %v1491_v63 = vcombine.low %v110_v56, %v114_v57 }
  0x31   :  { %1693 = vmatpush3.bf16.msra.mxu0 %v1859_v11  ;;  %v1435_v11 = vcombine.low %v54_v0, %v58_v1 }
  0x32   :  { %1757 = vmatpush3.bf16.msra.mxu1 %v1861_v13  ;;  %1694 = vmatprep.subr.bf16.mxu0 %v1862_v18 }
  0x33   :  { %996 = vmatmul.mubr.bf16.gmra.mrb[8].mxu0 %v1445_v2  ;;  %1758 = vmatprep.subr.bf16.mxu1 %v1864_v23  ;;  %v1485_v2 = vcombine.low %v107_v54, %v111_v55  ;;  %v81_v23 = vld [vmem:[%s2400_s0 + $0xf0] sm:$0xff] }
  0x34   :  { %1093 = vmatmul.mubr.bf16.gmra.mrb[8].mxu1 %v1447_v6  ;;  %1003 = vmatprep.mubr.bf16.mxu0 %v1454_v7  ;;  %v61_v6 = vld [vmem:[%s2400_s0 + $0x50] sm:$0xff] }
  0x35   :  { %1100 = vmatprep.mubr.bf16.mxu1 %v1456_v9  ;;  %1695 = vmatpush3.bf16.msra.mxu0 %v1863_v20  ;;  %v65_v7 = vld [vmem:[%s2400_s0 + $0x70] sm:$0xff]  ;;  %v66_v9 = vld [vmem:[%s2400_s0 + $0x78] sm:$0xff]  ;;  %v1450_v20 = vcombine.high %v69_v14, %v73_v15 }
  0x36   :  { %1759 = vmatpush3.bf16.msra.mxu1 %v1865_v25  ;;  %1696 = vmatprep.subr.bf16.mxu0 %v1866_v28  ;;  %v1442_v12 = vcombine.high %v61_v6, %v65_v7  ;;  %v1444_v13 = vcombine.high %v62_v8, %v66_v9  ;;  %v1441_v18 = vcombine.low %v61_v6, %v65_v7  ;;  %v82_v25 = vld [vmem:[%s2400_s0 + $0xf8] sm:$0xff]  ;;  %v109_v54 = vld [vmem:[%s2400_s0 + $0x1d0] sm:$0xff] }
  0x37   :  { %1760 = vmatprep.subr.bf16.mxu1 %v1868_v32  ;;  %v86_v32 = vld [vmem:[%s2400_s0 + $0x118] sm:$0xff]  ;;  %v113_v55 = vld [vmem:[%s2400_s0 + $0x1f0] sm:$0xff] }
  0x38   :  { %v1489_v62 = vcombine.low %v109_v54, %v113_v55 }
  0x39   :  { %1697 = vmatpush3.bf16.msra.mxu0 %v1867_v31  ;;  %v89_v31 = vld [vmem:[%s2400_s0 + $0x130] sm:$0xff] }
  0x3a   :  { %1761 = vmatpush3.bf16.msra.mxu1 %v1869_v33  ;;  %1698 = vmatprep.subr.bf16.mxu0 %v1870_v38  ;;  %v90_v33 = vld [vmem:[%s2400_s0 + $0x138] sm:$0xff]  ;;  %v93_v38 = vld [vmem:[%s2400_s0 + $0x150] sm:$0xff]  ;;  %v1465_v42 = vcombine.low %v85_v30, %v89_v31 }
  0x3b   :  { %1004 = vmatmul.mubr.bf16.gmra.mrb[12].mxu0 %v1453_v19  ;;  %1762 = vmatprep.subr.bf16.mxu1 %v1872_v40  ;;  %v1443_v19 = vcombine.low %v62_v8, %v66_v9  ;;  %v94_v40 = vld [vmem:[%s2400_s0 + $0x158] sm:$0xff] }
  0x3c   :  { %1101 = vmatmul.mubr.bf16.gmra.mrb[12].mxu1 %v1455_v21  ;;  %1011 = vmatprep.mubr.bf16.mxu0 %v1462_v22  ;;  %v1452_v21 = vcombine.high %v70_v16, %v74_v17  ;;  %v77_v22 = vld [vmem:[%s2400_s0 + $0xd0] sm:$0xff]  ;;  %v1476_v45 = vcombine.high %v94_v40, %v98_v41 }
  0x3d   :  { %1108 = vmatprep.mubr.bf16.mxu1 %v1464_v24  ;;  %1699 = vmatpush3.bf16.msra.mxu0 %v1871_v39  ;;  %v78_v24 = vld [vmem:[%s2400_s0 + $0xd8] sm:$0xff]  ;;  %v1458_v28 = vcombine.high %v77_v22, %v81_v23  ;;  %v97_v39 = vld [vmem:[%s2400_s0 + $0x170] sm:$0xff] }
  0x3e   :  { %1763 = vmatpush3.bf16.msra.mxu1 %v1873_v43  ;;  %1700 = vmatprep.subr.bf16.mxu0 %v1874_v46  ;;  %v1460_v29 = vcombine.high %v78_v24, %v82_v25  ;;  %v1467_v43 = vcombine.low %v86_v32, %v90_v33  ;;  %v1474_v44 = vcombine.high %v93_v38, %v97_v39  ;;  %v101_v46 = vld [vmem:[%s2400_s0 + $0x190] sm:$0xff] }
  0x3f   :  { %1764 = vmatprep.subr.bf16.mxu1 %v1876_v51  ;;  %v1475_v51 = vcombine.low %v94_v40, %v98_v41 }
  0x41   :  { %1701 = vmatpush3.bf16.msra.mxu0 %v1875_v48  ;;  %v102_v48 = vld [vmem:[%s2400_s0 + $0x198] sm:$0xff] }
  0x42   :  { %1765 = vmatpush3.bf16.msra.mxu1 %v1877_v53 }
  0x43   :  { %1012 = vmatmul.mubr.bf16.gmra.mrb[16].mxu0 %v1461_v34  ;;  %v1457_v34 = vcombine.low %v77_v22, %v81_v23 }
  0x44   :  { %1109 = vmatmul.mubr.bf16.gmra.mrb[16].mxu1 %v1463_v35  ;;  %1019 = vmatprep.mubr.bf16.mxu0 %v1470_v36  ;;  %v1459_v35 = vcombine.low %v78_v24, %v82_v25  ;;  %v1466_v36 = vcombine.high %v85_v30, %v89_v31 }
  0x45   :  { %1116 = vmatprep.mubr.bf16.mxu1 %v1472_v37  ;;  %v1468_v37 = vcombine.high %v86_v32, %v90_v33 }
  0x4b   :  { %1020 = vmatmul.mubr.bf16.gmra.mrb[20].mxu0 %v1469_v47  ;;  %v105_v47 = vld [vmem:[%s2400_s0 + $0x1b0] sm:$0xff] }
  0x4c   :  { %1117 = vmatmul.mubr.bf16.gmra.mrb[20].mxu1 %v1471_v49  ;;  %1027 = vmatprep.mubr.bf16.mxu0 %v1478_v50  ;;  %v106_v49 = vld [vmem:[%s2400_s0 + $0x1b8] sm:$0xff]  ;;  %v1473_v50 = vcombine.low %v93_v38, %v97_v39 }
  0x4d   :  { %1124 = vmatprep.mubr.bf16.mxu1 %v1480_v52  ;;  %v1482_v52 = vcombine.high %v101_v46, %v105_v47  ;;  %v1484_v53 = vcombine.high %v102_v48, %v106_v49 }
  0x53   :  { %1028 = vmatmul.mubr.bf16.gmra.mrb[24].mxu0 %v1477_v58  ;;  %v1481_v58 = vcombine.low %v101_v46, %v105_v47 }
  0x54   :  { %1125 = vmatmul.mubr.bf16.gmra.mrb[24].mxu1 %v1479_v59  ;;  %1035 = vmatprep.mubr.bf16.mxu0 %v1486_v60  ;;  %v1483_v59 = vcombine.low %v102_v48, %v106_v49  ;;  %v1490_v60 = vcombine.high %v109_v54, %v113_v55 }
  0x55   :  { %1132 = vmatprep.mubr.bf16.mxu1 %v1488_v61  ;;  %v1492_v61 = vcombine.high %v110_v56, %v114_v57 }
  0x5b   :  { %1036 = vmatmul.mubr.bf16.gmra.mrb[28].mxu0 %v1485_v2 }
  0x5c   :  { %1133 = vmatmul.mubr.bf16.gmra.mrb[28].mxu1 %v1487_v3  ;;  %1173 = vmatprep.mubr.bf16.mxu0 %v1434_v4 }
  0x5d   :  { %1270 = vmatprep.mubr.bf16.mxu1 %v1436_v5 }
  0x63   :  { %1174 = vmatmul.mubr.bf16.vlgmr.msra.gmra.mrb[32].mxu0 %v1433_v10 }
  0x64   :  { %1271 = vmatmul.mubr.bf16.vlgmr.msra.gmra.mrb[32].mxu1 %v1435_v11  ;;  %1181 = vmatprep.mubr.bf16.mxu0 %v1442_v12 }
  0x65   :  { %1278 = vmatprep.mubr.bf16.mxu1 %v1444_v13 }
  0x6b   :  { %1182 = vmatmul.mubr.bf16.gmra.mrb[36].mxu0 %v1441_v18 }
  0x6c   :  { %1279 = vmatmul.mubr.bf16.gmra.mrb[36].mxu1 %v1443_v19  ;;  %1189 = vmatprep.mubr.bf16.mxu0 %v1450_v20 }
  0x6d   :  { %1286 = vmatprep.mubr.bf16.mxu1 %v1452_v21 }
  0x73   :  { %1190 = vmatmul.mubr.bf16.gmra.mrb[40].mxu0 %v1449_v26 }
  0x74   :  { %1287 = vmatmul.mubr.bf16.gmra.mrb[40].mxu1 %v1451_v27  ;;  %1197 = vmatprep.mubr.bf16.mxu0 %v1458_v28 }
  0x75   :  { %1294 = vmatprep.mubr.bf16.mxu1 %v1460_v29 }
  0x7b   :  { %1198 = vmatmul.mubr.bf16.gmra.mrb[44].mxu0 %v1457_v34 }
  0x7c   :  { %1295 = vmatmul.mubr.bf16.gmra.mrb[44].mxu1 %v1459_v35  ;;  %1205 = vmatprep.mubr.bf16.mxu0 %v1466_v36 }
  0x7d   :  { %1302 = vmatprep.mubr.bf16.mxu1 %v1468_v37 }
  0x83   :  { %1206 = vmatmul.mubr.bf16.gmra.mrb[48].mxu0 %v1465_v42 }
  0x84   :  { %1303 = vmatmul.mubr.bf16.gmra.mrb[48].mxu1 %v1467_v43  ;;  %1213 = vmatprep.mubr.bf16.mxu0 %v1474_v44 }
  0x85   :  { %1310 = vmatprep.mubr.bf16.mxu1 %v1476_v45 }
  0x8b   :  { %1214 = vmatmul.mubr.bf16.gmra.mrb[52].mxu0 %v1473_v50 }
  0x8c   :  { %1311 = vmatmul.mubr.bf16.gmra.mrb[52].mxu1 %v1475_v51  ;;  %1221 = vmatprep.mubr.bf16.mxu0 %v1482_v52 }
  0x8d   :  { %1318 = vmatprep.mubr.bf16.mxu1 %v1484_v53 }
  0x93   :  { %1222 = vmatmul.mubr.bf16.gmra.mrb[56].mxu0 %v1481_v58 }
  0x94   :  { %1319 = vmatmul.mubr.bf16.gmra.mrb[56].mxu1 %v1483_v59  ;;  %1229 = vmatprep.mubr.bf16.mxu0 %v1490_v60 }
  0x95   :  { %1326 = vmatprep.mubr.bf16.mxu1 %v1492_v61 }
  0x9b   :  { %1230 = vmatmul.mubr.bf16.gmra.mrb[60].mxu0 %v1489_v62 }
  0x9c   :  { %1327 = vmatmul.mubr.bf16.gmra.mrb[60].mxu1 %v1491_v63 }
  0xf6   :  { %v1574_v0 = vpop.f32.mrb[0].mxu0 }
  0xf7   :  { %v1638_v1 = vpop.f32.mrb[0].mxu1  ;;  %v1575_v2 = vpop.f32.mrb[1].mxu0 }
  0xf8   :  { %v1576_v3 = vadd.f32 %v1575_v2, %v1574_v0  ;;  %v1639_v4 = vpop.f32.mrb[1].mxu1  ;;  %v1577_v5 = vpop.f32.mrb[2].mxu0 }
  0xf9   :  { %v1640_v6 = vadd.f32 %v1639_v4, %v1638_v1  ;;  %v1641_v7 = vpop.f32.mrb[2].mxu1  ;;  %v1578_v8 = vpop.f32.mrb[3].mxu0 }
  0xfa   :  { %v1579_v9 = vadd.f32 %v1578_v8, %v1577_v5  ;;  %v1642_v10 = vpop.f32.mrb[3].mxu1 }
  0xfb   :  { %v2282_v11 = vadd.f32 %v1640_v6, %v1576_v3  ;;  %v1643_v12 = vadd.f32 %v1642_v10, %v1641_v7 }
  0xfd   :  { %v2284_v13 = vadd.f32 %v1643_v12, %v1579_v9 }
  0xfe   :  { %v1580_v14 = vpop.f32.mrb[4].mxu0 }
  0xff   :  { %v1644_v15 = vpop.f32.mrb[4].mxu1  ;;  %v1581_v16 = vpop.f32.mrb[5].mxu0 }
 0x100   :  { %v1582_v17 = vadd.f32 %v1581_v16, %v1580_v14  ;;  %v1645_v18 = vpop.f32.mrb[5].mxu1  ;;  %v1583_v19 = vpop.f32.mrb[6].mxu0 }
 0x101   :  { %v1646_v20 = vadd.f32 %v1645_v18, %v1644_v15  ;;  %v1647_v21 = vpop.f32.mrb[6].mxu1  ;;  %v1584_v22 = vpop.f32.mrb[7].mxu0 }
 0x102   :  { %v1585_v23 = vadd.f32 %v1584_v22, %v1583_v19  ;;  %v1648_v24 = vpop.f32.mrb[7].mxu1 }
 0x103   :  { %v2286_v25 = vadd.f32 %v1646_v20, %v1582_v17  ;;  %v1649_v26 = vadd.f32 %v1648_v24, %v1647_v21 }
 0x105   :  { %v2288_v27 = vadd.f32 %v1649_v26, %v1585_v23 }
 0x106   :  { %v1586_v28 = vpop.f32.mrb[8].mxu0 }
 0x107   :  { %v1650_v29 = vpop.f32.mrb[8].mxu1  ;;  %v1587_v30 = vpop.f32.mrb[9].mxu0 }
 0x108   :  { %v1588_v31 = vadd.f32 %v1587_v30, %v1586_v28  ;;  %v1651_v32 = vpop.f32.mrb[9].mxu1  ;;  %v1589_v33 = vpop.f32.mrb[10].mxu0 }
 0x109   :  { %v1652_v34 = vadd.f32 %v1651_v32, %v1650_v29  ;;  %v1653_v35 = vpop.f32.mrb[10].mxu1  ;;  %v1590_v36 = vpop.f32.mrb[11].mxu0 }
 0x10a   :  { %v1591_v37 = vadd.f32 %v1590_v36, %v1589_v33  ;;  %v1654_v38 = vpop.f32.mrb[11].mxu1 }
 0x10b   :  { %v2290_v39 = vadd.f32 %v1652_v34, %v1588_v31  ;;  %v1655_v40 = vadd.f32 %v1654_v38, %v1653_v35 }
 0x10d   :  { %v2292_v41 = vadd.f32 %v1655_v40, %v1591_v37 }
 0x10e   :  { %v1592_v42 = vpop.f32.mrb[12].mxu0 }
 0x10f   :  { %v1656_v43 = vpop.f32.mrb[12].mxu1  ;;  %v1593_v44 = vpop.f32.mrb[13].mxu0 }
 0x110   :  { %v1594_v45 = vadd.f32 %v1593_v44, %v1592_v42  ;;  %v1657_v46 = vpop.f32.mrb[13].mxu1  ;;  %v1595_v47 = vpop.f32.mrb[14].mxu0 }
 0x111   :  { %v1658_v48 = vadd.f32 %v1657_v46, %v1656_v43  ;;  %v1659_v49 = vpop.f32.mrb[14].mxu1  ;;  %v1596_v50 = vpop.f32.mrb[15].mxu0 }
 0x112   :  { %v1597_v51 = vadd.f32 %v1596_v50, %v1595_v47  ;;  %v1660_v52 = vpop.f32.mrb[15].mxu1 }
 0x113   :  { %v2294_v53 = vadd.f32 %v1658_v48, %v1594_v45  ;;  %v1661_v54 = vadd.f32 %v1660_v52, %v1659_v49 }
 0x115   :  { %v2296_v55 = vadd.f32 %v1661_v54, %v1597_v51 }
 0x116   :  { %v1598_v56 = vpop.f32.mrb[16].mxu0 }
 0x117   :  { %v1662_v57 = vpop.f32.mrb[16].mxu1  ;;  %v1599_v58 = vpop.f32.mrb[17].mxu0 }
 0x118   :  { %v1600_v59 = vadd.f32 %v1599_v58, %v1598_v56  ;;  %v1663_v60 = vpop.f32.mrb[17].mxu1  ;;  %v1601_v61 = vpop.f32.mrb[18].mxu0 }
 0x119   :  { %v1664_v62 = vadd.f32 %v1663_v60, %v1662_v57  ;;  %v1665_v63 = vpop.f32.mrb[18].mxu1  ;;  %v1602_v0 = vpop.f32.mrb[19].mxu0 }
 0x11a   :  { %v1603_v1 = vadd.f32 %v1602_v0, %v1601_v61  ;;  %v1666_v2 = vpop.f32.mrb[19].mxu1 }
 0x11b   :  { %v2298_v3 = vadd.f32 %v1664_v62, %v1600_v59  ;;  %v1667_v4 = vadd.f32 %v1666_v2, %v1665_v63 }
 0x11d   :  { %v2300_v5 = vadd.f32 %v1667_v4, %v1603_v1 }
 0x11e   :  { %v1604_v6 = vpop.f32.mrb[20].mxu0 }
 0x11f   :  { %v1668_v7 = vpop.f32.mrb[20].mxu1  ;;  %v1605_v8 = vpop.f32.mrb[21].mxu0 }
 0x120   :  { %v1606_v9 = vadd.f32 %v1605_v8, %v1604_v6  ;;  %v1669_v10 = vpop.f32.mrb[21].mxu1  ;;  %v1607_v12 = vpop.f32.mrb[22].mxu0  ;;  %v2318_v6 = vld [vmem:[%s2401_s2] ss:$0 sm:$0xff] }
 0x121   :  { %v1670_v14 = vadd.f32 %v1669_v10, %v1668_v7  ;;  %v1671_v15 = vpop.f32.mrb[22].mxu1  ;;  %v1608_v16 = vpop.f32.mrb[23].mxu0 }
 0x122   :  { %v1609_v17 = vadd.f32 %v1608_v16, %v1607_v12  ;;  %v1672_v18 = vpop.f32.mrb[23].mxu1 }
 0x123   :  { %v2302_v19 = vadd.f32 %v1670_v14, %v1606_v9  ;;  %v1673_v20 = vadd.f32 %v1672_v18, %v1671_v15 }
 0x125   :  { %v2304_v21 = vadd.f32 %v1673_v20, %v1609_v17 }
 0x126   :  { %v1610_v22 = vpop.f32.mrb[24].mxu0 }
 0x127   :  { %v1674_v23 = vpop.f32.mrb[24].mxu1  ;;  %v1611_v24 = vpop.f32.mrb[25].mxu0 }
 0x128   :  { %v1612_v26 = vadd.f32 %v1611_v24, %v1610_v22  ;;  %v1675_v28 = vpop.f32.mrb[25].mxu1  ;;  %v1613_v29 = vpop.f32.mrb[26].mxu0 }
 0x129   :  { %v1676_v30 = vadd.f32 %v1675_v28, %v1674_v23  ;;  %v1677_v31 = vpop.f32.mrb[26].mxu1  ;;  %v1614_v32 = vpop.f32.mrb[27].mxu0 }
 0x12a   :  { %v1615_v33 = vadd.f32 %v1614_v32, %v1613_v29  ;;  %v1678_v34 = vpop.f32.mrb[27].mxu1 }
 0x12b   :  { %v2306_v35 = vadd.f32 %v1676_v30, %v1612_v26  ;;  %v1679_v36 = vadd.f32 %v1678_v34, %v1677_v31 }
 0x12d   :  { %v2308_v37 = vadd.f32 %v1679_v36, %v1615_v33 }
 0x12e   :  { %v1616_v38 = vpop.f32.mrb[28].mxu0 }
 0x12f   :  { %v1680_v40 = vpop.f32.mrb[28].mxu1  ;;  %v1617_v42 = vpop.f32.mrb[29].mxu0 }
 0x130   :  { %v1618_v43 = vadd.f32 %v1617_v42, %v1616_v38  ;;  %v1681_v44 = vpop.f32.mrb[29].mxu1  ;;  %v1619_v45 = vpop.f32.mrb[30].mxu0 }
 0x131   :  { %v1682_v46 = vadd.f32 %v1681_v44, %v1680_v40  ;;  %v1683_v47 = vpop.f32.mrb[30].mxu1  ;;  %v1620_v48 = vpop.f32.mrb[31].mxu0 }
 0x132   :  { %v1621_v49 = vadd.f32 %v1620_v48, %v1619_v45  ;;  %v1684_v50 = vpop.f32.mrb[31].mxu1 }
 0x133   :  { %v2310_v51 = vadd.f32 %v1682_v46, %v1618_v43  ;;  %v1685_v52 = vadd.f32 %v1684_v50, %v1683_v47 }
 0x135   :  { %v2312_v54 = vadd.f32 %v1685_v52, %v1621_v49 }
 0x136   :  { %v1702_v56 = vpop.f32.mrb[32].mxu0 }
 0x137   :  { %v1766_v57 = vpop.f32.mrb[32].mxu1  ;;  %v1703_v58 = vpop.f32.mrb[33].mxu0 }
 0x138   :  { %v1704_v59 = vadd.f32 %v1703_v58, %v1702_v56  ;;  %v1767_v60 = vpop.f32.mrb[33].mxu1  ;;  %v1705_v61 = vpop.f32.mrb[34].mxu0 }
 0x139   :  { %v1768_v62 = vadd.f32 %v1767_v60, %v1766_v57  ;;  %v1769_v63 = vpop.f32.mrb[34].mxu1  ;;  %v1706_v0 = vpop.f32.mrb[35].mxu0 }
 0x13a   :  { %v1176_v1 = vadd.f32 %v1704_v59, %v2282_v11  ;;  %v1707_v2 = vadd.f32 %v1706_v0, %v1705_v61  ;;  %v1770_v4 = vpop.f32.mrb[35].mxu1 }
 0x13b   :  { %v1771_v7 = vadd.f32 %v1770_v4, %v1769_v63 }
 0x13c   :  { %v1273_v8 = vadd.f32 %v1768_v62, %v1176_v1  ;;  %v1179_v9 = vadd.f32 %v1707_v2, %v2284_v13 }
 0x13e   :  { %v1393_v10 = vadd.f32 %v2318_v6, %v1273_v8  ;;  %v1276_v12 = vadd.f32 %v1771_v7, %v1179_v9  ;;  %v1708_v14 = vpop.f32.mrb[36].mxu0 }
 0x13f   :  { %v1772_v15 = vpop.f32.mrb[36].mxu1  ;;  %v1709_v16 = vpop.f32.mrb[37].mxu0 }
 0x140   :  { %1409 = vst [vmem:[%s2402_s3] sm:$0xff] %v1393_v10  ;;  %v1394_v11 = vadd.f32 %v2318_v6, %v1276_v12  ;;  %v1710_v17 = vadd.f32 %v1709_v16, %v1708_v14  ;;  %v1773_v18 = vpop.f32.mrb[37].mxu1  ;;  %v1711_v20 = vpop.f32.mrb[38].mxu0 }
 0x141   :  { %v1774_v22 = vadd.f32 %v1773_v18, %v1772_v15  ;;  %v1775_v23 = vpop.f32.mrb[38].mxu1  ;;  %v1712_v24 = vpop.f32.mrb[39].mxu0 }
 0x142   :  { %1410 = vst [vmem:[%s2402_s3 + $0x8] sm:$0xff] %v1394_v11  ;;  %v1184_v13 = vadd.f32 %v1710_v17, %v2286_v25  ;;  %v1713_v26 = vadd.f32 %v1712_v24, %v1711_v20  ;;  %v1776_v28 = vpop.f32.mrb[39].mxu1 }
 0x143   :  { %v1777_v29 = vadd.f32 %v1776_v28, %v1775_v23 }
 0x144   :  { %v1281_v30 = vadd.f32 %v1774_v22, %v1184_v13  ;;  %v1187_v31 = vadd.f32 %v1713_v26, %v2288_v27 }
 0x146   :  { %v1395_v32 = vadd.f32 %v2318_v6, %v1281_v30  ;;  %v1284_v33 = vadd.f32 %v1777_v29, %v1187_v31  ;;  %v1714_v34 = vpop.f32.mrb[40].mxu0 }
 0x147   :  { %v1778_v36 = vpop.f32.mrb[40].mxu1  ;;  %v1715_v38 = vpop.f32.mrb[41].mxu0 }
 0x148   :  { %1411 = vst [vmem:[%s2402_s3 + $0x10] sm:$0xff] %v1395_v32  ;;  %v1396_v40 = vadd.f32 %v2318_v6, %v1284_v33  ;;  %v1716_v42 = vadd.f32 %v1715_v38, %v1714_v34  ;;  %v1779_v25 = vpop.f32.mrb[41].mxu1  ;;  %v1717_v43 = vpop.f32.mrb[42].mxu0 }
 0x149   :  { %v1780_v44 = vadd.f32 %v1779_v25, %v1778_v36  ;;  %v1781_v45 = vpop.f32.mrb[42].mxu1  ;;  %v1718_v46 = vpop.f32.mrb[43].mxu0 }
 0x14a   :  { %1412 = vst [vmem:[%s2402_s3 + $0x18] sm:$0xff] %v1396_v40  ;;  %v1192_v27 = vadd.f32 %v1716_v42, %v2290_v39  ;;  %v1719_v47 = vadd.f32 %v1718_v46, %v1717_v43  ;;  %v1782_v48 = vpop.f32.mrb[43].mxu1 }
 0x14b   :  { %v1783_v49 = vadd.f32 %v1782_v48, %v1781_v45 }
 0x14c   :  { %v1289_v50 = vadd.f32 %v1780_v44, %v1192_v27  ;;  %v1195_v52 = vadd.f32 %v1719_v47, %v2292_v41 }
 0x14e   :  { %v1397_v56 = vadd.f32 %v2318_v6, %v1289_v50  ;;  %v1292_v57 = vadd.f32 %v1783_v49, %v1195_v52  ;;  %v1720_v58 = vpop.f32.mrb[44].mxu0 }
 0x14f   :  { %v1784_v59 = vpop.f32.mrb[44].mxu1  ;;  %v1721_v60 = vpop.f32.mrb[45].mxu0 }
 0x150   :  { %1413 = vst [vmem:[%s2402_s3 + $0x20] sm:$0xff] %v1397_v56  ;;  %v1398_v61 = vadd.f32 %v2318_v6, %v1292_v57  ;;  %v1722_v62 = vadd.f32 %v1721_v60, %v1720_v58  ;;  %v1785_v39 = vpop.f32.mrb[45].mxu1  ;;  %v1723_v63 = vpop.f32.mrb[46].mxu0 }
 0x151   :  { %v1786_v0 = vadd.f32 %v1785_v39, %v1784_v59  ;;  %v1787_v1 = vpop.f32.mrb[46].mxu1  ;;  %v1724_v2 = vpop.f32.mrb[47].mxu0 }
 0x152   :  { %1414 = vst [vmem:[%s2402_s3 + $0x28] sm:$0xff] %v1398_v61  ;;  %v1200_v41 = vadd.f32 %v1722_v62, %v2294_v53  ;;  %v1725_v4 = vadd.f32 %v1724_v2, %v1723_v63  ;;  %v1788_v7 = vpop.f32.mrb[47].mxu1 }
 0x153   :  { %v1789_v8 = vadd.f32 %v1788_v7, %v1787_v1 }
 0x154   :  { %v1297_v9 = vadd.f32 %v1786_v0, %v1200_v41  ;;  %v1203_v10 = vadd.f32 %v1725_v4, %v2296_v55 }
 0x156   :  { %v1399_v12 = vadd.f32 %v2318_v6, %v1297_v9  ;;  %v1300_v14 = vadd.f32 %v1789_v8, %v1203_v10  ;;  %v1726_v15 = vpop.f32.mrb[48].mxu0 }
 0x157   :  { %v1790_v16 = vpop.f32.mrb[48].mxu1  ;;  %v1727_v11 = vpop.f32.mrb[49].mxu0 }
 0x158   :  { %1415 = vst [vmem:[%s2402_s3 + $0x30] sm:$0xff] %v1399_v12  ;;  %v1400_v17 = vadd.f32 %v2318_v6, %v1300_v14  ;;  %v1728_v18 = vadd.f32 %v1727_v11, %v1726_v15  ;;  %v1791_v53 = vpop.f32.mrb[49].mxu1  ;;  %v1729_v20 = vpop.f32.mrb[50].mxu0 }
 0x159   :  { %v1792_v22 = vadd.f32 %v1791_v53, %v1790_v16  ;;  %v1793_v23 = vpop.f32.mrb[50].mxu1  ;;  %v1730_v24 = vpop.f32.mrb[51].mxu0 }
 0x15a   :  { %1416 = vst [vmem:[%s2402_s3 + $0x38] sm:$0xff] %v1400_v17  ;;  %v1208_v55 = vadd.f32 %v1728_v18, %v2298_v3  ;;  %v1731_v13 = vadd.f32 %v1730_v24, %v1729_v20  ;;  %v1794_v26 = vpop.f32.mrb[51].mxu1 }
 0x15b   :  { %v1795_v28 = vadd.f32 %v1794_v26, %v1793_v23 }
 0x15c   :  { %v1305_v29 = vadd.f32 %v1792_v22, %v1208_v55  ;;  %v1211_v30 = vadd.f32 %v1731_v13, %v2300_v5 }
 0x15e   :  { %v1401_v31 = vadd.f32 %v2318_v6, %v1305_v29  ;;  %v1308_v32 = vadd.f32 %v1795_v28, %v1211_v30  ;;  %v1732_v33 = vpop.f32.mrb[52].mxu0 }
 0x15f   :  { %v1796_v34 = vpop.f32.mrb[52].mxu1  ;;  %v1733_v36 = vpop.f32.mrb[53].mxu0 }
 0x160   :  { %1417 = vst [vmem:[%s2402_s3 + $0x40] sm:$0xff] %v1401_v31  ;;  %v1402_v38 = vadd.f32 %v2318_v6, %v1308_v32  ;;  %v1734_v40 = vadd.f32 %v1733_v36, %v1732_v33  ;;  %v1797_v3 = vpop.f32.mrb[53].mxu1  ;;  %v1735_v42 = vpop.f32.mrb[54].mxu0 }
 0x161   :  { %v1798_v25 = vadd.f32 %v1797_v3, %v1796_v34  ;;  %v1799_v43 = vpop.f32.mrb[54].mxu1  ;;  %v1736_v44 = vpop.f32.mrb[55].mxu0 }
 0x162   :  { %1418 = vst [vmem:[%s2402_s3 + $0x48] sm:$0xff] %v1402_v38  ;;  %v1216_v5 = vadd.f32 %v1734_v40, %v2302_v19  ;;  %v1737_v45 = vadd.f32 %v1736_v44, %v1735_v42  ;;  %v1800_v46 = vpop.f32.mrb[55].mxu1 }
 0x163   :  { %v1801_v27 = vadd.f32 %v1800_v46, %v1799_v43 }
 0x164   :  { %v1313_v47 = vadd.f32 %v1798_v25, %v1216_v5  ;;  %v1219_v48 = vadd.f32 %v1737_v45, %v2304_v21 }
 0x166   :  { %v1403_v49 = vadd.f32 %v2318_v6, %v1313_v47  ;;  %v1316_v50 = vadd.f32 %v1801_v27, %v1219_v48  ;;  %v1738_v52 = vpop.f32.mrb[56].mxu0 }
 0x167   :  { %v1802_v56 = vpop.f32.mrb[56].mxu1  ;;  %v1739_v57 = vpop.f32.mrb[57].mxu0 }
 0x168   :  { %1419 = vst [vmem:[%s2402_s3 + $0x50] sm:$0xff] %v1403_v49  ;;  %v1404_v58 = vadd.f32 %v2318_v6, %v1316_v50  ;;  %v1740_v59 = vadd.f32 %v1739_v57, %v1738_v52  ;;  %v1803_v19 = vpop.f32.mrb[57].mxu1  ;;  %v1741_v60 = vpop.f32.mrb[58].mxu0 }
 0x169   :  { %v1804_v61 = vadd.f32 %v1803_v19, %v1802_v56  ;;  %v1805_v62 = vpop.f32.mrb[58].mxu1  ;;  %v1742_v39 = vpop.f32.mrb[59].mxu0 }
 0x16a   :  { %1420 = vst [vmem:[%s2402_s3 + $0x58] sm:$0xff] %v1404_v58  ;;  %v1224_v21 = vadd.f32 %v1740_v59, %v2306_v35  ;;  %v1743_v63 = vadd.f32 %v1742_v39, %v1741_v60  ;;  %v1806_v0 = vpop.f32.mrb[59].mxu1 }
 0x16b   :  { %v1807_v1 = vadd.f32 %v1806_v0, %v1805_v62 }
 0x16c   :  { %v1321_v2 = vadd.f32 %v1804_v61, %v1224_v21  ;;  %v1227_v41 = vadd.f32 %v1743_v63, %v2308_v37 }
 0x16e   :  { %v1405_v4 = vadd.f32 %v2318_v6, %v1321_v2  ;;  %v1324_v7 = vadd.f32 %v1807_v1, %v1227_v41  ;;  %v1744_v8 = vpop.f32.mrb[60].mxu0 }
 0x16f   :  { %v1808_v9 = vpop.f32.mrb[60].mxu1  ;;  %v1745_v10 = vpop.f32.mrb[61].mxu0 }
 0x170   :  { %1421 = vst [vmem:[%s2402_s3 + $0x60] sm:$0xff] %v1405_v4  ;;  %v1406_v12 = vadd.f32 %v2318_v6, %v1324_v7  ;;  %v1746_v14 = vadd.f32 %v1745_v10, %v1744_v8  ;;  %v1809_v35 = vpop.f32.mrb[61].mxu1  ;;  %v1747_v15 = vpop.f32.mrb[62].mxu0 }
 0x171   :  { %v1810_v16 = vadd.f32 %v1809_v35, %v1808_v9  ;;  %v1811_v11 = vpop.f32.mrb[62].mxu1  ;;  %v1748_v17 = vpop.f32.mrb[63].mxu0 }
 0x172   :  { %1422 = vst [vmem:[%s2402_s3 + $0x68] sm:$0xff] %v1406_v12  ;;  %v1232_v37 = vadd.f32 %v1746_v14, %v2310_v51  ;;  %v1749_v18 = vadd.f32 %v1748_v17, %v1747_v15  ;;  %v1812_v53 = vpop.f32.mrb[63].mxu1 }
 0x173   :  { %v1813_v20 = vadd.f32 %v1812_v53, %v1811_v11 }
 0x174   :  { %v1329_v22 = vadd.f32 %v1810_v16, %v1232_v37  ;;  %v1235_v23 = vadd.f32 %v1749_v18, %v2312_v54 }
 0x176   :  { %v1407_v24 = vadd.f32 %v2318_v6, %v1329_v22  ;;  %v1332_v55 = vadd.f32 %v1813_v20, %v1235_v23 }
 0x178   :  { %1423 = vst [vmem:[%s2402_s3 + $0x70] sm:$0xff] %v1407_v24  ;;  %v1408_v13 = vadd.f32 %v2318_v6, %v1332_v55 }
 0x17a   :  { %1424 = vst [vmem:[%s2402_s3 + $0x78] sm:$0xff] %v1408_v13 }

// kernel: discriminator_forward.10
= control target key start
LH: loop header
LB: loop body
LE: loop exit
PB: predicated region body
PF: predicated region fallthrough
CT: control target
= control target key end

     0   :  { %s401_s6 = smov 0   ;;  %s403_s7 = smov 0   ;;  %s451_s0 = inlined_call_operand.vmem [shape: f32[2,64,128], index: 0, kind: input, shape index: {}]   ;;  %s452_s1 = inlined_call_operand.vmem [shape: f32[2,64,128], index: 1, kind: output, shape index: {}]  }
   0x1   :  { %s405_s8 = smov 0  }
   0x2 LB: > { %s23_s9 = sadd.s32 1, %s385_s7  ;;  %p332_p0 = scmp.ge.s32.totalorder %s389_s8, 1  ;;  %s389_s8 = sphi %s405_s8, %s11_s8   ;;  %s385_s7 = sphi %s403_s7, %s454_s7   ;;  %s381_s6 = sphi %s401_s6, %s453_s6  }
   0x3   : > { %p25_p1 = scmp.ge.s32.totalorder %s23_s9, 2  ;;  %p106_p2 = scmp.lt.s32.totalorder %s389_s8, 3 }
   0x5   : > { %s456_s9 = smov (%p25_p1, %s23_s9), 0  ;;  %p107_p3 = pnand %p332_p0, %p106_p2 }
   0x6   : > { %p132_p4 = scmp.lt.s32.totalorder (!%p107_p3), %s381_s6, 1 }
   0x7   : > { %110 = sbr.rel (%p107_p3) target bundleno = 76 (0x4c), region = 24 }
   0xe   : > { %s458_s6 = smov (!%p132_p4, %s381_s6), 1 }
   0xf   : > { %s339_s10 = sshll.u32 %s458_s6, 6 }
  0x10   : > { %s139_s13 = scalar_lea.vmem %s451_s0, %s339_s10  ;;  %s432_s16 = scalar_lea.vmem %s452_s1, %s339_s10 }
  0x11   : > { %v148_v0 = vld [vmem:[%s139_s13] sm:$0xff]  ;;  %v149_v1 = vld [vmem:[%s139_s13 + $0x8] sm:$0xff]  ;;  %v150_v2 = vld [vmem:[%s139_s13 + $0x10] sm:$0xff] }
  0x12   : > { %v151_v3 = vld [vmem:[%s139_s13 + $0x18] sm:$0xff]  ;;  %v156_v4 = vadd.f32 %v149_v1, %v148_v0  ;;  %v169_v5 = vmul.f32 %v148_v0, %v148_v0  ;;  %v170_v6 = vmul.f32 %v149_v1, %v149_v1  ;;  %v171_v7 = vmul.f32 %v150_v2, %v150_v2  ;;  %v152_v8 = vld [vmem:[%s139_s13 + $0x20] sm:$0xff]  ;;  %v153_v12 = vld [vmem:[%s139_s13 + $0x28] sm:$0xff] }
  0x13   : > { %v172_v10 = vmul.f32 %v151_v3, %v151_v3  ;;  %v173_v14 = vmul.f32 %v152_v8, %v152_v8  ;;  %v154_v16 = vld [vmem:[%s139_s13 + $0x30] sm:$0xff]  ;;  %v174_v18 = vmul.f32 %v153_v12, %v153_v12  ;;  %v155_v20 = vld [vmem:[%s139_s13 + $0x38] sm:$0xff] }
  0x14   : > { %v157_v9 = vadd.f32 %v156_v4, %v150_v2  ;;  %v177_v11 = vadd.f32 %v170_v6, %v169_v5  ;;  %v175_v22 = vmul.f32 %v154_v16, %v154_v16  ;;  %v176_v25 = vmul.f32 %v155_v20, %v155_v20 }
  0x16   : > { %v158_v13 = vadd.f32 %v157_v9, %v151_v3  ;;  %v178_v15 = vadd.f32 %v177_v11, %v171_v7 }
  0x18   : > { %v159_v17 = vadd.f32 %v158_v13, %v152_v8  ;;  %v179_v19 = vadd.f32 %v178_v15, %v172_v10 }
  0x1a   : > { %v160_v21 = vadd.f32 %v159_v17, %v153_v12  ;;  %v180_v23 = vadd.f32 %v179_v19, %v173_v14 }
  0x1c   : > { %v161_v24 = vadd.f32 %v160_v21, %v154_v16  ;;  %v181_v26 = vadd.f32 %v180_v23, %v174_v18 }
  0x1e   : > { %v162_v27 = vadd.f32 %v161_v24, %v155_v20  ;;  %v182_v28 = vadd.f32 %v181_v26, %v175_v22 }
  0x20   : > { %v163_v29 = vrot.slane %v162_v27, 4  ;;  %v183_v30 = vadd.f32 %v182_v28, %v176_v25 }
  0x22   : > { %v164_v31 = vadd.f32 %v163_v29, %v162_v27  ;;  %v184_v32 = vrot.slane %v183_v30, 4 }
  0x24   : > { %v165_v33 = vrot.slane %v164_v31, 2  ;;  %v185_v34 = vadd.f32 %v184_v32, %v183_v30 }
  0x26   : > { %v166_v35 = vadd.f32 %v165_v33, %v164_v31  ;;  %v186_v36 = vrot.slane %v185_v34, 2 }
  0x28   : > { %v167_v37 = vrot.slane %v166_v35, 1  ;;  %v187_v38 = vadd.f32 %v186_v36, %v185_v34 }
  0x2a   : > { %v168_v39 = vadd.f32 %v167_v37, %v166_v35  ;;  %v188_v40 = vrot.slane %v187_v38, 1 }
  0x2c   : > { %v189_v41 = vadd.f32 %v188_v40, %v187_v38  ;;  %v190_v42 = vmul.f32 0.015625, %v168_v39 }
  0x2e   : > { %v191_v43 = vmul.f32 0.015625, %v189_v41  ;;  %v192_v44 = vmul.f32 %v190_v42, %v190_v42  ;;  %v195_v48 = vsub.f32 %v148_v0, %v190_v42  ;;  %v196_v49 = vsub.f32 %v149_v1, %v190_v42 }
  0x2f   : > { %v197_v50 = vsub.f32 %v150_v2, %v190_v42  ;;  %v198_v51 = vsub.f32 %v151_v3, %v190_v42  ;;  %v199_v52 = vsub.f32 %v152_v8, %v190_v42  ;;  %v200_v53 = vsub.f32 %v153_v12, %v190_v42 }
  0x30   : > { %v193_v45 = vsub.f32 %v191_v43, %v192_v44  ;;  %v201_v54 = vsub.f32 %v154_v16, %v190_v42  ;;  %v202_v55 = vsub.f32 %v155_v20, %v190_v42 }
  0x32   : > { %v194_v46 = vmax.f32 %v193_v45, 0.0 }
  0x34   : > { %v203_v47 = vadd.f32 1e-05, %v194_v46 }
  0x36   : > { %365 = vrsqrt.f32 %v203_v47 }
  0x40   : > { %v366_v56 = vpop.eup %365 }
  0x41   : > { %v205_v57 = vmul.f32 %v366_v56, %v195_v48  ;;  %v206_v58 = vmul.f32 %v366_v56, %v196_v49  ;;  %v207_v59 = vmul.f32 %v366_v56, %v197_v50  ;;  %v208_v60 = vmul.f32 %v366_v56, %v198_v51 }
  0x42   : > { %v209_v61 = vmul.f32 %v366_v56, %v199_v52  ;;  %v210_v62 = vmul.f32 %v366_v56, %v200_v53  ;;  %v211_v63 = vmul.f32 %v366_v56, %v201_v54  ;;  %v212_v4 = vmul.f32 %v366_v56, %v202_v55 }
  0x43   : > { %vm213_vm0 = vcmp.ge.f32.partialorder %v205_v57, 0.0  ;;  %v221_v0 = vmul.f32 0.2, %v205_v57  ;;  %vm214_vm1 = vcmp.ge.f32.partialorder %v206_v58, 0.0  ;;  %v222_v1 = vmul.f32 0.2, %v206_v58 }
  0x44   : > { %vm215_vm2 = vcmp.ge.f32.partialorder %v207_v59, 0.0  ;;  %v223_v2 = vmul.f32 0.2, %v207_v59  ;;  %vm216_vm3 = vcmp.ge.f32.partialorder %v208_v60, 0.0  ;;  %v224_v3 = vmul.f32 0.2, %v208_v60 }
  0x45   : > { %v229_v5 = vsel %vm213_vm0, %v205_v57, %v221_v0  ;;  %v230_v6 = vsel %vm214_vm1, %v206_v58, %v222_v1  ;;  %vm217_vm4 = vcmp.ge.f32.partialorder %v209_v61, 0.0  ;;  %v225_v7 = vmul.f32 0.2, %v209_v61 }
  0x46   : > { %237 = vst [vmem:[%s432_s16] sm:$0xff] %v229_v5  ;;  %238 = vst [vmem:[%s432_s16 + $0x8] sm:$0xff] %v230_v6  ;;  %v231_v8 = vsel %vm215_vm2, %v207_v59, %v223_v2  ;;  %v232_v9 = vsel %vm216_vm3, %v208_v60, %v224_v3  ;;  %vm218_vm5 = vcmp.ge.f32.partialorder %v210_v62, 0.0  ;;  %v226_v10 = vmul.f32 0.2, %v210_v62 }
  0x47   : > { %239 = vst [vmem:[%s432_s16 + $0x10] sm:$0xff] %v231_v8  ;;  %240 = vst [vmem:[%s432_s16 + $0x18] sm:$0xff] %v232_v9  ;;  %v233_v11 = vsel %vm217_vm4, %v209_v61, %v225_v7  ;;  %vm219_vm6 = vcmp.ge.f32.partialorder %v211_v63, 0.0  ;;  %v227_v12 = vmul.f32 0.2, %v211_v63  ;;  %vm220_vm7 = vcmp.ge.f32.partialorder %v212_v4, 0.0 }
  0x48   : > { %241 = vst [vmem:[%s432_s16 + $0x20] sm:$0xff] %v233_v11  ;;  %v234_v13 = vsel %vm218_vm5, %v210_v62, %v226_v10  ;;  %v228_v14 = vmul.f32 0.2, %v212_v4 }
  0x49   : > { %242 = vst [vmem:[%s432_s16 + $0x28] sm:$0xff] %v234_v13  ;;  %v235_v15 = vsel %vm219_vm6, %v211_v63, %v227_v12 }
  0x4a   : > { %243 = vst [vmem:[%s432_s16 + $0x30] sm:$0xff] %v235_v15  ;;  %v236_v16 = vsel %vm220_vm7, %v212_v4, %v228_v14 }
  0x4b   : > { %244 = vst [vmem:[%s432_s16 + $0x38] sm:$0xff] %v236_v16 }
  0x4c PF: > { %s11_s8 = sadd.s32 1, %s389_s8   ;;  %s453_s6 = smov %s385_s7 }
  0x4d   : > { %p8_p5 = scmp.ge.s32.totalorder %s11_s8, 4   ;;  %s454_s7 = smov %s456_s9 }
  0x4f   :  { %10 = sbr.rel (!%p8_p5) target bundleno = 2 (0x2), region = 54 }

// kernel: discriminator_forward.12
= control target key start
LH: loop header
LB: loop body
LE: loop exit
PB: predicated region body
PF: predicated region fallthrough
CT: control target
= control target key end

     0   :  { %s392_s6 = smov 0   ;;  %s394_s7 = smov 0   ;;  %s432_s0 = inlined_call_operand.vmem [shape: f32[2,16,256], index: 0, kind: input, shape index: {}]   ;;  %s433_s1 = inlined_call_operand.vmem [shape: f32[2,16,256], index: 1, kind: output, shape index: {}]  }
   0x1   :  { %s396_s8 = smov 0  }
   0x2 LB: > { %s23_s9 = sadd.s32 1, %s376_s7  ;;  %p321_p0 = scmp.ge.s32.totalorder %s380_s8, 1  ;;  %s380_s8 = sphi %s396_s8, %s11_s8   ;;  %s376_s7 = sphi %s394_s7, %s435_s7   ;;  %s372_s6 = sphi %s392_s6, %s434_s6  }
   0x3   : > { %p25_p1 = scmp.ge.s32.totalorder %s23_s9, 2  ;;  %p108_p2 = scmp.lt.s32.totalorder %s380_s8, 3 }
   0x5   : > { %s437_s9 = smov (%p25_p1, %s23_s9), 0  ;;  %p109_p3 = pnand %p321_p0, %p108_p2 }
   0x6   : > { %p137_p4 = scmp.lt.s32.totalorder (!%p109_p3), %s372_s6, 1 }
   0x7   : > { %112 = sbr.rel (%p109_p3) target bundleno = 60 (0x3c), region = 24 }
   0xe   : > { %s439_s6 = smov (!%p137_p4, %s372_s6), 1 }
   0xf   : > { %s328_s10 = sshll.u32 %s439_s6, 5 }
  0x10   : > { %s144_s13 = scalar_lea.vmem %s432_s0, %s328_s10  ;;  %s154_s16 = scalar_lea.vmem %s433_s1, %s328_s10 }
  0x11   : > { %v156_v0 = vld [vmem:[%s144_s13] sm:$0xff]  ;;  %v158_v1 = vld [vmem:[%s144_s13 + $0x10] sm:$0xff]  ;;  %v159_v2 = vld [vmem:[%s144_s13 + $0x18] sm:$0xff] }
  0x12   : > { %v160_v3 = vadd.f32 %v158_v1, %v156_v0  ;;  %v174_v4 = vmul.f32 %v156_v0, %v156_v0  ;;  %v176_v5 = vmul.f32 %v158_v1, %v158_v1  ;;  %v177_v6 = vmul.f32 %v159_v2, %v159_v2  ;;  %v157_v7 = vld [vmem:[%s144_s13 + $0x8] sm:$0xff] }
  0x13   : > { %v167_v8 = vadd.f32 %v159_v2, %v157_v7  ;;  %v175_v9 = vmul.f32 %v157_v7, %v157_v7 }
  0x14   : > { %v161_v10 = vrot.slane %v160_v3, 4  ;;  %v178_v11 = vadd.f32 %v176_v5, %v174_v4 }
  0x15   : > { %v168_v12 = vrot.slane %v167_v8, 4  ;;  %v185_v13 = vadd.f32 %v177_v6, %v175_v9 }
  0x16   : > { %v162_v14 = vadd.f32 %v161_v10, %v160_v3  ;;  %v179_v15 = vrot.slane %v178_v11, 4 }
  0x17   : > { %v169_v16 = vadd.f32 %v168_v12, %v167_v8  ;;  %v186_v17 = vrot.slane %v185_v13, 4 }
  0x18   : > { %v163_v18 = vrot.slane %v162_v14, 2  ;;  %v180_v19 = vadd.f32 %v179_v15, %v178_v11 }
  0x19   : > { %v170_v20 = vrot.slane %v169_v16, 2  ;;  %v187_v21 = vadd.f32 %v186_v17, %v185_v13 }
  0x1a   : > { %v164_v22 = vadd.f32 %v163_v18, %v162_v14  ;;  %v181_v23 = vrot.slane %v180_v19, 2 }
  0x1b   : > { %v171_v24 = vadd.f32 %v170_v20, %v169_v16  ;;  %v188_v25 = vrot.slane %v187_v21, 2 }
  0x1c   : > { %v165_v26 = vrot.slane %v164_v22, 1  ;;  %v182_v27 = vadd.f32 %v181_v23, %v180_v19 }
  0x1d   : > { %v172_v28 = vrot.slane %v171_v24, 1  ;;  %v189_v29 = vadd.f32 %v188_v25, %v187_v21 }
  0x1e   : > { %v166_v30 = vadd.f32 %v165_v26, %v164_v22  ;;  %v183_v31 = vrot.slane %v182_v27, 1 }
  0x1f   : > { %v173_v32 = vadd.f32 %v172_v28, %v171_v24  ;;  %v190_v33 = vrot.slane %v189_v29, 1 }
  0x20   : > { %v184_v34 = vadd.f32 %v183_v31, %v182_v27  ;;  %v192_v35 = vmul.f32 0.0625, %v166_v30 }
  0x21   : > { %v191_v36 = vadd.f32 %v190_v33, %v189_v29  ;;  %v193_v37 = vmul.f32 0.0625, %v173_v32 }
  0x22   : > { %v194_v38 = vmul.f32 0.0625, %v184_v34  ;;  %v196_v39 = vmul.f32 %v192_v35, %v192_v35  ;;  %v202_v48 = vsub.f32 %v156_v0, %v192_v35  ;;  %v204_v49 = vsub.f32 %v158_v1, %v192_v35 }
  0x23   : > { %v195_v40 = vmul.f32 0.0625, %v191_v36  ;;  %v197_v41 = vmul.f32 %v193_v37, %v193_v37  ;;  %v203_v50 = vsub.f32 %v157_v7, %v193_v37  ;;  %v205_v51 = vsub.f32 %v159_v2, %v193_v37 }
  0x24   : > { %v198_v42 = vsub.f32 %v194_v38, %v196_v39 }
  0x25   : > { %v199_v43 = vsub.f32 %v195_v40, %v197_v41 }
  0x26   : > { %v200_v44 = vmax.f32 %v198_v42, 0.0 }
  0x27   : > { %v201_v45 = vmax.f32 %v199_v43, 0.0 }
  0x28   : > { %v206_v46 = vadd.f32 1e-05, %v200_v44 }
  0x29   : > { %v207_v47 = vadd.f32 1e-05, %v201_v45 }
  0x2a   : > { %354 = vrsqrt.f32 %v206_v46 }
  0x2b   : > { %356 = vrsqrt.f32 %v207_v47 }
  0x34   : > { %v355_v52 = vpop.eup %354 }
  0x35   : > { %v357_v53 = vpop.eup %356  ;;  %v210_v54 = vmul.f32 %v355_v52, %v202_v48  ;;  %v212_v55 = vmul.f32 %v355_v52, %v204_v49 }
  0x36   : > { %v211_v56 = vmul.f32 %v357_v53, %v203_v50  ;;  %v213_v57 = vmul.f32 %v357_v53, %v205_v51 }
  0x37   : > { %vm214_vm0 = vcmp.ge.f32.partialorder %v210_v54, 0.0  ;;  %v218_v58 = vmul.f32 0.2, %v210_v54  ;;  %vm216_vm1 = vcmp.ge.f32.partialorder %v212_v55, 0.0  ;;  %v220_v59 = vmul.f32 0.2, %v212_v55 }
  0x38   : > { %vm215_vm2 = vcmp.ge.f32.partialorder %v211_v56, 0.0  ;;  %v219_v60 = vmul.f32 0.2, %v211_v56  ;;  %vm217_vm3 = vcmp.ge.f32.partialorder %v213_v57, 0.0  ;;  %v221_v61 = vmul.f32 0.2, %v213_v57 }
  0x39   : > { %v222_v62 = vsel %vm214_vm0, %v210_v54, %v218_v58  ;;  %v224_v63 = vsel %vm216_vm1, %v212_v55, %v220_v59 }
  0x3a   : > { %226 = vst [vmem:[%s154_s16] sm:$0xff] %v222_v62  ;;  %v223_v0 = vsel %vm215_vm2, %v211_v56, %v219_v60  ;;  %228 = vst [vmem:[%s154_s16 + $0x10] sm:$0xff] %v224_v63  ;;  %v225_v1 = vsel %vm217_vm3, %v213_v57, %v221_v61 }
  0x3b   : > { %227 = vst [vmem:[%s154_s16 + $0x8] sm:$0xff] %v223_v0  ;;  %229 = vst [vmem:[%s154_s16 + $0x18] sm:$0xff] %v225_v1 }
  0x3c PF: > { %s11_s8 = sadd.s32 1, %s380_s8   ;;  %s434_s6 = smov %s376_s7 }
  0x3d   : > { %p8_p5 = scmp.ge.s32.totalorder %s11_s8, 4   ;;  %s435_s7 = smov %s437_s9 }
  0x3f   :  { %10 = sbr.rel (!%p8_p5) target bundleno = 2 (0x2), region = 54 }

// kernel: discriminator_forward.11
= control target key start
LH: loop header
LB: loop body
LE: loop exit
PB: predicated region body
PF: predicated region fallthrough
CT: control target
= control target key end

     0   :  { %s1986_s12 = smov 0   ;;  %s1988_s13 = smov 0   ;;  %s2262_s0 = inlined_call_operand.vmem [shape: bf16[32,2048], index: 0, kind: input, shape index: {}]   ;;  %s2263_s1 = inlined_call_operand.vmem [shape: bf16[2048,256], index: 1, kind: input, shape index: {}]   ;;  %s2264_s2 = inlined_call_operand.vmem [shape: f32[1,256], index: 2, kind: input, shape index: {}]   ;;  %s2265_s3 = inlined_call_operand.vmem [shape: f32[32,256], index: 3, kind: output, shape index: {}]  }
   0x1   :  { %s1990_s14 = smov 0   ;;  %s1992_s15 = smov 0  }
   0x2   :  { %s1994_s16 = smov 0  }
   0x3 LB: > { %s22_s17 = sadd.s32 1, %s1959_s15  ;;  %p41_p1 = scmp.ne.s32.totalorder %s1951_s13, %s1947_s12  ;;  %s1963_s16 = sphi %s1994_s16, %s13_s16   ;;  %s1959_s15 = sphi %s1992_s15, %s2269_s15   ;;  %s1955_s14 = sphi %s1990_s14, %s2268_s14   ;;  %s1951_s13 = sphi %s1988_s13, %s2267_s13   ;;  %s1947_s12 = sphi %s1986_s12, %s2266_s12  }
   0x4   : > { %p23_p0 = scmp.ge.s32.totalorder %s22_s17, 2  ;;  %p42_p2 = scmp.eq.s32.totalorder %s1963_s16, 0 }
   0x5   : > { %s34_s19 = sadd.s32 1, %s1951_s13  ;;  %p1507_p5 = scmp.ge.s32.totalorder %s1963_s16, 2 }
   0x6   : > { %s2271_s17 = smov (%p23_p0, %s22_s17), 0  ;;  %p43_p3 = por %p42_p2, %p41_p1 }
   0x7   : > { %s30_s18 = ssub.s32 %s1959_s15, %s2271_s17  ;;  %143 = sbr.rel (%p1507_p5) target bundleno = 26 (0x1a), region = 20 }
   0x8   : > { %p32_p4 = scmp.eq.s32.totalorder %s30_s18, 0 }
   0xa   : > { %s2021_s20 = scalar_select %p32_p4, %s1951_s13, %s34_s19  }
   0xe   : > { %146 = sbr.rel (!%p43_p3) target bundleno = 26 (0x1a), region = 24  ;;  %s148_s21 = sand.u32 (%p43_p3), 1, %s1951_s13  }
   0xf   : > { %s1666_s22 = sshll.u32 (%p43_p3), %s1959_s15, 5  ;;  %s1508_s23 = sshll.u32 (%p43_p3), %s148_s21, 7 }
  0x10   : > { %s2029_s26 = scalar_lea.vmem (%p43_p3), %s2262_s0, %s1666_s22  ;;  %s150_s27 = scalar_lea.vmem (%p43_p3), [#allocation3], %s1508_s23 }
  0x11   : > { %v169_v0 = vld [vmem:[%s2029_s26] sm:$0xff] (%p43_p3)  ;;  %v171_v1 = vld [vmem:[%s2029_s26 + $0x8] sm:$0xff] (%p43_p3)  ;;  %v173_v2 = vld [vmem:[%s2029_s26 + $0x10] sm:$0xff] (%p43_p3) }
  0x12   : > { %170 = vst [vmem:[%s150_s27] sm:$0xff] (%p43_p3), %v169_v0  ;;  %172 = vst [vmem:[%s150_s27 + $0x8] sm:$0xff] (%p43_p3), %v171_v1  ;;  %v175_v3 = vld [vmem:[%s2029_s26 + $0x18] sm:$0xff] (%p43_p3)  ;;  %v177_v4 = vld [vmem:[%s2029_s26 + $0x40] sm:$0xff] (%p43_p3) }
  0x13   : > { %174 = vst [vmem:[%s150_s27 + $0x10] sm:$0xff] (%p43_p3), %v173_v2  ;;  %v179_v5 = vld [vmem:[%s2029_s26 + $0x48] sm:$0xff] (%p43_p3)  ;;  %176 = vst [vmem:[%s150_s27 + $0x18] sm:$0xff] (%p43_p3), %v175_v3  ;;  %v181_v6 = vld [vmem:[%s2029_s26 + $0x50] sm:$0xff] (%p43_p3) }
  0x14   : > { %178 = vst [vmem:[%s150_s27 + $0x20] sm:$0xff] (%p43_p3), %v177_v4  ;;  %180 = vst [vmem:[%s150_s27 + $0x28] sm:$0xff] (%p43_p3), %v179_v5  ;;  %v183_v7 = vld [vmem:[%s2029_s26 + $0x58] sm:$0xff] (%p43_p3)  ;;  %v185_v8 = vld [vmem:[%s2029_s26 + $0x80] sm:$0xff] (%p43_p3) }
  0x15   : > { %182 = vst [vmem:[%s150_s27 + $0x30] sm:$0xff] %v181_v6  ;;  %184 = vst [vmem:[%s150_s27 + $0x38] sm:$0xff] %v183_v7  ;;  %v187_v9 = vld [vmem:[%s2029_s26 + $0x88] sm:$0xff]  ;;  %v189_v10 = vld [vmem:[%s2029_s26 + $0x90] sm:$0xff] }
  0x16   : > { %186 = vst [vmem:[%s150_s27 + $0x40] sm:$0xff] %v185_v8  ;;  %v191_v11 = vld [vmem:[%s2029_s26 + $0x98] sm:$0xff]  ;;  %188 = vst [vmem:[%s150_s27 + $0x48] sm:$0xff] %v187_v9  ;;  %v193_v12 = vld [vmem:[%s2029_s26 + $0xc0] sm:$0xff] }
  0x17   : > { %190 = vst [vmem:[%s150_s27 + $0x50] sm:$0xff] %v189_v10  ;;  %192 = vst [vmem:[%s150_s27 + $0x58] sm:$0xff] %v191_v11  ;;  %v195_v13 = vld [vmem:[%s2029_s26 + $0xc8] sm:$0xff]  ;;  %v197_v14 = vld [vmem:[%s2029_s26 + $0xd0] sm:$0xff] }
  0x18   : > { %194 = vst [vmem:[%s150_s27 + $0x60] sm:$0xff] %v193_v12  ;;  %196 = vst [vmem:[%s150_s27 + $0x68] sm:$0xff] %v195_v13  ;;  %v199_v15 = vld [vmem:[%s2029_s26 + $0xd8] sm:$0xff] }
  0x19   : > { %198 = vst [vmem:[%s150_s27 + $0x70] sm:$0xff] %v197_v14  ;;  %200 = vst [vmem:[%s150_s27 + $0x78] sm:$0xff] %v199_v15 }
  0x1a PF: > { %p1511_p6 = scmp.ge.s32.totalorder %s1963_s16, 1  ;;  %p215_p7 = scmp.lt.s32.totalorder %s1963_s16, 3 }
  0x1c   : > { %p216_p8 = pnand %p1511_p6, %p215_p7 }
  0x1d   : > { %s222_s28 = sand.u32 (!%p216_p8), 1, %s1947_s12   ;;  %s1513_s29 = sshll.u32 (!%p216_p8), %s1955_s14, 7 }
  0x1e   : > { %219 = sbr.rel (%p216_p8) target bundleno = 412 (0x19c), region = 51  ;;  %s1512_s30 = sshll.u32 (!%p216_p8), %s222_s28, 7 }
  0x1f   : > { %p255_p9 = scmp.lt.s32.totalorder (!%p216_p8), %s1513_s29, 255  ;;  %s2056_s8 = scalar_lea.vmem (!%p216_p8), [#allocation3], %s1512_s30 }
  0x20   : > { %p1516_p10 = scmp.ne.s32.totalorder (!%p216_p8), %s1955_s14, 0 }
  0x25   : > { %s2273_s29 = smov (!%p255_p9, %s1513_s29), 255  ;;  %271 = sbr.rel (%p1516_p10) target bundleno = 44 (0x2c), region = 59 }
  0x26   : > { %s1667_s4 = sshll.u32 %s2273_s29, 3  ;;  %v1965_v16 = vmov (!%p1516_p10), 0.0  }
  0x27   : > { %s2054_s7 = scalar_lea.vmem %s2263_s1, %s1667_s4  ;;  %272 = vst [vmem:[#allocation2] sm:$0xff] (!%p1516_p10), %v1965_v16  ;;  %273 = vst [vmem:[#allocation2 + $0x8] sm:$0xff] (!%p1516_p10), %v1965_v16 }
  0x28   : > { %274 = vst [vmem:[#allocation2 + $0x10] sm:$0xff] (!%p1516_p10), %v1965_v16  ;;  %275 = vst [vmem:[#allocation2 + $0x18] sm:$0xff] (!%p1516_p10), %v1965_v16 }
  0x29   : > { %276 = vst [vmem:[#allocation2 + $0x20] sm:$0xff] (!%p1516_p10), %v1965_v16  ;;  %277 = vst [vmem:[#allocation2 + $0x28] sm:$0xff] (!%p1516_p10), %v1965_v16 }
  0x2a   : > { %278 = vst [vmem:[#allocation2 + $0x30] sm:$0xff] (!%p1516_p10), %v1965_v16  ;;  %279 = vst [vmem:[#allocation2 + $0x38] sm:$0xff] (!%p1516_p10), %v1965_v16 }
  0x2c PF: > { %v1733_v17 = vld [vmem:[%s2054_s7 + $0x4] ss:$8 sps:$4 sm:$0xff]   ;;  %v1737_v19 = vld [vmem:[%s2054_s7] ss:$8 sps:$4 sm:$0xff]   ;;  %v1739_v21 = vld [vmem:[%s2054_s7 + $0x14] ss:$8 sps:$4 sm:$0xff]  }
  0x2d   : > { %v1735_v18 = vld [vmem:[%s2054_s7 + $0x204] ss:$8 sps:$4 sm:$0xff]   ;;  %1152 = vmatprep.subr.bf16.mxu1 %v1733_v17  ;;  %v1738_v20 = vld [vmem:[%s2054_s7 + $0x200] ss:$8 sps:$4 sm:$0xff]   ;;  %v1741_v22 = vld [vmem:[%s2054_s7 + $0x214] ss:$8 sps:$4 sm:$0xff]  }
  0x2e   : > { %1258 = vmatprep.subr.bf16.mxu0 %v1735_v18  ;;  %1153 = vmatpush1.bf16.msra.mxu1 %v1737_v19  ;;  %v1743_v23 = vld [vmem:[%s2054_s7 + $0x10] ss:$8 sps:$4 sm:$0xff]   ;;  %v1745_v25 = vld [vmem:[%s2054_s7 + $0x24] ss:$8 sps:$4 sm:$0xff]   ;;  %v1749_v27 = vld [vmem:[%s2054_s7 + $0x20] ss:$8 sps:$4 sm:$0xff]  }
  0x2f   : > { %1259 = vmatpush1.bf16.msra.mxu0 %v1738_v20  ;;  %1154 = vmatprep.subr.bf16.mxu1 %v1739_v21  ;;  %v1744_v24 = vld [vmem:[%s2054_s7 + $0x210] ss:$8 sps:$4 sm:$0xff]   ;;  %v1747_v26 = vld [vmem:[%s2054_s7 + $0x224] ss:$8 sps:$4 sm:$0xff]   ;;  %v1750_v28 = vld [vmem:[%s2054_s7 + $0x220] ss:$8 sps:$4 sm:$0xff]  }
  0x30   : > { %1260 = vmatprep.subr.bf16.mxu0 %v1741_v22  ;;  %v1751_v29 = vld [vmem:[%s2054_s7 + $0x34] ss:$8 sps:$4 sm:$0xff]   ;;  %v1755_v31 = vld [vmem:[%s2054_s7 + $0x30] ss:$8 sps:$4 sm:$0xff]   ;;  %v1757_v33 = vld [vmem:[%s2054_s7 + $0x44] ss:$8 sps:$4 sm:$0xff]  }
  0x31   : > { %v1753_v30 = vld [vmem:[%s2054_s7 + $0x234] ss:$8 sps:$4 sm:$0xff]   ;;  %v1756_v32 = vld [vmem:[%s2054_s7 + $0x230] ss:$8 sps:$4 sm:$0xff]   ;;  %v1759_v34 = vld [vmem:[%s2054_s7 + $0x244] ss:$8 sps:$4 sm:$0xff]  }
  0x32   : > { %1155 = vmatpush1.bf16.msra.mxu1 %v1743_v23  ;;  %v1761_v35 = vld [vmem:[%s2054_s7 + $0x40] ss:$8 sps:$4 sm:$0xff]   ;;  %v1763_v37 = vld [vmem:[%s2054_s7 + $0x54] ss:$8 sps:$4 sm:$0xff]   ;;  %v1767_v39 = vld [vmem:[%s2054_s7 + $0x50] ss:$8 sps:$4 sm:$0xff]  }
  0x33   : > { %1261 = vmatpush1.bf16.msra.mxu0 %v1744_v24  ;;  %1156 = vmatprep.subr.bf16.mxu1 %v1745_v25  ;;  %v1762_v36 = vld [vmem:[%s2054_s7 + $0x240] ss:$8 sps:$4 sm:$0xff]   ;;  %v1765_v38 = vld [vmem:[%s2054_s7 + $0x254] ss:$8 sps:$4 sm:$0xff]   ;;  %v1768_v40 = vld [vmem:[%s2054_s7 + $0x250] ss:$8 sps:$4 sm:$0xff]  }
  0x34   : > { %1262 = vmatprep.subr.bf16.mxu0 %v1747_v26  ;;  %v1769_v41 = vld [vmem:[%s2054_s7 + $0x64] ss:$8 sps:$4 sm:$0xff]   ;;  %v1773_v43 = vld [vmem:[%s2054_s7 + $0x60] ss:$8 sps:$4 sm:$0xff]   ;;  %v1775_v45 = vld [vmem:[%s2054_s7 + $0x74] ss:$8 sps:$4 sm:$0xff]  }
  0x35   : > { %v1771_v42 = vld [vmem:[%s2054_s7 + $0x264] ss:$8 sps:$4 sm:$0xff]   ;;  %v1774_v44 = vld [vmem:[%s2054_s7 + $0x260] ss:$8 sps:$4 sm:$0xff]   ;;  %v1777_v46 = vld [vmem:[%s2054_s7 + $0x274] ss:$8 sps:$4 sm:$0xff]  }
  0x36   : > { %1157 = vmatpush1.bf16.msra.mxu1 %v1749_v27  ;;  %v1779_v47 = vld [vmem:[%s2054_s7 + $0x70] ss:$8 sps:$4 sm:$0xff]   ;;  %v1781_v49 = vld [vmem:[%s2054_s7 + $0x84] ss:$8 sps:$4 sm:$0xff]   ;;  %v1785_v51 = vld [vmem:[%s2054_s7 + $0x80] ss:$8 sps:$4 sm:$0xff]  }
  0x37   : > { %1263 = vmatpush1.bf16.msra.mxu0 %v1750_v28  ;;  %1158 = vmatprep.subr.bf16.mxu1 %v1751_v29  ;;  %v1780_v48 = vld [vmem:[%s2054_s7 + $0x270] ss:$8 sps:$4 sm:$0xff]   ;;  %v1783_v50 = vld [vmem:[%s2054_s7 + $0x284] ss:$8 sps:$4 sm:$0xff]   ;;  %v1786_v52 = vld [vmem:[%s2054_s7 + $0x280] ss:$8 sps:$4 sm:$0xff]  }
  0x38   : > { %1264 = vmatprep.subr.bf16.mxu0 %v1753_v30  ;;  %v1787_v53 = vld [vmem:[%s2054_s7 + $0x94] ss:$8 sps:$4 sm:$0xff]   ;;  %v1791_v55 = vld [vmem:[%s2054_s7 + $0x90] ss:$8 sps:$4 sm:$0xff]   ;;  %v1793_v57 = vld [vmem:[%s2054_s7 + $0xa4] ss:$8 sps:$4 sm:$0xff]  }
  0x39   : > { %v1789_v54 = vld [vmem:[%s2054_s7 + $0x294] ss:$8 sps:$4 sm:$0xff]   ;;  %v1792_v56 = vld [vmem:[%s2054_s7 + $0x290] ss:$8 sps:$4 sm:$0xff]   ;;  %v1795_v58 = vld [vmem:[%s2054_s7 + $0x2a4] ss:$8 sps:$4 sm:$0xff]  }
  0x3a   : > { %1159 = vmatpush1.bf16.msra.mxu1 %v1755_v31  ;;  %v1797_v59 = vld [vmem:[%s2054_s7 + $0xa0] ss:$8 sps:$4 sm:$0xff]   ;;  %v1799_v61 = vld [vmem:[%s2054_s7 + $0xb4] ss:$8 sps:$4 sm:$0xff]   ;;  %v1803_v63 = vld [vmem:[%s2054_s7 + $0xb0] ss:$8 sps:$4 sm:$0xff]  }
  0x3b   : > { %1265 = vmatpush1.bf16.msra.mxu0 %v1756_v32  ;;  %1160 = vmatprep.subr.bf16.mxu1 %v1757_v33  ;;  %v1798_v60 = vld [vmem:[%s2054_s7 + $0x2a0] ss:$8 sps:$4 sm:$0xff]   ;;  %v1801_v62 = vld [vmem:[%s2054_s7 + $0x2b4] ss:$8 sps:$4 sm:$0xff]   ;;  %v1804_v0 = vld [vmem:[%s2054_s7 + $0x2b0] ss:$8 sps:$4 sm:$0xff]  }
  0x3c   : > { %1266 = vmatprep.subr.bf16.mxu0 %v1759_v34  ;;  %v288_v1 = vld [vmem:[%s2056_s8] sm:$0xff]  ;;  %v290_v6 = vld [vmem:[%s2056_s8 + $0x10] sm:$0xff]  ;;  %p1661_p11 = scmp.ne.s32.totalorder %s1955_s14, 1 }
  0x3d   : > { %v292_v2 = vld [vmem:[%s2056_s8 + $0x20] sm:$0xff]  ;;  %v294_v7 = vld [vmem:[%s2056_s8 + $0x30] sm:$0xff] }
  0x3e   : > { %1161 = vmatpush1.bf16.msra.mxu1 %v1761_v35  ;;  %v1805_v3 = vld [vmem:[%s2054_s7 + $0xc4] ss:$8 sps:$4 sm:$0xff]   ;;  %v1518_v5 = vcombine.high %v288_v1, %v292_v2  ;;  %v1522_v8 = vcombine.high %v290_v6, %v294_v7  ;;  %v1809_v9 = vld [vmem:[%s2054_s7 + $0xc0] ss:$8 sps:$4 sm:$0xff]   ;;  %v1811_v11 = vld [vmem:[%s2054_s7 + $0xd4] ss:$8 sps:$4 sm:$0xff]   ;;  %v1517_v25 = vcombine.low %v288_v1, %v292_v2  ;;  %v1521_v27 = vcombine.low %v290_v6, %v294_v7 }
  0x3f   : > { %1267 = vmatpush1.bf16.msra.mxu0 %v1762_v36  ;;  %1162 = vmatprep.subr.bf16.mxu1 %v1763_v37  ;;  %v1807_v4 = vld [vmem:[%s2054_s7 + $0x2c4] ss:$8 sps:$4 sm:$0xff]   ;;  %v1810_v10 = vld [vmem:[%s2054_s7 + $0x2c0] ss:$8 sps:$4 sm:$0xff]   ;;  %v1813_v12 = vld [vmem:[%s2054_s7 + $0x2d4] ss:$8 sps:$4 sm:$0xff]  }
  0x40   : > { %1268 = vmatprep.subr.bf16.mxu0 %v1765_v38  ;;  %1184 = vmatprep.mubr.bf16.mxu1 %v1518_v5  ;;  %v1815_v13 = vld [vmem:[%s2054_s7 + $0xd0] ss:$8 sps:$4 sm:$0xff]   ;;  %v1817_v15 = vld [vmem:[%s2054_s7 + $0xe4] ss:$8 sps:$4 sm:$0xff]   ;;  %v1821_v17 = vld [vmem:[%s2054_s7 + $0xe0] ss:$8 sps:$4 sm:$0xff]  }
  0x41   : > { %1290 = vmatprep.mubr.bf16.mxu0 %v1522_v8  ;;  %v1816_v14 = vld [vmem:[%s2054_s7 + $0x2d0] ss:$8 sps:$4 sm:$0xff]   ;;  %v1819_v16 = vld [vmem:[%s2054_s7 + $0x2e4] ss:$8 sps:$4 sm:$0xff]   ;;  %v1822_v18 = vld [vmem:[%s2054_s7 + $0x2e0] ss:$8 sps:$4 sm:$0xff]  }
  0x42   : > { %1163 = vmatpush1.bf16.msra.mxu1 %v1767_v39  ;;  %v1823_v19 = vld [vmem:[%s2054_s7 + $0xf4] ss:$8 sps:$4 sm:$0xff]   ;;  %v1827_v21 = vld [vmem:[%s2054_s7 + $0xf0] ss:$8 sps:$4 sm:$0xff]   ;;  %v1831_v23 = vld [vmem:[%s2054_s7 + $0x104] ss:$8 sps:$4 sm:$0xff]  }
  0x43   : > { %1269 = vmatpush1.bf16.msra.mxu0 %v1768_v40  ;;  %1164 = vmatprep.subr.bf16.mxu1 %v1769_v41  ;;  %v1825_v20 = vld [vmem:[%s2054_s7 + $0x2f4] ss:$8 sps:$4 sm:$0xff]   ;;  %v1828_v22 = vld [vmem:[%s2054_s7 + $0x2f0] ss:$8 sps:$4 sm:$0xff]   ;;  %v1834_v24 = vld [vmem:[%s2054_s7 + $0x304] ss:$8 sps:$4 sm:$0xff]  }
  0x44   : > { %1270 = vmatprep.subr.bf16.mxu0 %v1771_v42  ;;  %v1829_v26 = vld [vmem:[%s2054_s7 + $0x100] ss:$8 sps:$4 sm:$0xff]   ;;  %v1837_v29 = vld [vmem:[%s2054_s7 + $0x114] ss:$8 sps:$4 sm:$0xff]   ;;  %v1835_v31 = vld [vmem:[%s2054_s7 + $0x110] ss:$8 sps:$4 sm:$0xff]  }
  0x45   : > { %v1832_v28 = vld [vmem:[%s2054_s7 + $0x300] ss:$8 sps:$4 sm:$0xff]   ;;  %v1840_v30 = vld [vmem:[%s2054_s7 + $0x314] ss:$8 sps:$4 sm:$0xff]   ;;  %v1838_v32 = vld [vmem:[%s2054_s7 + $0x310] ss:$8 sps:$4 sm:$0xff]  }
  0x46   : > { %1165 = vmatpush1.bf16.msra.mxu1 %v1773_v43  ;;  %v1843_v33 = vld [vmem:[%s2054_s7 + $0x124] ss:$8 sps:$4 sm:$0xff]   ;;  %v1841_v35 = vld [vmem:[%s2054_s7 + $0x120] ss:$8 sps:$4 sm:$0xff]   ;;  %v1849_v37 = vld [vmem:[%s2054_s7 + $0x134] ss:$8 sps:$4 sm:$0xff]  }
  0x47   : > { %1271 = vmatpush1.bf16.msra.mxu0 %v1774_v44  ;;  %1166 = vmatprep.subr.bf16.mxu1 %v1775_v45  ;;  %v1846_v34 = vld [vmem:[%s2054_s7 + $0x324] ss:$8 sps:$4 sm:$0xff]   ;;  %v1844_v36 = vld [vmem:[%s2054_s7 + $0x320] ss:$8 sps:$4 sm:$0xff]   ;;  %v1852_v38 = vld [vmem:[%s2054_s7 + $0x334] ss:$8 sps:$4 sm:$0xff]  }
  0x48   : > { %1272 = vmatprep.subr.bf16.mxu0 %v1777_v46  ;;  %v1847_v39 = vld [vmem:[%s2054_s7 + $0x130] ss:$8 sps:$4 sm:$0xff]   ;;  %v1855_v41 = vld [vmem:[%s2054_s7 + $0x144] ss:$8 sps:$4 sm:$0xff]   ;;  %v1853_v43 = vld [vmem:[%s2054_s7 + $0x140] ss:$8 sps:$4 sm:$0xff]  }
  0x49   : > { %v1850_v40 = vld [vmem:[%s2054_s7 + $0x330] ss:$8 sps:$4 sm:$0xff]   ;;  %v1858_v42 = vld [vmem:[%s2054_s7 + $0x344] ss:$8 sps:$4 sm:$0xff]   ;;  %v1856_v44 = vld [vmem:[%s2054_s7 + $0x340] ss:$8 sps:$4 sm:$0xff]  }
  0x4a   : > { %1167 = vmatpush1.bf16.msra.mxu1 %v1779_v47  ;;  %v1861_v45 = vld [vmem:[%s2054_s7 + $0x154] ss:$8 sps:$4 sm:$0xff]   ;;  %v296_v47 = vld [vmem:[%s2056_s8 + $0x40] sm:$0xff]  ;;  %v1871_v5 = vld [vmem:[%s2054_s7 + $0x170] ss:$8 sps:$4 sm:$0xff]  }
  0x4b   : > { %1273 = vmatpush1.bf16.msra.mxu0 %v1780_v48  ;;  %1168 = vmatprep.subr.bf16.mxu1 %v1781_v49  ;;  %v1864_v46 = vld [vmem:[%s2054_s7 + $0x354] ss:$8 sps:$4 sm:$0xff]   ;;  %v300_v48 = vld [vmem:[%s2056_s8 + $0x60] sm:$0xff]  ;;  %v1874_v6 = vld [vmem:[%s2054_s7 + $0x370] ss:$8 sps:$4 sm:$0xff]  }
  0x4c   : > { %1274 = vmatprep.subr.bf16.mxu0 %v1783_v50  ;;  %v1526_v49 = vcombine.high %v296_v47, %v300_v48  ;;  %v298_v50 = vld [vmem:[%s2056_s8 + $0x50] sm:$0xff]  ;;  %v1879_v7 = vld [vmem:[%s2054_s7 + $0x184] ss:$8 sps:$4 sm:$0xff]  }
  0x4d   : > { %v1876_v1 = vld [vmem:[%s2054_s7 + $0x374] ss:$8 sps:$4 sm:$0xff]   ;;  %v1882_v8 = vld [vmem:[%s2054_s7 + $0x384] ss:$8 sps:$4 sm:$0xff]  }
  0x4e   : > { %1169 = vmatpush1.bf16.msra.mxu1 %v1785_v51  ;;  %v302_v51 = vld [vmem:[%s2056_s8 + $0x70] sm:$0xff] }
  0x4f   : > { %1275 = vmatpush1.bf16.msra.mxu0 %v1786_v52  ;;  %1170 = vmatprep.subr.bf16.mxu1 %v1787_v53  ;;  %v1859_v52 = vld [vmem:[%s2054_s7 + $0x150] ss:$8 sps:$4 sm:$0xff]  }
  0x50   : > { %1276 = vmatprep.subr.bf16.mxu0 %v1789_v54  ;;  %v1862_v53 = vld [vmem:[%s2054_s7 + $0x350] ss:$8 sps:$4 sm:$0xff]   ;;  %v1530_v54 = vcombine.high %v298_v50, %v302_v51 }
  0x52   : > { %1171 = vmatpush1.bf16.msra.mxu1 %v1791_v55  ;;  %v1525_v55 = vcombine.low %v296_v47, %v300_v48 }
  0x53   : > { %1277 = vmatpush1.bf16.msra.mxu0 %v1792_v56  ;;  %1172 = vmatprep.subr.bf16.mxu1 %v1793_v57  ;;  %v1529_v56 = vcombine.low %v298_v50, %v302_v51  ;;  %v1867_v57 = vld [vmem:[%s2054_s7 + $0x164] ss:$8 sps:$4 sm:$0xff]  }
  0x54   : > { %1278 = vmatprep.subr.bf16.mxu0 %v1795_v58  ;;  %v1870_v58 = vld [vmem:[%s2054_s7 + $0x364] ss:$8 sps:$4 sm:$0xff]  }
  0x55   : > { %v280_v50 = vld [vmem:[#allocation2] sm:$0xff] }
  0x56   : > { %1173 = vmatpush1.bf16.msra.mxu1 %v1797_v59  ;;  %v1865_v59 = vld [vmem:[%s2054_s7 + $0x160] ss:$8 sps:$4 sm:$0xff]  }
  0x57   : > { %1279 = vmatpush1.bf16.msra.mxu0 %v1798_v60  ;;  %1174 = vmatprep.subr.bf16.mxu1 %v1799_v61  ;;  %v1868_v60 = vld [vmem:[%s2054_s7 + $0x360] ss:$8 sps:$4 sm:$0xff]  }
  0x58   : > { %1280 = vmatprep.subr.bf16.mxu0 %v1801_v62  ;;  %v2160_v61 = vld [vmem:[%s2056_s8 + $0x8] sm:$0xff] }
  0x59   : > { %v2163_v62 = vld [vmem:[%s2056_s8 + $0x28] sm:$0xff] }
  0x5a   : > { %1175 = vmatpush1.bf16.msra.mxu1 %v1803_v63  ;;  %v2166_v63 = vld [vmem:[%s2056_s8 + $0x18] sm:$0xff]  ;;  %v1520_v2 = vcombine.high %v2160_v61, %v2163_v62 }
  0x5b   : > { %1281 = vmatpush1.bf16.msra.mxu0 %v1804_v0  ;;  %1176 = vmatprep.subr.bf16.mxu1 %v1805_v3  ;;  %v1873_v0 = vld [vmem:[%s2054_s7 + $0x174] ss:$8 sps:$4 sm:$0xff]  }
  0x5c   : > { %1282 = vmatprep.subr.bf16.mxu0 %v1807_v4  ;;  %v2173_v3 = vld [vmem:[%s2056_s8 + $0x38] sm:$0xff] }
  0x5d   : > { %v1524_v4 = vcombine.high %v2166_v63, %v2173_v3 }
  0x5e   : > { %1177 = vmatpush1.bf16.msra.mxu1 %v1809_v9  ;;  %v1877_v9 = vld [vmem:[%s2054_s7 + $0x180] ss:$8 sps:$4 sm:$0xff]  }
  0x5f   : > { %1283 = vmatpush1.bf16.msra.mxu0 %v1810_v10  ;;  %1178 = vmatprep.subr.bf16.mxu1 %v1811_v11  ;;  %v1880_v10 = vld [vmem:[%s2054_s7 + $0x380] ss:$8 sps:$4 sm:$0xff]   ;;  %v1885_v11 = vld [vmem:[%s2054_s7 + $0x194] ss:$8 sps:$4 sm:$0xff]  }
  0x60   : > { %1284 = vmatprep.subr.bf16.mxu0 %v1813_v12  ;;  %v1888_v12 = vld [vmem:[%s2054_s7 + $0x394] ss:$8 sps:$4 sm:$0xff]  }
  0x62   : > { %1179 = vmatpush1.bf16.msra.mxu1 %v1815_v13  ;;  %v1883_v13 = vld [vmem:[%s2054_s7 + $0x190] ss:$8 sps:$4 sm:$0xff]  }
  0x63   : > { %1285 = vmatpush1.bf16.msra.mxu0 %v1816_v14  ;;  %1180 = vmatprep.subr.bf16.mxu1 %v1817_v15  ;;  %v1886_v14 = vld [vmem:[%s2054_s7 + $0x390] ss:$8 sps:$4 sm:$0xff]   ;;  %v1891_v15 = vld [vmem:[%s2054_s7 + $0x1a4] ss:$8 sps:$4 sm:$0xff]  }
  0x64   : > { %1286 = vmatprep.subr.bf16.mxu0 %v1819_v16  ;;  %v1894_v16 = vld [vmem:[%s2054_s7 + $0x3a4] ss:$8 sps:$4 sm:$0xff]  }
  0x66   : > { %1181 = vmatpush1.bf16.msra.mxu1 %v1821_v17  ;;  %v1889_v17 = vld [vmem:[%s2054_s7 + $0x1a0] ss:$8 sps:$4 sm:$0xff]  }
  0x67   : > { %1287 = vmatpush1.bf16.msra.mxu0 %v1822_v18  ;;  %1182 = vmatprep.subr.bf16.mxu1 %v1823_v19  ;;  %v1892_v18 = vld [vmem:[%s2054_s7 + $0x3a0] ss:$8 sps:$4 sm:$0xff]   ;;  %v1897_v19 = vld [vmem:[%s2054_s7 + $0x1b4] ss:$8 sps:$4 sm:$0xff]  }
  0x68   : > { %1288 = vmatprep.subr.bf16.mxu0 %v1825_v20  ;;  %v1900_v20 = vld [vmem:[%s2054_s7 + $0x3b4] ss:$8 sps:$4 sm:$0xff]  }
  0x6a   : > { %1183 = vmatpush1.bf16.msra.mxu1 %v1827_v21  ;;  %v1895_v21 = vld [vmem:[%s2054_s7 + $0x1b0] ss:$8 sps:$4 sm:$0xff]  }
  0x6b   : > { %1289 = vmatpush1.bf16.msra.mxu0 %v1828_v22  ;;  %1205 = vmatprep.subr.bf16.mxu1 %v1831_v23  ;;  %v1898_v22 = vld [vmem:[%s2054_s7 + $0x3b0] ss:$8 sps:$4 sm:$0xff]   ;;  %v1903_v23 = vld [vmem:[%s2054_s7 + $0x1c4] ss:$8 sps:$4 sm:$0xff]  }
  0x6c   : > { %1311 = vmatprep.subr.bf16.mxu0 %v1834_v24  ;;  %v1906_v24 = vld [vmem:[%s2054_s7 + $0x3c4] ss:$8 sps:$4 sm:$0xff]  }
  0x6d   : > { %1185 = vmatmul.mubr.bf16.vlgmr.msra.gmra.mrb[0].mxu1 %v1517_v25  ;;  %v1901_v25 = vld [vmem:[%s2054_s7 + $0x1c0] ss:$8 sps:$4 sm:$0xff]  }
  0x6e   : > { %1291 = vmatmul.mubr.bf16.vlgmr.msra.gmra.mrb[0].mxu0 %v1521_v27  ;;  %1206 = vmatpush1.bf16.msra.mxu1 %v1829_v26  ;;  %v1904_v26 = vld [vmem:[%s2054_s7 + $0x3c0] ss:$8 sps:$4 sm:$0xff]   ;;  %v1909_v27 = vld [vmem:[%s2054_s7 + $0x1d4] ss:$8 sps:$4 sm:$0xff]  }
  0x6f   : > { %1312 = vmatpush1.bf16.msra.mxu0 %v1832_v28  ;;  %1207 = vmatprep.subr.bf16.mxu1 %v1837_v29  ;;  %v1912_v28 = vld [vmem:[%s2054_s7 + $0x3d4] ss:$8 sps:$4 sm:$0xff]   ;;  %v1907_v29 = vld [vmem:[%s2054_s7 + $0x1d0] ss:$8 sps:$4 sm:$0xff]  }
  0x70   : > { %1313 = vmatprep.subr.bf16.mxu0 %v1840_v30  ;;  %1194 = vmatprep.mubr.bf16.mxu1 %v1526_v49  ;;  %v1910_v30 = vld [vmem:[%s2054_s7 + $0x3d0] ss:$8 sps:$4 sm:$0xff]  }
  0x71   : > { %1300 = vmatprep.mubr.bf16.mxu0 %v1530_v54  ;;  %v281_v54 = vld [vmem:[#allocation2 + $0x8] sm:$0xff] }
  0x72   : > { %1208 = vmatpush1.bf16.msra.mxu1 %v1835_v31  ;;  %v1915_v31 = vld [vmem:[%s2054_s7 + $0x1e4] ss:$8 sps:$4 sm:$0xff]  }
  0x73   : > { %1314 = vmatpush1.bf16.msra.mxu0 %v1838_v32  ;;  %1209 = vmatprep.subr.bf16.mxu1 %v1843_v33  ;;  %v1918_v32 = vld [vmem:[%s2054_s7 + $0x3e4] ss:$8 sps:$4 sm:$0xff]   ;;  %v1913_v33 = vld [vmem:[%s2054_s7 + $0x1e0] ss:$8 sps:$4 sm:$0xff]  }
  0x74   : > { %1315 = vmatprep.subr.bf16.mxu0 %v1846_v34  ;;  %v1916_v34 = vld [vmem:[%s2054_s7 + $0x3e0] ss:$8 sps:$4 sm:$0xff]  }
  0x75   : > { %1195 = vmatmul.mubr.bf16.gmra.mrb[4].mxu1 %v1525_v55 }
  0x76   : > { %1210 = vmatpush1.bf16.msra.mxu1 %v1841_v35  ;;  %1301 = vmatmul.mubr.bf16.gmra.mrb[4].mxu0 %v1529_v56  ;;  %v1921_v35 = vld [vmem:[%s2054_s7 + $0x1f4] ss:$8 sps:$4 sm:$0xff]  }
  0x77   : > { %1316 = vmatpush1.bf16.msra.mxu0 %v1844_v36  ;;  %1211 = vmatprep.subr.bf16.mxu1 %v1849_v37  ;;  %v1924_v36 = vld [vmem:[%s2054_s7 + $0x3f4] ss:$8 sps:$4 sm:$0xff]   ;;  %v1919_v37 = vld [vmem:[%s2054_s7 + $0x1f0] ss:$8 sps:$4 sm:$0xff]  }
  0x78   : > { %1317 = vmatprep.subr.bf16.mxu0 %v1852_v38  ;;  %1237 = vmatprep.mubr.bf16.mxu1 %v1520_v2  ;;  %v1922_v38 = vld [vmem:[%s2054_s7 + $0x3f0] ss:$8 sps:$4 sm:$0xff]  }
  0x79   : > { %1343 = vmatprep.mubr.bf16.mxu0 %v1524_v4 }
  0x7a   : > { %1212 = vmatpush1.bf16.msra.mxu1 %v1847_v39  ;;  %v297_v39 = vld [vmem:[%s2056_s8 + $0x48] sm:$0xff] }
  0x7b   : > { %1318 = vmatpush1.bf16.msra.mxu0 %v1850_v40  ;;  %1213 = vmatprep.subr.bf16.mxu1 %v1855_v41  ;;  %v301_v40 = vld [vmem:[%s2056_s8 + $0x68] sm:$0xff]  ;;  %v299_v41 = vld [vmem:[%s2056_s8 + $0x58] sm:$0xff] }
  0x7c   : > { %1319 = vmatprep.subr.bf16.mxu0 %v1858_v42  ;;  %v303_v42 = vld [vmem:[%s2056_s8 + $0x78] sm:$0xff]  ;;  %v1527_v47 = vcombine.low %v297_v39, %v301_v40 }
  0x7d   : > { %v1531_v48 = vcombine.low %v299_v41, %v303_v42 }
  0x7e   : > { %1214 = vmatpush1.bf16.msra.mxu1 %v1853_v43  ;;  %v1519_v43 = vcombine.low %v2160_v61, %v2163_v62 }
  0x7f   : > { %1320 = vmatpush1.bf16.msra.mxu0 %v1856_v44  ;;  %1215 = vmatprep.subr.bf16.mxu1 %v1861_v45  ;;  %v1523_v44 = vcombine.low %v2166_v63, %v2173_v3  ;;  %v1528_v45 = vcombine.high %v297_v39, %v301_v40  ;;  %v283_v63 = vld [vmem:[#allocation2 + $0x18] sm:$0xff] }
  0x80   : > { %1321 = vmatprep.subr.bf16.mxu0 %v1864_v46  ;;  %v1532_v46 = vcombine.high %v299_v41, %v303_v42 }
  0x82   : > { %1216 = vmatpush1.bf16.msra.mxu1 %v1859_v52 }
  0x83   : > { %1322 = vmatpush1.bf16.msra.mxu0 %v1862_v53  ;;  %1217 = vmatprep.subr.bf16.mxu1 %v1867_v57 }
  0x84   : > { %1323 = vmatprep.subr.bf16.mxu0 %v1870_v58  ;;  %v282_v58 = vld [vmem:[#allocation2 + $0x10] sm:$0xff] }
  0x86   : > { %1218 = vmatpush1.bf16.msra.mxu1 %v1865_v59 }
  0x87   : > { %1324 = vmatpush1.bf16.msra.mxu0 %v1868_v60  ;;  %1219 = vmatprep.subr.bf16.mxu1 %v1873_v0 }
  0x88   : > { %1325 = vmatprep.subr.bf16.mxu0 %v1876_v1 }
  0x8a   : > { %1220 = vmatpush1.bf16.msra.mxu1 %v1871_v5 }
  0x8b   : > { %1326 = vmatpush1.bf16.msra.mxu0 %v1874_v6  ;;  %1221 = vmatprep.subr.bf16.mxu1 %v1879_v7  ;;  %v284_v6 = vld [vmem:[#allocation2 + $0x20] sm:$0xff] }
  0x8c   : > { %1327 = vmatprep.subr.bf16.mxu0 %v1882_v8 }
  0x8e   : > { %1222 = vmatpush1.bf16.msra.mxu1 %v1877_v9 }
  0x8f   : > { %1328 = vmatpush1.bf16.msra.mxu0 %v1880_v10  ;;  %1223 = vmatprep.subr.bf16.mxu1 %v1885_v11  ;;  %v285_v10 = vld [vmem:[#allocation2 + $0x28] sm:$0xff] }
  0x90   : > { %1329 = vmatprep.subr.bf16.mxu0 %v1888_v12 }
  0x92   : > { %1224 = vmatpush1.bf16.msra.mxu1 %v1883_v13 }
  0x93   : > { %1330 = vmatpush1.bf16.msra.mxu0 %v1886_v14  ;;  %1225 = vmatprep.subr.bf16.mxu1 %v1891_v15  ;;  %v286_v14 = vld [vmem:[#allocation2 + $0x30] sm:$0xff] }
  0x94   : > { %1331 = vmatprep.subr.bf16.mxu0 %v1894_v16 }
  0x96   : > { %1226 = vmatpush1.bf16.msra.mxu1 %v1889_v17 }
  0x97   : > { %1332 = vmatpush1.bf16.msra.mxu0 %v1892_v18  ;;  %1227 = vmatprep.subr.bf16.mxu1 %v1897_v19  ;;  %v287_v19 = vld [vmem:[#allocation2 + $0x38] sm:$0xff] }
  0x98   : > { %1333 = vmatprep.subr.bf16.mxu0 %v1900_v20 }
  0x9a   : > { %1228 = vmatpush1.bf16.msra.mxu1 %v1895_v21 }
  0x9b   : > { %1334 = vmatpush1.bf16.msra.mxu0 %v1898_v22  ;;  %1229 = vmatprep.subr.bf16.mxu1 %v1903_v23 }
  0x9c   : > { %1335 = vmatprep.subr.bf16.mxu0 %v1906_v24 }
  0x9e   : > { %1230 = vmatpush1.bf16.msra.mxu1 %v1901_v25  ;;  %v1394_v25 = vlaneseq (!%p1661_p11) }
  0x9f   : > { %1336 = vmatpush1.bf16.msra.mxu0 %v1904_v26  ;;  %1231 = vmatprep.subr.bf16.mxu1 %v1909_v27  ;;  %v1392_v27 = vld [vmem:[%s2264_s2] sm:$0x3] (!%p1661_p11) }
  0xa0   : > { %1337 = vmatprep.subr.bf16.mxu0 %v1912_v28  ;;  %v1395_v26 = vshrl.u32 (!%p1661_p11), %v1394_v25, 7 }
  0xa2   : > { %1232 = vmatpush1.bf16.msra.mxu1 %v1907_v29  ;;  %v1396_v29 = vsub.s32 (!%p1661_p11), 0, %v1395_v26 }
  0xa3   : > { %1338 = vmatpush1.bf16.msra.mxu0 %v1910_v30  ;;  %1233 = vmatprep.subr.bf16.mxu1 %v1915_v31  ;;  %v1400_v31 = vsub.s32 (!%p1661_p11), 1, %v1395_v26 }
  0xa4   : > { %1339 = vmatprep.subr.bf16.mxu0 %v1918_v32 }
  0xa6   : > { %1234 = vmatpush1.bf16.msra.mxu1 %v1913_v33 }
  0xa7   : > { %1340 = vmatpush1.bf16.msra.mxu0 %v1916_v34  ;;  %1235 = vmatprep.subr.bf16.mxu1 %v1921_v35  ;;  %v1397_v35 = vrot.slane (!%p1661_p11), %v1392_v27, %v1396_v29 }
  0xa8   : > { %1341 = vmatprep.subr.bf16.mxu0 %v1924_v36  ;;  %v1401_v36 = vrot.slane (!%p1661_p11), %v1392_v27, %v1400_v31 }
  0xaa   : > { %1236 = vmatpush1.bf16.msra.mxu1 %v1919_v37 }
  0xab   : > { %1342 = vmatpush1.bf16.msra.mxu0 %v1922_v38 }
  0xad   : > { %1238 = vmatmul.mubr.bf16.vlgmr.msra.gmra.mrb[0].mxu1 %v1519_v43 }
  0xae   : > { %1344 = vmatmul.mubr.bf16.vlgmr.msra.gmra.mrb[0].mxu0 %v1523_v44  ;;  %1247 = vmatprep.mubr.bf16.mxu1 %v1528_v45 }
  0xaf   : > { %1353 = vmatprep.mubr.bf16.mxu0 %v1532_v46 }
  0xb5   : > { %1248 = vmatmul.mubr.bf16.gmra.mrb[4].mxu1 %v1527_v47 }
  0xb6   : > { %1354 = vmatmul.mubr.bf16.gmra.mrb[4].mxu0 %v1531_v48 }
 0x180   : > { %v1239_v49 = vpop.f32.mrb[0].mxu1 }
 0x181   : > { %v1345_v51 = vpop.f32.mrb[0].mxu0  ;;  %v1241_v53 = vpop.f32.mrb[1].mxu1 }
 0x182   : > { %v1668_v52 = vadd.f32 %v1345_v51, %v1239_v49  ;;  %v1347_v55 = vpop.f32.mrb[1].mxu0  ;;  %v1243_v57 = vpop.f32.mrb[2].mxu1 }
 0x183   : > { %v1669_v56 = vadd.f32 %v1347_v55, %v1241_v53  ;;  %v1349_v59 = vpop.f32.mrb[2].mxu0  ;;  %v1245_v62 = vpop.f32.mrb[3].mxu1 }
 0x184   : > { %v1364_v60 = vadd.f32 %v1668_v52, %v280_v50  ;;  %v1670_v61 = vadd.f32 %v1349_v59, %v1243_v57  ;;  %v1351_v0 = vpop.f32.mrb[3].mxu0 }
 0x185   : > { %v1365_v1 = vadd.f32 %v1669_v56, %v281_v54  ;;  %v1671_v2 = vadd.f32 %v1351_v0, %v1245_v62 }
 0x186   : > { %1372 = vst [vmem:[#allocation2] sm:$0xff] %v1364_v60  ;;  %v1366_v3 = vadd.f32 %v1670_v61, %v282_v58 }
 0x187   : > { %1373 = vst [vmem:[#allocation2 + $0x8] sm:$0xff] %v1365_v1  ;;  %v1367_v4 = vadd.f32 %v1671_v2, %v283_v63 }
 0x188   : > { %1374 = vst [vmem:[#allocation2 + $0x10] sm:$0xff] %v1366_v3  ;;  %v1249_v5 = vpop.f32.mrb[4].mxu1 }
 0x189   : > { %1375 = vst [vmem:[#allocation2 + $0x18] sm:$0xff] %v1367_v4  ;;  %v1355_v7 = vpop.f32.mrb[4].mxu0  ;;  %v1251_v9 = vpop.f32.mrb[5].mxu1 }
 0x18a   : > { %v1672_v8 = vadd.f32 %v1355_v7, %v1249_v5  ;;  %v1357_v11 = vpop.f32.mrb[5].mxu0  ;;  %v1253_v13 = vpop.f32.mrb[6].mxu1 }
 0x18b   : > { %v1673_v12 = vadd.f32 %v1357_v11, %v1251_v9  ;;  %v1359_v15 = vpop.f32.mrb[6].mxu0  ;;  %v1255_v18 = vpop.f32.mrb[7].mxu1  ;;  %1383 = sbr.rel (%p1661_p11) target bundleno = 412 (0x19c), region = 63 }
 0x18c   : > { %v1368_v16 = vadd.f32 %v1672_v8, %v284_v6  ;;  %v1674_v17 = vadd.f32 %v1359_v15, %v1253_v13  ;;  %v1361_v20 = vpop.f32.mrb[7].mxu0 }
 0x18d   : > { %v1369_v21 = vadd.f32 %v1673_v12, %v285_v10  ;;  %v1675_v22 = vadd.f32 %v1361_v20, %v1255_v18  ;;  %v1384_v28 = vld [vmem:[#allocation2] sm:$0xff] (!%p1661_p11) }
 0x18e   : > { %1376 = vst [vmem:[#allocation2 + $0x20] sm:$0xff] %v1368_v16  ;;  %v1370_v23 = vadd.f32 %v1674_v17, %v286_v14  ;;  %v1385_v30 = vld [vmem:[#allocation2 + $0x8] sm:$0xff] (!%p1661_p11)  ;;  %v1404_v40 = vadd.f32 (!%p1661_p11), %v1397_v35, %v1384_v28 }
 0x18f   : > { %1377 = vst [vmem:[#allocation2 + $0x28] sm:$0xff] %v1369_v21  ;;  %v1371_v24 = vadd.f32 %v1675_v22, %v287_v19  ;;  %v1386_v32 = vld [vmem:[#allocation2 + $0x10] sm:$0xff] (!%p1661_p11)  ;;  %v1405_v41 = vadd.f32 (!%p1661_p11), %v1401_v36, %v1385_v30 }
 0x190   : > { %1378 = vst [vmem:[#allocation2 + $0x30] sm:$0xff] %v1370_v23  ;;  %v1387_v33 = vld [vmem:[#allocation2 + $0x18] sm:$0xff] (!%p1661_p11)  ;;  %v1406_v42 = vadd.f32 (!%p1661_p11), %v1397_v35, %v1386_v32  ;;  %1412 = vst [vmem:[%s2265_s3] sm:$0xff] (!%p1661_p11), %v1404_v40 }
 0x191   : > { %1379 = vst [vmem:[#allocation2 + $0x38] sm:$0xff] %v1371_v24  ;;  %v1407_v43 = vadd.f32 (!%p1661_p11), %v1401_v36, %v1387_v33  ;;  %1413 = vst [vmem:[%s2265_s3 + $0x8] sm:$0xff] (!%p1661_p11), %v1405_v41 }
 0x192   : > { %1414 = vst [vmem:[%s2265_s3 + $0x10] sm:$0xff] %v1406_v42 }
 0x193   : > { %1415 = vst [vmem:[%s2265_s3 + $0x18] sm:$0xff] %v1407_v43 }
 0x195   : > { %v1388_v34 = vld [vmem:[#allocation2 + $0x20] sm:$0xff] }
 0x196   : > { %v1389_v37 = vld [vmem:[#allocation2 + $0x28] sm:$0xff]  ;;  %v1408_v44 = vadd.f32 %v1397_v35, %v1388_v34 }
 0x197   : > { %v1390_v38 = vld [vmem:[#allocation2 + $0x30] sm:$0xff]  ;;  %v1409_v45 = vadd.f32 %v1401_v36, %v1389_v37 }
 0x198   : > { %v1391_v39 = vld [vmem:[#allocation2 + $0x38] sm:$0xff]  ;;  %v1410_v46 = vadd.f32 %v1397_v35, %v1390_v38  ;;  %1416 = vst [vmem:[%s2265_s3 + $0x20] sm:$0xff] %v1408_v44 }
 0x199   : > { %v1411_v47 = vadd.f32 %v1401_v36, %v1391_v39  ;;  %1417 = vst [vmem:[%s2265_s3 + $0x28] sm:$0xff] %v1409_v45 }
 0x19a   : > { %1418 = vst [vmem:[%s2265_s3 + $0x30] sm:$0xff] %v1410_v46 }
 0x19b   : > { %1419 = vst [vmem:[%s2265_s3 + $0x38] sm:$0xff] %v1411_v47 }
 0x19c PF: > { %s13_s16 = sadd.s32 1, %s1963_s16   ;;  %s2266_s12 = smov %s1951_s13 }
 0x19d   : > { %p10_p12 = scmp.ge.s32.totalorder %s13_s16, 4   ;;  %s2267_s13 = smov %s2021_s20 }
 0x19e   : > { %s2268_s14 = smov %s1959_s15  ;;  %s2269_s15 = smov %s2271_s17 }
 0x19f   :  { %12 = sbr.rel (!%p10_p12) target bundleno = 3 (0x3), region = 101 }

// kernel: discriminator_forward.14
= control target key start
LH: loop header
LB: loop body
LE: loop exit
PB: predicated region body
PF: predicated region fallthrough
CT: control target
= control target key end

     0   :  { %s488_s6 = smov 0   ;;  %s490_s7 = smov 0   ;;  %s592_s0 = inlined_call_operand.vmem [shape: f32[2,9,512], index: 0, kind: input, shape index: {}]   ;;  %s593_s1 = inlined_call_operand.vmem [shape: f32[2,9,512], index: 1, kind: output, shape index: {}]  }
   0x1   :  { %s492_s8 = smov 0   ;;  %s494_s9 = smov 0  }
   0x2   :  { %s496_s10 = smov 0   ;;  %s498_s11 = smov 0  }
   0x3   :  { %s500_s12 = smov 0  }
   0x4 LB: > { %s20_s13 = sadd.s32 1, %s468_s10  ;;  %s23_s14 = sadd.s32 1, %s472_s11  ;;  %s476_s12 = sphi %s500_s12, %s11_s12   ;;  %s472_s11 = sphi %s498_s11, %s600_s11   ;;  %s468_s10 = sphi %s496_s10, %s599_s10   ;;  %s464_s9 = sphi %s494_s9, %s598_s9   ;;  %s460_s8 = sphi %s492_s8, %s597_s8   ;;  %s456_s7 = sphi %s490_s7, %s596_s7   ;;  %s452_s6 = sphi %s488_s6, %s595_s6  }
   0x5   : > { %p21_p0 = scmp.ge.s32.totalorder %s20_s13, 2  ;;  %s345_s15 = sadd.s32 4294967295, %s476_s12  }
   0x6   : > { %p39_p1 = scmp.ne.s32.totalorder %s456_s7, %s452_s6  ;;  %p40_p2 = scmp.eq.s32.totalorder %s476_s12, 0 }
   0x7   : > { %s602_s13 = smov (%p21_p0, %s20_s13), 0  ;;  %s604_s14 = smov (!%p21_p0, %s23_s14), %s472_s11 }
   0x8   : > { %p25_p3 = scmp.ge.s32.totalorder %s604_s14, 2  ;;  %p71_p4 = scmp.eq.s32.totalorder %s345_s15, 3 }
   0x9   : > { %s28_s16 = ssub.s32 %s468_s10, %s602_s13  ;;  %p41_p5 = por %p40_p2, %p39_p1 }
   0xa   : > { %s606_s14 = smov (%p25_p3, %s604_s14), 0  ;;  %p536_p6 = por %p71_p4, %p39_p1 }
   0xb   : > { %s27_s18 = ssub.s32 %s472_s11, %s606_s14  ;;  %s32_s20 = sadd.s32 1, %s456_s7 }
   0xc   : > { %s29_s19 = sor.u32 %s28_s16, %s27_s18  ;;  %p348_p8 = scmp.ge.s32.totalorder %s476_s12, 4 }
   0xd   : > { %p30_p7 = scmp.eq.s32.totalorder %s29_s19, 0 }
   0xe   : > { %93 = sbr.rel (%p348_p8) target bundleno = 30 (0x1e), region = 16 }
   0xf   : > { %s544_s21 = scalar_select %p30_p7, %s456_s7, %s32_s20  }
  0x15   : > { %96 = sbr.rel (!%p41_p5) target bundleno = 30 (0x1e), region = 20  ;;  %s98_s22 = sand.u32 (%p41_p5), 1, %s456_s7  }
  0x16   : > { %s350_s23 = sshll.u32 (%p41_p5), %s468_s10, 1  ;;  %s349_s24 = sshll.u32 (%p41_p5), %s98_s22, 5 }
  0x17   : > { %s351_s25 = sshll.u32 (%p41_p5), %s472_s11, 3  ;;  %s100_s2 = scalar_lea.vmem (%p41_p5), [#allocation2], %s349_s24 }
  0x18   : > { %s103_s26 = sadd.s32 (%p41_p5), %s351_s25, %s350_s23 }
  0x19   : > { %s352_s27 = sshll.u32 (%p41_p5), %s103_s26, 3 }
  0x1a   : > { %s105_s30 = scalar_lea.vmem (%p41_p5), %s592_s0, %s352_s27 }
  0x1b   : > { %v118_v0 = vld [vmem:[%s105_s30] sm:$0xff] (%p41_p5)  ;;  %v120_v1 = vld [vmem:[%s105_s30 + $0x8] sm:$0xff] (%p41_p5) }
  0x1c   : > { %v122_v2 = vld [vmem:[%s105_s30 + $0x20] sm:$0xff]  ;;  %119 = vst [vmem:[%s100_s2] sm:$0xff] %v118_v0  ;;  %121 = vst [vmem:[%s100_s2 + $0x8] sm:$0xff] %v120_v1  ;;  %v124_v3 = vld [vmem:[%s105_s30 + $0x28] sm:$0xff] }
  0x1d   : > { %123 = vst [vmem:[%s100_s2 + $0x10] sm:$0xff] %v122_v2  ;;  %125 = vst [vmem:[%s100_s2 + $0x18] sm:$0xff] %v124_v3 }
  0x1e PF: > { %p353_p9 = scmp.ge.s32.totalorder %s476_s12, 1  ;;  %p130_p10 = scmp.lt.s32.totalorder %s476_s12, 5 }
  0x20   : > { %p131_p11 = pnand %p353_p9, %p130_p10 }
  0x21   : > { %s137_s3 = sand.u32 (!%p131_p11), 1, %s452_s6   ;;  %vm161_vm0 = vcmask (!%p131_p11), 1040384  }
  0x22   : > { %134 = sbr.rel (%p131_p11) target bundleno = 88 (0x58), region = 43  ;;  %s556_s4 = sshll.u32 (!%p131_p11), %s137_s3, 5 }
  0x23   : > { %s139_s5 = scalar_lea.vmem (!%p131_p11), [#allocation2], %s556_s4  ;;  %s154_s6 = scalar_lea.vmem (!%p131_p11), [#allocation3], %s556_s4 }
  0x24   : > { %v157_v4 = vld [vmem:[%s139_s5] sm:$0xff] (!%p131_p11)  ;;  %v159_v5 = vld [vmem:[%s139_s5 + $0x10] sm:$0x1] (!%p131_p11)  ;;  %v160_v6 = vld [vmem:[%s139_s5 + $0x18] sm:$0x1] (!%p131_p11) }
  0x25   : > { %v162_v7 = vsel (!%p131_p11), %vm161_vm0, %v159_v5, 0.0  ;;  %v170_v8 = vsel (!%p131_p11), %vm161_vm0, %v160_v6, 0.0  ;;  %v178_v9 = vmul.f32 (!%p131_p11), %v157_v4, %v157_v4  ;;  %v180_v10 = vmul.f32 (!%p131_p11), %v159_v5, %v159_v5  ;;  %v158_v11 = vld [vmem:[%s139_s5 + $0x8] sm:$0xff] (!%p131_p11) }
  0x26   : > { %v163_v12 = vadd.f32 (!%p131_p11), %v162_v7, %v157_v4  ;;  %v181_v13 = vmul.f32 (!%p131_p11), %v160_v6, %v160_v6  ;;  %v171_v14 = vadd.f32 (!%p131_p11), %v170_v8, %v158_v11  ;;  %v179_v15 = vmul.f32 (!%p131_p11), %v158_v11, %v158_v11 }
  0x27   : > { %v182_v16 = vsel (!%p131_p11), %vm161_vm0, %v180_v10, 0.0 }
  0x28   : > { %v164_v17 = vrot.slane (!%p131_p11), %v163_v12, 4  ;;  %v183_v18 = vadd.f32 (!%p131_p11), %v182_v16, %v178_v9  ;;  %v190_v19 = vsel (!%p131_p11), %vm161_vm0, %v181_v13, 0.0  ;;  %v172_v20 = vrot.slane (!%p131_p11), %v171_v14, 4 }
  0x29   : > { %v191_v21 = vadd.f32 %v190_v19, %v179_v15  ;;  %s357_s15 = sshll.u32 (%p536_p6), %s460_s8, 1  ;;  %s358_s16 = sshll.u32 (%p536_p6), %s464_s9, 3 }
  0x2a   : > { %v165_v22 = vadd.f32 %v164_v17, %v163_v12  ;;  %v184_v23 = vrot.slane %v183_v18, 4  ;;  %v173_v24 = vadd.f32 %v172_v20, %v171_v14  ;;  %s245_s18 = sadd.s32 (%p536_p6), %s358_s16, %s357_s15 }
  0x2b   : > { %v192_v25 = vrot.slane %v191_v21, 4  ;;  %s359_s19 = sshll.u32 (%p536_p6), %s245_s18, 3 }
  0x2c   : > { %v166_v26 = vrot.slane %v165_v22, 2  ;;  %v185_v27 = vadd.f32 %v184_v23, %v183_v18  ;;  %v174_v28 = vrot.slane %v173_v24, 2  ;;  %s247_s23 = scalar_lea.vmem (%p536_p6), %s593_s1, %s359_s19 }
  0x2d   : > { %v193_v29 = vadd.f32 %v192_v25, %v191_v21 }
  0x2e   : > { %v167_v30 = vadd.f32 %v166_v26, %v165_v22  ;;  %v186_v31 = vrot.slane %v185_v27, 2  ;;  %v175_v32 = vadd.f32 %v174_v28, %v173_v24 }
  0x2f   : > { %v194_v33 = vrot.slane %v193_v29, 2 }
  0x30   : > { %v168_v34 = vrot.slane %v167_v30, 1  ;;  %v187_v35 = vadd.f32 %v186_v31, %v185_v27  ;;  %v176_v36 = vrot.slane %v175_v32, 1 }
  0x31   : > { %v195_v37 = vadd.f32 %v194_v33, %v193_v29 }
  0x32   : > { %v169_v38 = vadd.f32 %v168_v34, %v167_v30  ;;  %v188_v39 = vrot.slane %v187_v35, 1  ;;  %v177_v40 = vadd.f32 %v176_v36, %v175_v32 }
  0x33   : > { %v196_v41 = vrot.slane %v195_v37, 1 }
  0x34   : > { %v189_v42 = vadd.f32 %v188_v39, %v187_v35  ;;  %v198_v43 = vmul.f32 0.11111111, %v169_v38  ;;  %v199_v44 = vmul.f32 0.11111111, %v177_v40 }
  0x35   : > { %v197_v45 = vadd.f32 %v196_v41, %v195_v37 }
  0x36   : > { %v200_v46 = vmul.f32 0.11111111, %v189_v42  ;;  %v202_v47 = vmul.f32 %v198_v43, %v198_v43  ;;  %v203_v48 = vmul.f32 %v199_v44, %v199_v44  ;;  %v208_v56 = vsub.f32 %v157_v4, %v198_v43 }
  0x37   : > { %v201_v49 = vmul.f32 0.11111111, %v197_v45  ;;  %v210_v57 = vsub.f32 %v159_v5, %v198_v43  ;;  %v209_v58 = vsub.f32 %v158_v11, %v199_v44  ;;  %v211_v59 = vsub.f32 %v160_v6, %v199_v44 }
  0x38   : > { %v204_v50 = vsub.f32 %v200_v46, %v202_v47 }
  0x39   : > { %v205_v51 = vsub.f32 %v201_v49, %v203_v48 }
  0x3a   : > { %v206_v52 = vmax.f32 %v204_v50, 0.0 }
  0x3b   : > { %v207_v53 = vmax.f32 %v205_v51, 0.0 }
  0x3c   : > { %v212_v54 = vadd.f32 1e-05, %v206_v52 }
  0x3d   : > { %v213_v55 = vadd.f32 1e-05, %v207_v53 }
  0x3e   : > { %418 = vrsqrt.f32 %v212_v54 }
  0x3f   : > { %420 = vrsqrt.f32 %v213_v55 }
  0x48   : > { %v419_v60 = vpop.eup %418 }
  0x49   : > { %v421_v61 = vpop.eup %420  ;;  %v216_v62 = vmul.f32 %v419_v60, %v208_v56  ;;  %v218_v63 = vmul.f32 %v419_v60, %v210_v57  ;;  %242 = sbr.rel (!%p536_p6) target bundleno = 88 (0x58), region = 51 }
  0x4a   : > { %v217_v0 = vmul.f32 %v421_v61, %v209_v58  ;;  %v219_v1 = vmul.f32 %v421_v61, %v211_v59 }
  0x4b   : > { %vm220_vm1 = vcmp.ge.f32.partialorder %v216_v62, 0.0  ;;  %v224_v2 = vmul.f32 0.2, %v216_v62  ;;  %vm222_vm2 = vcmp.ge.f32.partialorder %v218_v63, 0.0  ;;  %v226_v3 = vmul.f32 0.2, %v218_v63 }
  0x4c   : > { %vm221_vm3 = vcmp.ge.f32.partialorder %v217_v0, 0.0  ;;  %v225_v7 = vmul.f32 0.2, %v217_v0  ;;  %vm223_vm4 = vcmp.ge.f32.partialorder %v219_v1, 0.0  ;;  %v227_v8 = vmul.f32 0.2, %v219_v1 }
  0x4d   : > { %v228_v9 = vsel %vm220_vm1, %v216_v62, %v224_v2  ;;  %v230_v4 = vsel %vm222_vm2, %v218_v63, %v226_v3 }
  0x4e   : > { %232 = vst [vmem:[%s154_s6] sm:$0xff] %v228_v9  ;;  %v229_v5 = vsel %vm221_vm3, %v217_v0, %v225_v7  ;;  %234 = vst [vmem:[%s154_s6 + $0x10] sm:$0x1] %v230_v4  ;;  %v231_v6 = vsel %vm223_vm4, %v219_v1, %v227_v8 }
  0x4f   : > { %233 = vst [vmem:[%s154_s6 + $0x8] sm:$0xff] %v229_v5  ;;  %235 = vst [vmem:[%s154_s6 + $0x18] sm:$0x1] %v231_v6 }
  0x55   : > { %v260_v10 = vld [vmem:[%s154_s6] sm:$0xff]  ;;  %v264_v12 = vld [vmem:[%s154_s6 + $0x10] sm:$0xff] }
  0x56   : > { %v262_v11 = vld [vmem:[%s154_s6 + $0x8] sm:$0xff]  ;;  %v266_v13 = vld [vmem:[%s154_s6 + $0x18] sm:$0xff]  ;;  %261 = vst [vmem:[%s247_s23] sm:$0xff] %v260_v10  ;;  %265 = vst [vmem:[%s247_s23 + $0x20] sm:$0xff] %v264_v12 }
  0x57   : > { %263 = vst [vmem:[%s247_s23 + $0x8] sm:$0xff] %v262_v11  ;;  %267 = vst [vmem:[%s247_s23 + $0x28] sm:$0xff] %v266_v13 }
  0x58 PF: > { %s11_s12 = sadd.s32 1, %s476_s12   ;;  %s595_s6 = smov %s456_s7 }
  0x59   : > { %p8_p12 = scmp.ge.s32.totalorder %s11_s12, 6   ;;  %s596_s7 = smov %s544_s21 }
  0x5a   : > { %s597_s8 = smov %s468_s10  ;;  %s598_s9 = smov %s472_s11 }
  0x5b   : > { %s599_s10 = smov %s602_s13  ;;  %s600_s11 = smov %s606_s14 }
  0x5c   :  { %10 = sbr.rel (!%p8_p12) target bundleno = 4 (0x4), region = 105 }

// kernel: discriminator_forward.13
= control target key start
LH: loop header
LB: loop body
LE: loop exit
PB: predicated region body
PF: predicated region fallthrough
CT: control target
= control target key end

     0   :  { %s3292_s12 = smov 0   ;;  %s3294_s13 = smov 0   ;;  %s3694_s0 = inlined_call_operand.vmem [shape: bf16[24,4096], index: 0, kind: input, shape index: {}]   ;;  %s3695_s1 = inlined_call_operand.vmem [shape: bf16[4096,512], index: 1, kind: input, shape index: {}]   ;;  %s3696_s2 = inlined_call_operand.vmem [shape: f32[1,512], index: 2, kind: input, shape index: {}]   ;;  %s3697_s3 = inlined_call_operand.vmem [shape: f32[24,512], index: 3, kind: output, shape index: {}]  }
   0x1   :  { %s3296_s14 = smov 0   ;;  %s3298_s15 = smov 0  }
   0x2   :  { %s3300_s16 = smov 0  }
   0x3 LB: > { %s22_s17 = sadd.s32 1, %s3265_s15  ;;  %p41_p1 = scmp.ne.s32.totalorder %s3257_s13, %s3253_s12  ;;  %s3269_s16 = sphi %s3300_s16, %s13_s16   ;;  %s3265_s15 = sphi %s3298_s15, %s3701_s15   ;;  %s3261_s14 = sphi %s3296_s14, %s3700_s14   ;;  %s3257_s13 = sphi %s3294_s13, %s3699_s13   ;;  %s3253_s12 = sphi %s3292_s12, %s3698_s12  }
   0x4   : > { %p23_p0 = scmp.ge.s32.totalorder %s22_s17, 4  ;;  %p42_p2 = scmp.eq.s32.totalorder %s3269_s16, 0 }
   0x5   : > { %s34_s19 = sadd.s32 1, %s3257_s13  ;;  %p2485_p5 = scmp.ge.s32.totalorder %s3269_s16, 4 }
   0x6   : > { %s3703_s17 = smov (%p23_p0, %s22_s17), 0  ;;  %p43_p3 = por %p42_p2, %p41_p1 }
   0x7   : > { %s30_s18 = ssub.s32 %s3265_s15, %s3703_s17  ;;  %143 = sbr.rel (%p2485_p5) target bundleno = 25 (0x19), region = 20 }
   0x8   : > { %p32_p4 = scmp.eq.s32.totalorder %s30_s18, 0 }
   0xa   : > { %s3327_s20 = scalar_select %p32_p4, %s3257_s13, %s34_s19  }
   0xe   : > { %146 = sbr.rel (!%p43_p3) target bundleno = 25 (0x19), region = 24  ;;  %s148_s21 = sand.u32 (%p43_p3), 1, %s3257_s13  }
   0xf   : > { %s2770_s22 = sshll.u32 (%p43_p3), %s3265_s15, 5  ;;  %s2796_s23 = smul.u32 (%p43_p3), 96, %s148_s21 }
  0x10   : > { %s156_s26 = scalar_lea.vmem (%p43_p3), %s3694_s0, %s2770_s22 }
  0x11   : > { %v169_v0 = vld [vmem:[%s156_s26] sm:$0xff] (%p43_p3)  ;;  %v171_v1 = vld [vmem:[%s156_s26 + $0x8] sm:$0xff] (%p43_p3)  ;;  %v173_v2 = vld [vmem:[%s156_s26 + $0x10] sm:$0xff] (%p43_p3)  ;;  %s150_s27 = scalar_lea.vmem (%p43_p3), [#allocation3], %s2796_s23 }
  0x12   : > { %v175_v3 = vld [vmem:[%s156_s26 + $0x18] sm:$0xff] (%p43_p3)  ;;  %v177_v4 = vld [vmem:[%s156_s26 + $0x80] sm:$0xff] (%p43_p3)  ;;  %v179_v5 = vld [vmem:[%s156_s26 + $0x88] sm:$0xff] (%p43_p3)  ;;  %170 = vst [vmem:[%s150_s27] sm:$0xff] (%p43_p3), %v169_v0 }
  0x13   : > { %172 = vst [vmem:[%s150_s27 + $0x8] sm:$0xff] (%p43_p3), %v171_v1  ;;  %174 = vst [vmem:[%s150_s27 + $0x10] sm:$0xff] (%p43_p3), %v173_v2  ;;  %v181_v6 = vld [vmem:[%s156_s26 + $0x90] sm:$0xff] (%p43_p3)  ;;  %v183_v7 = vld [vmem:[%s156_s26 + $0x98] sm:$0xff] (%p43_p3) }
  0x14   : > { %176 = vst [vmem:[%s150_s27 + $0x18] sm:$0xff] (%p43_p3), %v175_v3  ;;  %178 = vst [vmem:[%s150_s27 + $0x20] sm:$0xff] (%p43_p3), %v177_v4  ;;  %v185_v8 = vld [vmem:[%s156_s26 + $0x100] sm:$0xff] (%p43_p3)  ;;  %v187_v9 = vld [vmem:[%s156_s26 + $0x108] sm:$0xff] (%p43_p3) }
  0x15   : > { %180 = vst [vmem:[%s150_s27 + $0x28] sm:$0xff] %v179_v5  ;;  %182 = vst [vmem:[%s150_s27 + $0x30] sm:$0xff] %v181_v6  ;;  %v189_v10 = vld [vmem:[%s156_s26 + $0x110] sm:$0xff]  ;;  %v191_v11 = vld [vmem:[%s156_s26 + $0x118] sm:$0xff] }
  0x16   : > { %184 = vst [vmem:[%s150_s27 + $0x38] sm:$0xff] %v183_v7  ;;  %186 = vst [vmem:[%s150_s27 + $0x40] sm:$0xff] %v185_v8 }
  0x17   : > { %188 = vst [vmem:[%s150_s27 + $0x48] sm:$0xff] %v187_v9  ;;  %190 = vst [vmem:[%s150_s27 + $0x50] sm:$0xff] %v189_v10 }
  0x18   : > { %192 = vst [vmem:[%s150_s27 + $0x58] sm:$0xff] %v191_v11 }
  0x19 PF: > { %p2488_p6 = scmp.ge.s32.totalorder %s3269_s16, 1  ;;  %p207_p7 = scmp.lt.s32.totalorder %s3269_s16, 5 }
  0x1b   : > { %p208_p8 = pnand %p2488_p6, %p207_p7 }
  0x1c   : > { %s214_s28 = sand.u32 (!%p208_p8), 1, %s3253_s12   ;;  %s2489_s29 = sshll.u32 (!%p208_p8), %s3261_s14, 7 }
  0x1d   : > { %211 = sbr.rel (%p208_p8) target bundleno = 537 (0x219), region = 51  ;;  %p247_p9 = scmp.lt.s32.totalorder (!%p208_p8), %s2489_s29, 511 }
  0x1e   : > { %s2797_s30 = smul.u32 (!%p208_p8), 96, %s214_s28  ;;  %p2492_p10 = scmp.ne.s32.totalorder (!%p208_p8), %s3261_s14, 0 }
  0x20   : > { %s3344_s8 = scalar_lea.vmem (!%p208_p8), [#allocation3], %s2797_s30 }
  0x24   : > { %s3705_s29 = smov (!%p247_p9, %s2489_s29), 511  ;;  %263 = sbr.rel (%p2492_p10) target bundleno = 44 (0x2c), region = 59 }
  0x25   : > { %s2771_s4 = sshll.u32 %s3705_s29, 4  ;;  %v3271_v12 = vmov (!%p2492_p10), 0.0  }
  0x26   : > { %s3342_s7 = scalar_lea.vmem %s3695_s1, %s2771_s4  ;;  %264 = vst [vmem:[#allocation2] sm:$0xff] (!%p2492_p10), %v3271_v12  ;;  %265 = vst [vmem:[#allocation2 + $0x8] sm:$0xff] (!%p2492_p10), %v3271_v12 }
  0x27   : > { %266 = vst [vmem:[#allocation2 + $0x10] sm:$0xff] (!%p2492_p10), %v3271_v12  ;;  %267 = vst [vmem:[#allocation2 + $0x18] sm:$0xff] (!%p2492_p10), %v3271_v12 }
  0x28   : > { %268 = vst [vmem:[#allocation2 + $0x20] sm:$0xff] (!%p2492_p10), %v3271_v12  ;;  %269 = vst [vmem:[#allocation2 + $0x28] sm:$0xff] (!%p2492_p10), %v3271_v12 }
  0x29   : > { %270 = vst [vmem:[#allocation2 + $0x30] sm:$0xff] (!%p2492_p10), %v3271_v12  ;;  %271 = vst [vmem:[#allocation2 + $0x38] sm:$0xff] (!%p2492_p10), %v3271_v12 }
  0x2a   : > { %272 = vst [vmem:[#allocation2 + $0x40] sm:$0xff] (!%p2492_p10), %v3271_v12  ;;  %273 = vst [vmem:[#allocation2 + $0x48] sm:$0xff] (!%p2492_p10), %v3271_v12 }
  0x2b   : > { %274 = vst [vmem:[#allocation2 + $0x50] sm:$0xff] %v3271_v12  ;;  %275 = vst [vmem:[#allocation2 + $0x58] sm:$0xff] %v3271_v12 }
  0x2c PF: > { %v2839_v13 = vld [vmem:[%s3342_s7 + $0x4] ss:$16 sps:$4 sm:$0xff]   ;;  %v2841_v14 = vld [vmem:[%s3342_s7 + $0xc] ss:$16 sps:$4 sm:$0xff]   ;;  %v2843_v15 = vld [vmem:[%s3342_s7] ss:$16 sps:$4 sm:$0xff]  }
  0x2d   : > { %1904 = vmatprep.subr.bf16.mxu0 %v2839_v13  ;;  %v2844_v16 = vld [vmem:[%s3342_s7 + $0x8] ss:$16 sps:$4 sm:$0xff]   ;;  %2108 = vmatprep.subr.bf16.mxu1 %v2841_v14  ;;  %v2845_v17 = vld [vmem:[%s3342_s7 + $0x24] ss:$16 sps:$4 sm:$0xff]   ;;  %v2847_v18 = vld [vmem:[%s3342_s7 + $0x2c] ss:$16 sps:$4 sm:$0xff]  }
  0x2e   : > { %1905 = vmatpush1.bf16.msra.mxu0 %v2843_v15  ;;  %2109 = vmatpush1.bf16.msra.mxu1 %v2844_v16  ;;  %v2849_v19 = vld [vmem:[%s3342_s7 + $0x20] ss:$16 sps:$4 sm:$0xff]   ;;  %v2850_v20 = vld [vmem:[%s3342_s7 + $0x28] ss:$16 sps:$4 sm:$0xff]   ;;  %v2851_v21 = vld [vmem:[%s3342_s7 + $0x44] ss:$16 sps:$4 sm:$0xff]  }
  0x2f   : > { %1906 = vmatprep.subr.bf16.mxu0 %v2845_v17  ;;  %2110 = vmatprep.subr.bf16.mxu1 %v2847_v18  ;;  %v2853_v22 = vld [vmem:[%s3342_s7 + $0x4c] ss:$16 sps:$4 sm:$0xff]   ;;  %v2855_v23 = vld [vmem:[%s3342_s7 + $0x40] ss:$16 sps:$4 sm:$0xff]   ;;  %v2856_v24 = vld [vmem:[%s3342_s7 + $0x48] ss:$16 sps:$4 sm:$0xff]  }
  0x30   : > { %v2857_v25 = vld [vmem:[%s3342_s7 + $0x64] ss:$16 sps:$4 sm:$0xff]   ;;  %v2859_v26 = vld [vmem:[%s3342_s7 + $0x6c] ss:$16 sps:$4 sm:$0xff]   ;;  %v2861_v27 = vld [vmem:[%s3342_s7 + $0x60] ss:$16 sps:$4 sm:$0xff]  }
  0x31   : > { %v2862_v28 = vld [vmem:[%s3342_s7 + $0x68] ss:$16 sps:$4 sm:$0xff]   ;;  %v2863_v29 = vld [vmem:[%s3342_s7 + $0x84] ss:$16 sps:$4 sm:$0xff]   ;;  %v2865_v30 = vld [vmem:[%s3342_s7 + $0x8c] ss:$16 sps:$4 sm:$0xff]  }
  0x32   : > { %1907 = vmatpush1.bf16.msra.mxu0 %v2849_v19  ;;  %2111 = vmatpush1.bf16.msra.mxu1 %v2850_v20  ;;  %v2867_v31 = vld [vmem:[%s3342_s7 + $0x80] ss:$16 sps:$4 sm:$0xff]   ;;  %v2868_v32 = vld [vmem:[%s3342_s7 + $0x88] ss:$16 sps:$4 sm:$0xff]   ;;  %v2869_v33 = vld [vmem:[%s3342_s7 + $0xa4] ss:$16 sps:$4 sm:$0xff]  }
  0x33   : > { %1908 = vmatprep.subr.bf16.mxu0 %v2851_v21  ;;  %2112 = vmatprep.subr.bf16.mxu1 %v2853_v22  ;;  %v2871_v34 = vld [vmem:[%s3342_s7 + $0xac] ss:$16 sps:$4 sm:$0xff]   ;;  %v2873_v35 = vld [vmem:[%s3342_s7 + $0xa0] ss:$16 sps:$4 sm:$0xff]   ;;  %v2874_v36 = vld [vmem:[%s3342_s7 + $0xa8] ss:$16 sps:$4 sm:$0xff]  }
  0x34   : > { %v2875_v37 = vld [vmem:[%s3342_s7 + $0xc4] ss:$16 sps:$4 sm:$0xff]   ;;  %v2877_v38 = vld [vmem:[%s3342_s7 + $0xcc] ss:$16 sps:$4 sm:$0xff]   ;;  %v2879_v39 = vld [vmem:[%s3342_s7 + $0xc0] ss:$16 sps:$4 sm:$0xff]  }
  0x35   : > { %v2880_v40 = vld [vmem:[%s3342_s7 + $0xc8] ss:$16 sps:$4 sm:$0xff]   ;;  %v2881_v41 = vld [vmem:[%s3342_s7 + $0xe4] ss:$16 sps:$4 sm:$0xff]   ;;  %v2883_v42 = vld [vmem:[%s3342_s7 + $0xec] ss:$16 sps:$4 sm:$0xff]  }
  0x36   : > { %1909 = vmatpush1.bf16.msra.mxu0 %v2855_v23  ;;  %2113 = vmatpush1.bf16.msra.mxu1 %v2856_v24  ;;  %v2885_v43 = vld [vmem:[%s3342_s7 + $0xe0] ss:$16 sps:$4 sm:$0xff]   ;;  %v2886_v44 = vld [vmem:[%s3342_s7 + $0xe8] ss:$16 sps:$4 sm:$0xff]   ;;  %v2887_v45 = vld [vmem:[%s3342_s7 + $0x104] ss:$16 sps:$4 sm:$0xff]  }
  0x37   : > { %1910 = vmatprep.subr.bf16.mxu0 %v2857_v25  ;;  %2114 = vmatprep.subr.bf16.mxu1 %v2859_v26  ;;  %v2889_v46 = vld [vmem:[%s3342_s7 + $0x10c] ss:$16 sps:$4 sm:$0xff]   ;;  %v2891_v47 = vld [vmem:[%s3342_s7 + $0x100] ss:$16 sps:$4 sm:$0xff]   ;;  %v2892_v48 = vld [vmem:[%s3342_s7 + $0x108] ss:$16 sps:$4 sm:$0xff]  }
  0x38   : > { %v2893_v49 = vld [vmem:[%s3342_s7 + $0x124] ss:$16 sps:$4 sm:$0xff]   ;;  %v2895_v50 = vld [vmem:[%s3342_s7 + $0x12c] ss:$16 sps:$4 sm:$0xff]   ;;  %v2897_v51 = vld [vmem:[%s3342_s7 + $0x120] ss:$16 sps:$4 sm:$0xff]  }
  0x39   : > { %v2898_v52 = vld [vmem:[%s3342_s7 + $0x128] ss:$16 sps:$4 sm:$0xff]   ;;  %v2899_v53 = vld [vmem:[%s3342_s7 + $0x144] ss:$16 sps:$4 sm:$0xff]   ;;  %v2901_v54 = vld [vmem:[%s3342_s7 + $0x14c] ss:$16 sps:$4 sm:$0xff]  }
  0x3a   : > { %1911 = vmatpush1.bf16.msra.mxu0 %v2861_v27  ;;  %2115 = vmatpush1.bf16.msra.mxu1 %v2862_v28  ;;  %v2903_v55 = vld [vmem:[%s3342_s7 + $0x140] ss:$16 sps:$4 sm:$0xff]   ;;  %v2904_v56 = vld [vmem:[%s3342_s7 + $0x148] ss:$16 sps:$4 sm:$0xff]   ;;  %v2905_v57 = vld [vmem:[%s3342_s7 + $0x164] ss:$16 sps:$4 sm:$0xff]  }
  0x3b   : > { %1912 = vmatprep.subr.bf16.mxu0 %v2863_v29  ;;  %2116 = vmatprep.subr.bf16.mxu1 %v2865_v30  ;;  %v2907_v58 = vld [vmem:[%s3342_s7 + $0x16c] ss:$16 sps:$4 sm:$0xff]   ;;  %v288_v59 = vld [vmem:[%s3344_s8] sm:$0xff]  ;;  %v2910_v62 = vld [vmem:[%s3342_s7 + $0x168] ss:$16 sps:$4 sm:$0xff]   ;;  %p2765_p11 = scmp.ne.s32.totalorder %s3261_s14, 3 }
  0x3c   : > { %v292_v60 = vld [vmem:[%s3344_s8 + $0x20] sm:$0xff]  ;;  %v2913_v1 = vld [vmem:[%s3342_s7 + $0x18c] ss:$16 sps:$4 sm:$0xff]   ;;  %v2916_v3 = vld [vmem:[%s3342_s7 + $0x188] ss:$16 sps:$4 sm:$0xff]  }
  0x3d   : > { %v2909_v61 = vld [vmem:[%s3342_s7 + $0x160] ss:$16 sps:$4 sm:$0xff]   ;;  %v2494_v63 = vcombine.high %v288_v59, %v292_v60  ;;  %v2911_v0 = vld [vmem:[%s3342_s7 + $0x184] ss:$16 sps:$4 sm:$0xff]   ;;  %v2919_v5 = vld [vmem:[%s3342_s7 + $0x1ac] ss:$16 sps:$4 sm:$0xff]   ;;  %v2493_v18 = vcombine.low %v288_v59, %v292_v60 }
  0x3e   : > { %1913 = vmatpush1.bf16.msra.mxu0 %v2867_v31  ;;  %2117 = vmatpush1.bf16.msra.mxu1 %v2868_v32  ;;  %v2915_v2 = vld [vmem:[%s3342_s7 + $0x180] ss:$16 sps:$4 sm:$0xff]   ;;  %v2917_v4 = vld [vmem:[%s3342_s7 + $0x1a4] ss:$16 sps:$4 sm:$0xff]   ;;  %v2922_v7 = vld [vmem:[%s3342_s7 + $0x1a8] ss:$16 sps:$4 sm:$0xff]  }
  0x3f   : > { %1914 = vmatprep.subr.bf16.mxu0 %v2869_v33  ;;  %2118 = vmatprep.subr.bf16.mxu1 %v2871_v34  ;;  %v2921_v6 = vld [vmem:[%s3342_s7 + $0x1a0] ss:$16 sps:$4 sm:$0xff]   ;;  %v2923_v8 = vld [vmem:[%s3342_s7 + $0x1c4] ss:$16 sps:$4 sm:$0xff]   ;;  %v2925_v9 = vld [vmem:[%s3342_s7 + $0x1cc] ss:$16 sps:$4 sm:$0xff]  }
  0x40   : > { %1936 = vmatprep.mubr.bf16.mxu0 %v2494_v63  ;;  %2140 = vmatprep.mubr.bf16.mxu1 %v2494_v63  ;;  %v2927_v10 = vld [vmem:[%s3342_s7 + $0x1c0] ss:$16 sps:$4 sm:$0xff]   ;;  %v2928_v11 = vld [vmem:[%s3342_s7 + $0x1c8] ss:$16 sps:$4 sm:$0xff]   ;;  %v2929_v12 = vld [vmem:[%s3342_s7 + $0x1e4] ss:$16 sps:$4 sm:$0xff]  }
  0x41   : > { %v2931_v13 = vld [vmem:[%s3342_s7 + $0x1ec] ss:$16 sps:$4 sm:$0xff]   ;;  %v2933_v14 = vld [vmem:[%s3342_s7 + $0x1e0] ss:$16 sps:$4 sm:$0xff]   ;;  %v2934_v15 = vld [vmem:[%s3342_s7 + $0x1e8] ss:$16 sps:$4 sm:$0xff]  }
  0x42   : > { %1915 = vmatpush1.bf16.msra.mxu0 %v2873_v35  ;;  %2119 = vmatpush1.bf16.msra.mxu1 %v2874_v36  ;;  %v2937_v16 = vld [vmem:[%s3342_s7 + $0x204] ss:$16 sps:$4 sm:$0xff]   ;;  %v2940_v17 = vld [vmem:[%s3342_s7 + $0x20c] ss:$16 sps:$4 sm:$0xff]   ;;  %v2935_v19 = vld [vmem:[%s3342_s7 + $0x200] ss:$16 sps:$4 sm:$0xff]  }
  0x43   : > { %1916 = vmatprep.subr.bf16.mxu0 %v2875_v37  ;;  %2120 = vmatprep.subr.bf16.mxu1 %v2877_v38  ;;  %v2938_v20 = vld [vmem:[%s3342_s7 + $0x208] ss:$16 sps:$4 sm:$0xff]   ;;  %v2943_v21 = vld [vmem:[%s3342_s7 + $0x224] ss:$16 sps:$4 sm:$0xff]   ;;  %v2946_v22 = vld [vmem:[%s3342_s7 + $0x22c] ss:$16 sps:$4 sm:$0xff]  }
  0x44   : > { %v2941_v23 = vld [vmem:[%s3342_s7 + $0x220] ss:$16 sps:$4 sm:$0xff]   ;;  %v2944_v24 = vld [vmem:[%s3342_s7 + $0x228] ss:$16 sps:$4 sm:$0xff]   ;;  %v2949_v25 = vld [vmem:[%s3342_s7 + $0x244] ss:$16 sps:$4 sm:$0xff]  }
  0x45   : > { %v2952_v26 = vld [vmem:[%s3342_s7 + $0x24c] ss:$16 sps:$4 sm:$0xff]   ;;  %v2947_v27 = vld [vmem:[%s3342_s7 + $0x240] ss:$16 sps:$4 sm:$0xff]   ;;  %v2950_v28 = vld [vmem:[%s3342_s7 + $0x248] ss:$16 sps:$4 sm:$0xff]  }
  0x46   : > { %1917 = vmatpush1.bf16.msra.mxu0 %v2879_v39  ;;  %2121 = vmatpush1.bf16.msra.mxu1 %v2880_v40  ;;  %v2955_v29 = vld [vmem:[%s3342_s7 + $0x264] ss:$16 sps:$4 sm:$0xff]   ;;  %v2958_v30 = vld [vmem:[%s3342_s7 + $0x26c] ss:$16 sps:$4 sm:$0xff]   ;;  %v2953_v31 = vld [vmem:[%s3342_s7 + $0x260] ss:$16 sps:$4 sm:$0xff]  }
  0x47   : > { %1918 = vmatprep.subr.bf16.mxu0 %v2881_v41  ;;  %2122 = vmatprep.subr.bf16.mxu1 %v2883_v42  ;;  %v2956_v32 = vld [vmem:[%s3342_s7 + $0x268] ss:$16 sps:$4 sm:$0xff]   ;;  %v2961_v33 = vld [vmem:[%s3342_s7 + $0x284] ss:$16 sps:$4 sm:$0xff]   ;;  %v2964_v34 = vld [vmem:[%s3342_s7 + $0x28c] ss:$16 sps:$4 sm:$0xff]  }
  0x48   : > { %v2959_v35 = vld [vmem:[%s3342_s7 + $0x280] ss:$16 sps:$4 sm:$0xff]   ;;  %v2962_v36 = vld [vmem:[%s3342_s7 + $0x288] ss:$16 sps:$4 sm:$0xff]   ;;  %v2967_v37 = vld [vmem:[%s3342_s7 + $0x2a4] ss:$16 sps:$4 sm:$0xff]  }
  0x49   : > { %v296_v38 = vld [vmem:[%s3344_s8 + $0x40] sm:$0xff]  ;;  %v2970_v39 = vld [vmem:[%s3342_s7 + $0x2ac] ss:$16 sps:$4 sm:$0xff]  }
  0x4a   : > { %1919 = vmatpush1.bf16.msra.mxu0 %v2885_v43  ;;  %2123 = vmatpush1.bf16.msra.mxu1 %v2886_v44  ;;  %v2502_v40 = vcombine.high %v296_v38, %v296_v38  ;;  %v2501_v41 = vcombine.low %v296_v38, %v296_v38  ;;  %v2965_v42 = vld [vmem:[%s3342_s7 + $0x2a0] ss:$16 sps:$4 sm:$0xff]   ;;  %v2968_v43 = vld [vmem:[%s3342_s7 + $0x2a8] ss:$16 sps:$4 sm:$0xff]   ;;  %v2973_v44 = vld [vmem:[%s3342_s7 + $0x2c4] ss:$16 sps:$4 sm:$0xff]  }
  0x4b   : > { %1920 = vmatprep.subr.bf16.mxu0 %v2887_v45  ;;  %2124 = vmatprep.subr.bf16.mxu1 %v2889_v46  ;;  %v2976_v45 = vld [vmem:[%s3342_s7 + $0x2cc] ss:$16 sps:$4 sm:$0xff]   ;;  %v2991_v59 = vld [vmem:[%s3342_s7 + $0x324] ss:$16 sps:$4 sm:$0xff]  }
  0x4c   : > { %v3441_v46 = vld [vmem:[%s3344_s8 + $0x8] sm:$0xff]  ;;  %v2997_v63 = vld [vmem:[%s3342_s7 + $0x344] ss:$16 sps:$4 sm:$0xff]  }
  0x4d   : > { %v2994_v60 = vld [vmem:[%s3342_s7 + $0x32c] ss:$16 sps:$4 sm:$0xff]   ;;  %v3501_v38 = vld [vmem:[%s3344_s8 + $0x10] sm:$0xff] }
  0x4e   : > { %1921 = vmatpush1.bf16.msra.mxu0 %v2891_v47  ;;  %2125 = vmatpush1.bf16.msra.mxu1 %v2892_v48  ;;  %v3444_v47 = vld [vmem:[%s3344_s8 + $0x28] sm:$0xff]  ;;  %v2971_v48 = vld [vmem:[%s3342_s7 + $0x2c0] ss:$16 sps:$4 sm:$0xff]  }
  0x4f   : > { %1922 = vmatprep.subr.bf16.mxu0 %v2893_v49  ;;  %2126 = vmatprep.subr.bf16.mxu1 %v2895_v50  ;;  %v2496_v49 = vcombine.high %v3441_v46, %v3444_v47  ;;  %v2974_v50 = vld [vmem:[%s3342_s7 + $0x2c8] ss:$16 sps:$4 sm:$0xff]  }
  0x52   : > { %1923 = vmatpush1.bf16.msra.mxu0 %v2897_v51  ;;  %2127 = vmatpush1.bf16.msra.mxu1 %v2898_v52  ;;  %v2979_v51 = vld [vmem:[%s3342_s7 + $0x2e4] ss:$16 sps:$4 sm:$0xff]   ;;  %v2982_v52 = vld [vmem:[%s3342_s7 + $0x2ec] ss:$16 sps:$4 sm:$0xff]  }
  0x53   : > { %1924 = vmatprep.subr.bf16.mxu0 %v2899_v53  ;;  %2128 = vmatprep.subr.bf16.mxu1 %v2901_v54  ;;  %v2977_v53 = vld [vmem:[%s3342_s7 + $0x2e0] ss:$16 sps:$4 sm:$0xff]   ;;  %v2980_v54 = vld [vmem:[%s3342_s7 + $0x2e8] ss:$16 sps:$4 sm:$0xff]  }
  0x56   : > { %1925 = vmatpush1.bf16.msra.mxu0 %v2903_v55  ;;  %2129 = vmatpush1.bf16.msra.mxu1 %v2904_v56  ;;  %v2985_v55 = vld [vmem:[%s3342_s7 + $0x304] ss:$16 sps:$4 sm:$0xff]   ;;  %v2988_v56 = vld [vmem:[%s3342_s7 + $0x30c] ss:$16 sps:$4 sm:$0xff]  }
  0x57   : > { %1926 = vmatprep.subr.bf16.mxu0 %v2905_v57  ;;  %2130 = vmatprep.subr.bf16.mxu1 %v2907_v58  ;;  %v2983_v57 = vld [vmem:[%s3342_s7 + $0x300] ss:$16 sps:$4 sm:$0xff]   ;;  %v2986_v58 = vld [vmem:[%s3342_s7 + $0x308] ss:$16 sps:$4 sm:$0xff]  }
  0x5a   : > { %1927 = vmatpush1.bf16.msra.mxu0 %v2909_v61  ;;  %2131 = vmatpush1.bf16.msra.mxu1 %v2910_v62  ;;  %v2989_v61 = vld [vmem:[%s3342_s7 + $0x320] ss:$16 sps:$4 sm:$0xff]   ;;  %v2992_v62 = vld [vmem:[%s3342_s7 + $0x328] ss:$16 sps:$4 sm:$0xff]  }
  0x5b   : > { %1928 = vmatprep.subr.bf16.mxu0 %v2911_v0  ;;  %2132 = vmatprep.subr.bf16.mxu1 %v2913_v1  ;;  %v3000_v0 = vld [vmem:[%s3342_s7 + $0x34c] ss:$16 sps:$4 sm:$0xff]   ;;  %v2995_v1 = vld [vmem:[%s3342_s7 + $0x340] ss:$16 sps:$4 sm:$0xff]  }
  0x5e   : > { %1929 = vmatpush1.bf16.msra.mxu0 %v2915_v2  ;;  %2133 = vmatpush1.bf16.msra.mxu1 %v2916_v3  ;;  %v2998_v2 = vld [vmem:[%s3342_s7 + $0x348] ss:$16 sps:$4 sm:$0xff]   ;;  %v3003_v3 = vld [vmem:[%s3342_s7 + $0x364] ss:$16 sps:$4 sm:$0xff]  }
  0x5f   : > { %1930 = vmatprep.subr.bf16.mxu0 %v2917_v4  ;;  %2134 = vmatprep.subr.bf16.mxu1 %v2919_v5  ;;  %v3006_v4 = vld [vmem:[%s3342_s7 + $0x36c] ss:$16 sps:$4 sm:$0xff]   ;;  %v3001_v5 = vld [vmem:[%s3342_s7 + $0x360] ss:$16 sps:$4 sm:$0xff]  }
  0x62   : > { %1931 = vmatpush1.bf16.msra.mxu0 %v2921_v6  ;;  %2135 = vmatpush1.bf16.msra.mxu1 %v2922_v7  ;;  %v3004_v6 = vld [vmem:[%s3342_s7 + $0x368] ss:$16 sps:$4 sm:$0xff]   ;;  %v3009_v7 = vld [vmem:[%s3342_s7 + $0x384] ss:$16 sps:$4 sm:$0xff]  }
  0x63   : > { %1932 = vmatprep.subr.bf16.mxu0 %v2923_v8  ;;  %2136 = vmatprep.subr.bf16.mxu1 %v2925_v9  ;;  %v3012_v8 = vld [vmem:[%s3342_s7 + $0x38c] ss:$16 sps:$4 sm:$0xff]   ;;  %v3007_v9 = vld [vmem:[%s3342_s7 + $0x380] ss:$16 sps:$4 sm:$0xff]  }
  0x66   : > { %1933 = vmatpush1.bf16.msra.mxu0 %v2927_v10  ;;  %2137 = vmatpush1.bf16.msra.mxu1 %v2928_v11  ;;  %v3010_v10 = vld [vmem:[%s3342_s7 + $0x388] ss:$16 sps:$4 sm:$0xff]   ;;  %v3015_v11 = vld [vmem:[%s3342_s7 + $0x3a4] ss:$16 sps:$4 sm:$0xff]  }
  0x67   : > { %1934 = vmatprep.subr.bf16.mxu0 %v2929_v12  ;;  %2138 = vmatprep.subr.bf16.mxu1 %v2931_v13  ;;  %v3018_v12 = vld [vmem:[%s3342_s7 + $0x3ac] ss:$16 sps:$4 sm:$0xff]   ;;  %v3013_v13 = vld [vmem:[%s3342_s7 + $0x3a0] ss:$16 sps:$4 sm:$0xff]  }
  0x6a   : > { %1935 = vmatpush1.bf16.msra.mxu0 %v2933_v14  ;;  %2139 = vmatpush1.bf16.msra.mxu1 %v2934_v15  ;;  %v3016_v14 = vld [vmem:[%s3342_s7 + $0x3a8] ss:$16 sps:$4 sm:$0xff]   ;;  %v3023_v15 = vld [vmem:[%s3342_s7 + $0x3c4] ss:$16 sps:$4 sm:$0xff]  }
  0x6b   : > { %1955 = vmatprep.subr.bf16.mxu0 %v2937_v16  ;;  %2159 = vmatprep.subr.bf16.mxu1 %v2940_v17  ;;  %v3026_v16 = vld [vmem:[%s3342_s7 + $0x3cc] ss:$16 sps:$4 sm:$0xff]   ;;  %v3021_v17 = vld [vmem:[%s3342_s7 + $0x3c0] ss:$16 sps:$4 sm:$0xff]  }
  0x6d   : > { %1937 = vmatmul.mubr.bf16.vlgmr.msra.gmra.mrb[0].mxu0 %v2493_v18  ;;  %2141 = vmatmul.mubr.bf16.vlgmr.msra.gmra.mrb[0].mxu1 %v2493_v18  ;;  %v3024_v18 = vld [vmem:[%s3342_s7 + $0x3c8] ss:$16 sps:$4 sm:$0xff]  }
  0x6e   : > { %1956 = vmatpush1.bf16.msra.mxu0 %v2935_v19  ;;  %2160 = vmatpush1.bf16.msra.mxu1 %v2938_v20  ;;  %v3029_v19 = vld [vmem:[%s3342_s7 + $0x3e4] ss:$16 sps:$4 sm:$0xff]   ;;  %v3032_v20 = vld [vmem:[%s3342_s7 + $0x3ec] ss:$16 sps:$4 sm:$0xff]  }
  0x6f   : > { %1957 = vmatprep.subr.bf16.mxu0 %v2943_v21  ;;  %2161 = vmatprep.subr.bf16.mxu1 %v2946_v22  ;;  %v3027_v21 = vld [vmem:[%s3342_s7 + $0x3e0] ss:$16 sps:$4 sm:$0xff]   ;;  %v3030_v22 = vld [vmem:[%s3342_s7 + $0x3e8] ss:$16 sps:$4 sm:$0xff]  }
  0x70   : > { %1946 = vmatprep.mubr.bf16.mxu0 %v2502_v40  ;;  %2150 = vmatprep.mubr.bf16.mxu1 %v2502_v40  ;;  %v3050_v40 = vld [vmem:[%s3342_s7 + $0x448] ss:$16 sps:$4 sm:$0xff]  }
  0x72   : > { %1958 = vmatpush1.bf16.msra.mxu0 %v2941_v23  ;;  %2162 = vmatpush1.bf16.msra.mxu1 %v2944_v24  ;;  %v3035_v23 = vld [vmem:[%s3342_s7 + $0x404] ss:$16 sps:$4 sm:$0xff]   ;;  %v3038_v24 = vld [vmem:[%s3342_s7 + $0x40c] ss:$16 sps:$4 sm:$0xff]  }
  0x73   : > { %1959 = vmatprep.subr.bf16.mxu0 %v2949_v25  ;;  %2163 = vmatprep.subr.bf16.mxu1 %v2952_v26  ;;  %v2495_v25 = vcombine.low %v3441_v46, %v3444_v47  ;;  %v297_v26 = vld [vmem:[%s3344_s8 + $0x48] sm:$0xff]  ;;  %v3061_v46 = vld [vmem:[%s3342_s7 + $0x484] ss:$16 sps:$4 sm:$0xff]  }
  0x74   : > { %v3064_v47 = vld [vmem:[%s3342_s7 + $0x48c] ss:$16 sps:$4 sm:$0xff]  }
  0x75   : > { %1947 = vmatmul.mubr.bf16.gmra.mrb[4].mxu0 %v2501_v41  ;;  %2151 = vmatmul.mubr.bf16.gmra.mrb[4].mxu1 %v2501_v41  ;;  %v3055_v41 = vld [vmem:[%s3342_s7 + $0x464] ss:$16 sps:$4 sm:$0xff]  }
  0x76   : > { %1960 = vmatpush1.bf16.msra.mxu0 %v2947_v27  ;;  %2164 = vmatpush1.bf16.msra.mxu1 %v2950_v28  ;;  %v3033_v27 = vld [vmem:[%s3342_s7 + $0x400] ss:$16 sps:$4 sm:$0xff]   ;;  %v3036_v28 = vld [vmem:[%s3342_s7 + $0x408] ss:$16 sps:$4 sm:$0xff]  }
  0x77   : > { %1961 = vmatprep.subr.bf16.mxu0 %v2955_v29  ;;  %2165 = vmatprep.subr.bf16.mxu1 %v2958_v30  ;;  %v3041_v29 = vld [vmem:[%s3342_s7 + $0x424] ss:$16 sps:$4 sm:$0xff]   ;;  %v3044_v30 = vld [vmem:[%s3342_s7 + $0x42c] ss:$16 sps:$4 sm:$0xff]  }
  0x78   : > { %1987 = vmatprep.mubr.bf16.mxu0 %v2496_v49  ;;  %2191 = vmatprep.mubr.bf16.mxu1 %v2496_v49  ;;  %v3062_v49 = vld [vmem:[%s3342_s7 + $0x488] ss:$16 sps:$4 sm:$0xff]  }
  0x7a   : > { %1962 = vmatpush1.bf16.msra.mxu0 %v2953_v31  ;;  %2166 = vmatpush1.bf16.msra.mxu1 %v2956_v32  ;;  %v2504_v31 = vcombine.high %v297_v26, %v297_v26  ;;  %v3039_v32 = vld [vmem:[%s3342_s7 + $0x420] ss:$16 sps:$4 sm:$0xff]  }
  0x7b   : > { %1963 = vmatprep.subr.bf16.mxu0 %v2961_v33  ;;  %2167 = vmatprep.subr.bf16.mxu1 %v2964_v34  ;;  %v3042_v33 = vld [vmem:[%s3342_s7 + $0x428] ss:$16 sps:$4 sm:$0xff]   ;;  %v3049_v34 = vld [vmem:[%s3342_s7 + $0x444] ss:$16 sps:$4 sm:$0xff]  }
  0x7e   : > { %1964 = vmatpush1.bf16.msra.mxu0 %v2959_v35  ;;  %2168 = vmatpush1.bf16.msra.mxu1 %v2962_v36  ;;  %v3052_v35 = vld [vmem:[%s3342_s7 + $0x44c] ss:$16 sps:$4 sm:$0xff]   ;;  %v3047_v36 = vld [vmem:[%s3342_s7 + $0x440] ss:$16 sps:$4 sm:$0xff]  }
  0x7f   : > { %1965 = vmatprep.subr.bf16.mxu0 %v2967_v37  ;;  %2169 = vmatprep.subr.bf16.mxu1 %v2970_v39  ;;  %v2503_v37 = vcombine.low %v297_v26, %v297_v26  ;;  %v3504_v39 = vld [vmem:[%s3344_s8 + $0x30] sm:$0xff] }
  0x80   : > { %v3127_v26 = vld [vmem:[%s3342_s7 + $0x5e4] ss:$16 sps:$4 sm:$0xff]  }
  0x82   : > { %1966 = vmatpush1.bf16.msra.mxu0 %v2965_v42  ;;  %2170 = vmatpush1.bf16.msra.mxu1 %v2968_v43  ;;  %v3058_v42 = vld [vmem:[%s3342_s7 + $0x46c] ss:$16 sps:$4 sm:$0xff]   ;;  %v2498_v43 = vcombine.high %v3501_v38, %v3504_v39 }
  0x83   : > { %1967 = vmatprep.subr.bf16.mxu0 %v2973_v44  ;;  %2171 = vmatprep.subr.bf16.mxu1 %v2976_v45  ;;  %v3053_v44 = vld [vmem:[%s3342_s7 + $0x460] ss:$16 sps:$4 sm:$0xff]   ;;  %v3056_v45 = vld [vmem:[%s3342_s7 + $0x468] ss:$16 sps:$4 sm:$0xff]  }
  0x86   : > { %1968 = vmatpush1.bf16.msra.mxu0 %v2971_v48  ;;  %2172 = vmatpush1.bf16.msra.mxu1 %v2974_v50  ;;  %v3059_v48 = vld [vmem:[%s3342_s7 + $0x480] ss:$16 sps:$4 sm:$0xff]   ;;  %v3067_v50 = vld [vmem:[%s3342_s7 + $0x4a4] ss:$16 sps:$4 sm:$0xff]  }
  0x87   : > { %1969 = vmatprep.subr.bf16.mxu0 %v2979_v51  ;;  %2173 = vmatprep.subr.bf16.mxu1 %v2982_v52  ;;  %v3070_v51 = vld [vmem:[%s3342_s7 + $0x4ac] ss:$16 sps:$4 sm:$0xff]   ;;  %v3065_v52 = vld [vmem:[%s3342_s7 + $0x4a0] ss:$16 sps:$4 sm:$0xff]  }
  0x8a   : > { %1970 = vmatpush1.bf16.msra.mxu0 %v2977_v53  ;;  %2174 = vmatpush1.bf16.msra.mxu1 %v2980_v54  ;;  %v3068_v53 = vld [vmem:[%s3342_s7 + $0x4a8] ss:$16 sps:$4 sm:$0xff]   ;;  %v3073_v54 = vld [vmem:[%s3342_s7 + $0x4c4] ss:$16 sps:$4 sm:$0xff]  }
  0x8b   : > { %1971 = vmatprep.subr.bf16.mxu0 %v2985_v55  ;;  %2175 = vmatprep.subr.bf16.mxu1 %v2988_v56  ;;  %v3076_v55 = vld [vmem:[%s3342_s7 + $0x4cc] ss:$16 sps:$4 sm:$0xff]   ;;  %v3071_v56 = vld [vmem:[%s3342_s7 + $0x4c0] ss:$16 sps:$4 sm:$0xff]  }
  0x8e   : > { %1972 = vmatpush1.bf16.msra.mxu0 %v2983_v57  ;;  %2176 = vmatpush1.bf16.msra.mxu1 %v2986_v58  ;;  %v3074_v57 = vld [vmem:[%s3342_s7 + $0x4c8] ss:$16 sps:$4 sm:$0xff]   ;;  %v3079_v58 = vld [vmem:[%s3342_s7 + $0x4e4] ss:$16 sps:$4 sm:$0xff]  }
  0x8f   : > { %1973 = vmatprep.subr.bf16.mxu0 %v2991_v59  ;;  %2177 = vmatprep.subr.bf16.mxu1 %v2994_v60  ;;  %v3082_v59 = vld [vmem:[%s3342_s7 + $0x4ec] ss:$16 sps:$4 sm:$0xff]   ;;  %v3077_v60 = vld [vmem:[%s3342_s7 + $0x4e0] ss:$16 sps:$4 sm:$0xff]  }
  0x92   : > { %1974 = vmatpush1.bf16.msra.mxu0 %v2989_v61  ;;  %2178 = vmatpush1.bf16.msra.mxu1 %v2992_v62  ;;  %v3080_v61 = vld [vmem:[%s3342_s7 + $0x4e8] ss:$16 sps:$4 sm:$0xff]   ;;  %v3085_v62 = vld [vmem:[%s3342_s7 + $0x504] ss:$16 sps:$4 sm:$0xff]  }
  0x93   : > { %1975 = vmatprep.subr.bf16.mxu0 %v2997_v63  ;;  %2179 = vmatprep.subr.bf16.mxu1 %v3000_v0  ;;  %v3088_v63 = vld [vmem:[%s3342_s7 + $0x50c] ss:$16 sps:$4 sm:$0xff]   ;;  %v3083_v0 = vld [vmem:[%s3342_s7 + $0x500] ss:$16 sps:$4 sm:$0xff]  }
  0x96   : > { %1976 = vmatpush1.bf16.msra.mxu0 %v2995_v1  ;;  %2180 = vmatpush1.bf16.msra.mxu1 %v2998_v2  ;;  %v3086_v1 = vld [vmem:[%s3342_s7 + $0x508] ss:$16 sps:$4 sm:$0xff]   ;;  %v3091_v2 = vld [vmem:[%s3342_s7 + $0x524] ss:$16 sps:$4 sm:$0xff]  }
  0x97   : > { %1977 = vmatprep.subr.bf16.mxu0 %v3003_v3  ;;  %2181 = vmatprep.subr.bf16.mxu1 %v3006_v4  ;;  %v3094_v3 = vld [vmem:[%s3342_s7 + $0x52c] ss:$16 sps:$4 sm:$0xff]   ;;  %v3089_v4 = vld [vmem:[%s3342_s7 + $0x520] ss:$16 sps:$4 sm:$0xff]  }
  0x9a   : > { %1978 = vmatpush1.bf16.msra.mxu0 %v3001_v5  ;;  %2182 = vmatpush1.bf16.msra.mxu1 %v3004_v6  ;;  %v3092_v5 = vld [vmem:[%s3342_s7 + $0x528] ss:$16 sps:$4 sm:$0xff]   ;;  %v3097_v6 = vld [vmem:[%s3342_s7 + $0x544] ss:$16 sps:$4 sm:$0xff]  }
  0x9b   : > { %1979 = vmatprep.subr.bf16.mxu0 %v3009_v7  ;;  %2183 = vmatprep.subr.bf16.mxu1 %v3012_v8  ;;  %v3100_v7 = vld [vmem:[%s3342_s7 + $0x54c] ss:$16 sps:$4 sm:$0xff]   ;;  %v3095_v8 = vld [vmem:[%s3342_s7 + $0x540] ss:$16 sps:$4 sm:$0xff]  }
  0x9e   : > { %1980 = vmatpush1.bf16.msra.mxu0 %v3007_v9  ;;  %2184 = vmatpush1.bf16.msra.mxu1 %v3010_v10  ;;  %v3098_v9 = vld [vmem:[%s3342_s7 + $0x548] ss:$16 sps:$4 sm:$0xff]   ;;  %v3103_v10 = vld [vmem:[%s3342_s7 + $0x564] ss:$16 sps:$4 sm:$0xff]  }
  0x9f   : > { %1981 = vmatprep.subr.bf16.mxu0 %v3015_v11  ;;  %2185 = vmatprep.subr.bf16.mxu1 %v3018_v12  ;;  %v3106_v11 = vld [vmem:[%s3342_s7 + $0x56c] ss:$16 sps:$4 sm:$0xff]   ;;  %v3101_v12 = vld [vmem:[%s3342_s7 + $0x560] ss:$16 sps:$4 sm:$0xff]  }
  0xa2   : > { %1982 = vmatpush1.bf16.msra.mxu0 %v3013_v13  ;;  %2186 = vmatpush1.bf16.msra.mxu1 %v3016_v14  ;;  %v3104_v13 = vld [vmem:[%s3342_s7 + $0x568] ss:$16 sps:$4 sm:$0xff]   ;;  %v3109_v14 = vld [vmem:[%s3342_s7 + $0x584] ss:$16 sps:$4 sm:$0xff]  }
  0xa3   : > { %1983 = vmatprep.subr.bf16.mxu0 %v3023_v15  ;;  %2187 = vmatprep.subr.bf16.mxu1 %v3026_v16  ;;  %v3112_v15 = vld [vmem:[%s3342_s7 + $0x58c] ss:$16 sps:$4 sm:$0xff]   ;;  %v3107_v16 = vld [vmem:[%s3342_s7 + $0x580] ss:$16 sps:$4 sm:$0xff]  }
  0xa6   : > { %1984 = vmatpush1.bf16.msra.mxu0 %v3021_v17  ;;  %2188 = vmatpush1.bf16.msra.mxu1 %v3024_v18  ;;  %v3110_v17 = vld [vmem:[%s3342_s7 + $0x588] ss:$16 sps:$4 sm:$0xff]   ;;  %v3115_v18 = vld [vmem:[%s3342_s7 + $0x5a4] ss:$16 sps:$4 sm:$0xff]  }
  0xa7   : > { %1985 = vmatprep.subr.bf16.mxu0 %v3029_v19  ;;  %2189 = vmatprep.subr.bf16.mxu1 %v3032_v20  ;;  %v3118_v19 = vld [vmem:[%s3342_s7 + $0x5ac] ss:$16 sps:$4 sm:$0xff]   ;;  %v3113_v20 = vld [vmem:[%s3342_s7 + $0x5a0] ss:$16 sps:$4 sm:$0xff]  }
  0xaa   : > { %1986 = vmatpush1.bf16.msra.mxu0 %v3027_v21  ;;  %2190 = vmatpush1.bf16.msra.mxu1 %v3030_v22  ;;  %v3116_v21 = vld [vmem:[%s3342_s7 + $0x5a8] ss:$16 sps:$4 sm:$0xff]   ;;  %v3121_v22 = vld [vmem:[%s3342_s7 + $0x5c4] ss:$16 sps:$4 sm:$0xff]  }
  0xab   : > { %2006 = vmatprep.subr.bf16.mxu0 %v3035_v23  ;;  %2210 = vmatprep.subr.bf16.mxu1 %v3038_v24  ;;  %v3124_v23 = vld [vmem:[%s3342_s7 + $0x5cc] ss:$16 sps:$4 sm:$0xff]   ;;  %v3119_v24 = vld [vmem:[%s3342_s7 + $0x5c0] ss:$16 sps:$4 sm:$0xff]  }
  0xad   : > { %1988 = vmatmul.mubr.bf16.vlgmr.msra.gmra.mrb[0].mxu0 %v2495_v25  ;;  %2192 = vmatmul.mubr.bf16.vlgmr.msra.gmra.mrb[0].mxu1 %v2495_v25  ;;  %v3122_v25 = vld [vmem:[%s3342_s7 + $0x5c8] ss:$16 sps:$4 sm:$0xff]  }
  0xae   : > { %2007 = vmatpush1.bf16.msra.mxu0 %v3033_v27  ;;  %2211 = vmatpush1.bf16.msra.mxu1 %v3036_v28  ;;  %v3130_v27 = vld [vmem:[%s3342_s7 + $0x5ec] ss:$16 sps:$4 sm:$0xff]   ;;  %v3125_v28 = vld [vmem:[%s3342_s7 + $0x5e0] ss:$16 sps:$4 sm:$0xff]  }
  0xaf   : > { %2008 = vmatprep.subr.bf16.mxu0 %v3041_v29  ;;  %2212 = vmatprep.subr.bf16.mxu1 %v3044_v30  ;;  %v3128_v29 = vld [vmem:[%s3342_s7 + $0x5e8] ss:$16 sps:$4 sm:$0xff]   ;;  %v3133_v30 = vld [vmem:[%s3342_s7 + $0x604] ss:$16 sps:$4 sm:$0xff]  }
  0xb0   : > { %1997 = vmatprep.mubr.bf16.mxu0 %v2504_v31  ;;  %2201 = vmatprep.mubr.bf16.mxu1 %v2504_v31  ;;  %v3136_v31 = vld [vmem:[%s3342_s7 + $0x60c] ss:$16 sps:$4 sm:$0xff]  }
  0xb2   : > { %2009 = vmatpush1.bf16.msra.mxu0 %v3039_v32  ;;  %2213 = vmatpush1.bf16.msra.mxu1 %v3042_v33  ;;  %v2497_v32 = vcombine.low %v3501_v38, %v3504_v39  ;;  %v298_v33 = vld [vmem:[%s3344_s8 + $0x50] sm:$0xff]  ;;  %v3140_v39 = vld [vmem:[%s3342_s7 + $0x628] ss:$16 sps:$4 sm:$0xff]  }
  0xb3   : > { %2010 = vmatprep.subr.bf16.mxu0 %v3049_v34  ;;  %2214 = vmatprep.subr.bf16.mxu1 %v3052_v35  ;;  %v3131_v34 = vld [vmem:[%s3342_s7 + $0x600] ss:$16 sps:$4 sm:$0xff]   ;;  %v3134_v35 = vld [vmem:[%s3342_s7 + $0x608] ss:$16 sps:$4 sm:$0xff]  }
  0xb4   : > { %v3137_v38 = vld [vmem:[%s3342_s7 + $0x620] ss:$16 sps:$4 sm:$0xff]  }
  0xb5   : > { %1998 = vmatmul.mubr.bf16.gmra.mrb[8].mxu0 %v2503_v37  ;;  %2202 = vmatmul.mubr.bf16.gmra.mrb[8].mxu1 %v2503_v37  ;;  %v3142_v37 = vld [vmem:[%s3342_s7 + $0x62c] ss:$16 sps:$4 sm:$0xff]  }
  0xb6   : > { %2011 = vmatpush1.bf16.msra.mxu0 %v3047_v36  ;;  %2215 = vmatpush1.bf16.msra.mxu1 %v3050_v40  ;;  %v3139_v36 = vld [vmem:[%s3342_s7 + $0x624] ss:$16 sps:$4 sm:$0xff]   ;;  %v2506_v40 = vcombine.high %v298_v33, %v298_v33 }
  0xb7   : > { %2012 = vmatprep.subr.bf16.mxu0 %v3055_v41  ;;  %2216 = vmatprep.subr.bf16.mxu1 %v3058_v42  ;;  %v3147_v41 = vld [vmem:[%s3342_s7 + $0x644] ss:$16 sps:$4 sm:$0xff]   ;;  %v3150_v42 = vld [vmem:[%s3342_s7 + $0x64c] ss:$16 sps:$4 sm:$0xff]  }
  0xb8   : > { %2038 = vmatprep.mubr.bf16.mxu0 %v2498_v43  ;;  %2242 = vmatprep.mubr.bf16.mxu1 %v2498_v43  ;;  %v2505_v43 = vcombine.low %v298_v33, %v298_v33  ;;  %v3225_v33 = vld [vmem:[%s3342_s7 + $0x7e4] ss:$16 sps:$4 sm:$0xff]  }
  0xba   : > { %2013 = vmatpush1.bf16.msra.mxu0 %v3053_v44  ;;  %2217 = vmatpush1.bf16.msra.mxu1 %v3056_v45  ;;  %v3575_v44 = vld [vmem:[%s3344_s8 + $0x18] sm:$0xff] }
  0xbb   : > { %2014 = vmatprep.subr.bf16.mxu0 %v3061_v46  ;;  %2218 = vmatprep.subr.bf16.mxu1 %v3064_v47  ;;  %v3578_v45 = vld [vmem:[%s3344_s8 + $0x38] sm:$0xff]  ;;  %v3145_v46 = vld [vmem:[%s3342_s7 + $0x640] ss:$16 sps:$4 sm:$0xff]  }
  0xbc   : > { %v3148_v47 = vld [vmem:[%s3342_s7 + $0x648] ss:$16 sps:$4 sm:$0xff]  }
  0xbe   : > { %2015 = vmatpush1.bf16.msra.mxu0 %v3059_v48  ;;  %2219 = vmatpush1.bf16.msra.mxu1 %v3062_v49  ;;  %v3153_v48 = vld [vmem:[%s3342_s7 + $0x664] ss:$16 sps:$4 sm:$0xff]   ;;  %v3156_v49 = vld [vmem:[%s3342_s7 + $0x66c] ss:$16 sps:$4 sm:$0xff]  }
  0xbf   : > { %2016 = vmatprep.subr.bf16.mxu0 %v3067_v50  ;;  %2220 = vmatprep.subr.bf16.mxu1 %v3070_v51  ;;  %v2500_v50 = vcombine.high %v3575_v44, %v3578_v45  ;;  %v3151_v51 = vld [vmem:[%s3342_s7 + $0x660] ss:$16 sps:$4 sm:$0xff]  }
  0xc2   : > { %2017 = vmatpush1.bf16.msra.mxu0 %v3065_v52  ;;  %2221 = vmatpush1.bf16.msra.mxu1 %v3068_v53  ;;  %v3154_v52 = vld [vmem:[%s3342_s7 + $0x668] ss:$16 sps:$4 sm:$0xff]   ;;  %v3159_v53 = vld [vmem:[%s3342_s7 + $0x684] ss:$16 sps:$4 sm:$0xff]  }
  0xc3   : > { %2018 = vmatprep.subr.bf16.mxu0 %v3073_v54  ;;  %2222 = vmatprep.subr.bf16.mxu1 %v3076_v55  ;;  %v3162_v54 = vld [vmem:[%s3342_s7 + $0x68c] ss:$16 sps:$4 sm:$0xff]   ;;  %v3157_v55 = vld [vmem:[%s3342_s7 + $0x680] ss:$16 sps:$4 sm:$0xff]  }
  0xc6   : > { %2019 = vmatpush1.bf16.msra.mxu0 %v3071_v56  ;;  %2223 = vmatpush1.bf16.msra.mxu1 %v3074_v57  ;;  %v3160_v56 = vld [vmem:[%s3342_s7 + $0x688] ss:$16 sps:$4 sm:$0xff]   ;;  %v3165_v57 = vld [vmem:[%s3342_s7 + $0x6a4] ss:$16 sps:$4 sm:$0xff]  }
  0xc7   : > { %2020 = vmatprep.subr.bf16.mxu0 %v3079_v58  ;;  %2224 = vmatprep.subr.bf16.mxu1 %v3082_v59  ;;  %v3168_v58 = vld [vmem:[%s3342_s7 + $0x6ac] ss:$16 sps:$4 sm:$0xff]   ;;  %v3163_v59 = vld [vmem:[%s3342_s7 + $0x6a0] ss:$16 sps:$4 sm:$0xff]  }
  0xca   : > { %2021 = vmatpush1.bf16.msra.mxu0 %v3077_v60  ;;  %2225 = vmatpush1.bf16.msra.mxu1 %v3080_v61  ;;  %v3166_v60 = vld [vmem:[%s3342_s7 + $0x6a8] ss:$16 sps:$4 sm:$0xff]   ;;  %v3171_v61 = vld [vmem:[%s3342_s7 + $0x6c4] ss:$16 sps:$4 sm:$0xff]  }
  0xcb   : > { %2022 = vmatprep.subr.bf16.mxu0 %v3085_v62  ;;  %2226 = vmatprep.subr.bf16.mxu1 %v3088_v63  ;;  %v3174_v62 = vld [vmem:[%s3342_s7 + $0x6cc] ss:$16 sps:$4 sm:$0xff]   ;;  %v3169_v63 = vld [vmem:[%s3342_s7 + $0x6c0] ss:$16 sps:$4 sm:$0xff]  }
  0xce   : > { %2023 = vmatpush1.bf16.msra.mxu0 %v3083_v0  ;;  %2227 = vmatpush1.bf16.msra.mxu1 %v3086_v1  ;;  %v3172_v0 = vld [vmem:[%s3342_s7 + $0x6c8] ss:$16 sps:$4 sm:$0xff]   ;;  %v3177_v1 = vld [vmem:[%s3342_s7 + $0x6e4] ss:$16 sps:$4 sm:$0xff]  }
  0xcf   : > { %2024 = vmatprep.subr.bf16.mxu0 %v3091_v2  ;;  %2228 = vmatprep.subr.bf16.mxu1 %v3094_v3  ;;  %v3180_v2 = vld [vmem:[%s3342_s7 + $0x6ec] ss:$16 sps:$4 sm:$0xff]   ;;  %v3175_v3 = vld [vmem:[%s3342_s7 + $0x6e0] ss:$16 sps:$4 sm:$0xff]  }
  0xd2   : > { %2025 = vmatpush1.bf16.msra.mxu0 %v3089_v4  ;;  %2229 = vmatpush1.bf16.msra.mxu1 %v3092_v5  ;;  %v3178_v4 = vld [vmem:[%s3342_s7 + $0x6e8] ss:$16 sps:$4 sm:$0xff]   ;;  %v3183_v5 = vld [vmem:[%s3342_s7 + $0x704] ss:$16 sps:$4 sm:$0xff]  }
  0xd3   : > { %2026 = vmatprep.subr.bf16.mxu0 %v3097_v6  ;;  %2230 = vmatprep.subr.bf16.mxu1 %v3100_v7  ;;  %v3186_v6 = vld [vmem:[%s3342_s7 + $0x70c] ss:$16 sps:$4 sm:$0xff]   ;;  %v3181_v7 = vld [vmem:[%s3342_s7 + $0x700] ss:$16 sps:$4 sm:$0xff]  }
  0xd6   : > { %2027 = vmatpush1.bf16.msra.mxu0 %v3095_v8  ;;  %2231 = vmatpush1.bf16.msra.mxu1 %v3098_v9  ;;  %v3184_v8 = vld [vmem:[%s3342_s7 + $0x708] ss:$16 sps:$4 sm:$0xff]   ;;  %v3189_v9 = vld [vmem:[%s3342_s7 + $0x724] ss:$16 sps:$4 sm:$0xff]  }
  0xd7   : > { %2028 = vmatprep.subr.bf16.mxu0 %v3103_v10  ;;  %2232 = vmatprep.subr.bf16.mxu1 %v3106_v11  ;;  %v3192_v10 = vld [vmem:[%s3342_s7 + $0x72c] ss:$16 sps:$4 sm:$0xff]   ;;  %v3187_v11 = vld [vmem:[%s3342_s7 + $0x720] ss:$16 sps:$4 sm:$0xff]  }
  0xda   : > { %2029 = vmatpush1.bf16.msra.mxu0 %v3101_v12  ;;  %2233 = vmatpush1.bf16.msra.mxu1 %v3104_v13  ;;  %v3190_v12 = vld [vmem:[%s3342_s7 + $0x728] ss:$16 sps:$4 sm:$0xff]   ;;  %v3195_v13 = vld [vmem:[%s3342_s7 + $0x744] ss:$16 sps:$4 sm:$0xff]  }
  0xdb   : > { %2030 = vmatprep.subr.bf16.mxu0 %v3109_v14  ;;  %2234 = vmatprep.subr.bf16.mxu1 %v3112_v15  ;;  %v3198_v14 = vld [vmem:[%s3342_s7 + $0x74c] ss:$16 sps:$4 sm:$0xff]   ;;  %v3193_v15 = vld [vmem:[%s3342_s7 + $0x740] ss:$16 sps:$4 sm:$0xff]  }
  0xde   : > { %2031 = vmatpush1.bf16.msra.mxu0 %v3107_v16  ;;  %2235 = vmatpush1.bf16.msra.mxu1 %v3110_v17  ;;  %v3196_v16 = vld [vmem:[%s3342_s7 + $0x748] ss:$16 sps:$4 sm:$0xff]   ;;  %v3201_v17 = vld [vmem:[%s3342_s7 + $0x764] ss:$16 sps:$4 sm:$0xff]  }
  0xdf   : > { %2032 = vmatprep.subr.bf16.mxu0 %v3115_v18  ;;  %2236 = vmatprep.subr.bf16.mxu1 %v3118_v19  ;;  %v3204_v18 = vld [vmem:[%s3342_s7 + $0x76c] ss:$16 sps:$4 sm:$0xff]   ;;  %v3199_v19 = vld [vmem:[%s3342_s7 + $0x760] ss:$16 sps:$4 sm:$0xff]  }
  0xe2   : > { %2033 = vmatpush1.bf16.msra.mxu0 %v3113_v20  ;;  %2237 = vmatpush1.bf16.msra.mxu1 %v3116_v21  ;;  %v3202_v20 = vld [vmem:[%s3342_s7 + $0x768] ss:$16 sps:$4 sm:$0xff]   ;;  %v3207_v21 = vld [vmem:[%s3342_s7 + $0x784] ss:$16 sps:$4 sm:$0xff]  }
  0xe3   : > { %2034 = vmatprep.subr.bf16.mxu0 %v3121_v22  ;;  %2238 = vmatprep.subr.bf16.mxu1 %v3124_v23  ;;  %v3210_v22 = vld [vmem:[%s3342_s7 + $0x78c] ss:$16 sps:$4 sm:$0xff]   ;;  %v3205_v23 = vld [vmem:[%s3342_s7 + $0x780] ss:$16 sps:$4 sm:$0xff]  }
  0xe6   : > { %2035 = vmatpush1.bf16.msra.mxu0 %v3119_v24  ;;  %2239 = vmatpush1.bf16.msra.mxu1 %v3122_v25  ;;  %v3208_v24 = vld [vmem:[%s3342_s7 + $0x788] ss:$16 sps:$4 sm:$0xff]   ;;  %v3213_v25 = vld [vmem:[%s3342_s7 + $0x7a4] ss:$16 sps:$4 sm:$0xff]  }
  0xe7   : > { %2036 = vmatprep.subr.bf16.mxu0 %v3127_v26  ;;  %2240 = vmatprep.subr.bf16.mxu1 %v3130_v27  ;;  %v3216_v26 = vld [vmem:[%s3342_s7 + $0x7ac] ss:$16 sps:$4 sm:$0xff]   ;;  %v3211_v27 = vld [vmem:[%s3342_s7 + $0x7a0] ss:$16 sps:$4 sm:$0xff]  }
  0xea   : > { %2037 = vmatpush1.bf16.msra.mxu0 %v3125_v28  ;;  %2241 = vmatpush1.bf16.msra.mxu1 %v3128_v29  ;;  %v3214_v28 = vld [vmem:[%s3342_s7 + $0x7a8] ss:$16 sps:$4 sm:$0xff]   ;;  %v3219_v29 = vld [vmem:[%s3342_s7 + $0x7c4] ss:$16 sps:$4 sm:$0xff]  }
  0xeb   : > { %2057 = vmatprep.subr.bf16.mxu0 %v3133_v30  ;;  %2261 = vmatprep.subr.bf16.mxu1 %v3136_v31  ;;  %v3222_v30 = vld [vmem:[%s3342_s7 + $0x7cc] ss:$16 sps:$4 sm:$0xff]   ;;  %v3217_v31 = vld [vmem:[%s3342_s7 + $0x7c0] ss:$16 sps:$4 sm:$0xff]  }
  0xed   : > { %2039 = vmatmul.mubr.bf16.vlgmr.msra.gmra.mrb[0].mxu0 %v2497_v32  ;;  %2243 = vmatmul.mubr.bf16.vlgmr.msra.gmra.mrb[0].mxu1 %v2497_v32  ;;  %v3220_v32 = vld [vmem:[%s3342_s7 + $0x7c8] ss:$16 sps:$4 sm:$0xff]  }
  0xee   : > { %2058 = vmatpush1.bf16.msra.mxu0 %v3131_v34  ;;  %2262 = vmatpush1.bf16.msra.mxu1 %v3134_v35  ;;  %v3228_v34 = vld [vmem:[%s3342_s7 + $0x7ec] ss:$16 sps:$4 sm:$0xff]   ;;  %v3223_v35 = vld [vmem:[%s3342_s7 + $0x7e0] ss:$16 sps:$4 sm:$0xff]  }
  0xef   : > { %2059 = vmatprep.subr.bf16.mxu0 %v3139_v36  ;;  %2263 = vmatprep.subr.bf16.mxu1 %v3142_v37  ;;  %v3226_v36 = vld [vmem:[%s3342_s7 + $0x7e8] ss:$16 sps:$4 sm:$0xff]  }
  0xf0   : > { %2048 = vmatprep.mubr.bf16.mxu0 %v2506_v40  ;;  %2252 = vmatprep.mubr.bf16.mxu1 %v2506_v40  ;;  %v299_v37 = vld [vmem:[%s3344_s8 + $0x58] sm:$0xff]  ;;  %v2499_v40 = vcombine.low %v3575_v44, %v3578_v45 }
  0xf2   : > { %2060 = vmatpush1.bf16.msra.mxu0 %v3137_v38  ;;  %2264 = vmatpush1.bf16.msra.mxu1 %v3140_v39  ;;  %v2508_v38 = vcombine.high %v299_v37, %v299_v37  ;;  %v2507_v39 = vcombine.low %v299_v37, %v299_v37 }
  0xf3   : > { %2061 = vmatprep.subr.bf16.mxu0 %v3147_v41  ;;  %2265 = vmatprep.subr.bf16.mxu1 %v3150_v42 }
  0xf5   : > { %2049 = vmatmul.mubr.bf16.gmra.mrb[12].mxu0 %v2505_v43  ;;  %2253 = vmatmul.mubr.bf16.gmra.mrb[12].mxu1 %v2505_v43 }
  0xf6   : > { %2062 = vmatpush1.bf16.msra.mxu0 %v3145_v46  ;;  %2266 = vmatpush1.bf16.msra.mxu1 %v3148_v47 }
  0xf7   : > { %2063 = vmatprep.subr.bf16.mxu0 %v3153_v48  ;;  %2267 = vmatprep.subr.bf16.mxu1 %v3156_v49 }
  0xf8   : > { %2089 = vmatprep.mubr.bf16.mxu0 %v2500_v50  ;;  %2293 = vmatprep.mubr.bf16.mxu1 %v2500_v50 }
  0xfa   : > { %2064 = vmatpush1.bf16.msra.mxu0 %v3151_v51  ;;  %2268 = vmatpush1.bf16.msra.mxu1 %v3154_v52 }
  0xfb   : > { %2065 = vmatprep.subr.bf16.mxu0 %v3159_v53  ;;  %2269 = vmatprep.subr.bf16.mxu1 %v3162_v54 }
  0xfe   : > { %2066 = vmatpush1.bf16.msra.mxu0 %v3157_v55  ;;  %2270 = vmatpush1.bf16.msra.mxu1 %v3160_v56 }
  0xff   : > { %2067 = vmatprep.subr.bf16.mxu0 %v3165_v57  ;;  %2271 = vmatprep.subr.bf16.mxu1 %v3168_v58 }
 0x102   : > { %2068 = vmatpush1.bf16.msra.mxu0 %v3163_v59  ;;  %2272 = vmatpush1.bf16.msra.mxu1 %v3166_v60 }
 0x103   : > { %2069 = vmatprep.subr.bf16.mxu0 %v3171_v61  ;;  %2273 = vmatprep.subr.bf16.mxu1 %v3174_v62 }
 0x106   : > { %2070 = vmatpush1.bf16.msra.mxu0 %v3169_v63  ;;  %2274 = vmatpush1.bf16.msra.mxu1 %v3172_v0 }
 0x107   : > { %2071 = vmatprep.subr.bf16.mxu0 %v3177_v1  ;;  %2275 = vmatprep.subr.bf16.mxu1 %v3180_v2 }
 0x10a   : > { %2072 = vmatpush1.bf16.msra.mxu0 %v3175_v3  ;;  %2276 = vmatpush1.bf16.msra.mxu1 %v3178_v4 }
 0x10b   : > { %2073 = vmatprep.subr.bf16.mxu0 %v3183_v5  ;;  %2277 = vmatprep.subr.bf16.mxu1 %v3186_v6 }
 0x10e   : > { %2074 = vmatpush1.bf16.msra.mxu0 %v3181_v7  ;;  %2278 = vmatpush1.bf16.msra.mxu1 %v3184_v8 }
 0x10f   : > { %2075 = vmatprep.subr.bf16.mxu0 %v3189_v9  ;;  %2279 = vmatprep.subr.bf16.mxu1 %v3192_v10  ;;  %v276_v9 = vld [vmem:[#allocation2] sm:$0xff]  ;;  %v278_v10 = vld [vmem:[#allocation2 + $0x10] sm:$0xff] }
 0x112   : > { %2076 = vmatpush1.bf16.msra.mxu0 %v3187_v11  ;;  %2280 = vmatpush1.bf16.msra.mxu1 %v3190_v12  ;;  %v277_v11 = vld [vmem:[#allocation2 + $0x8] sm:$0xff]  ;;  %v279_v12 = vld [vmem:[#allocation2 + $0x18] sm:$0xff] }
 0x113   : > { %2077 = vmatprep.subr.bf16.mxu0 %v3195_v13  ;;  %2281 = vmatprep.subr.bf16.mxu1 %v3198_v14 }
 0x116   : > { %2078 = vmatpush1.bf16.msra.mxu0 %v3193_v15  ;;  %2282 = vmatpush1.bf16.msra.mxu1 %v3196_v16  ;;  %v280_v15 = vld [vmem:[#allocation2 + $0x20] sm:$0xff]  ;;  %v282_v16 = vld [vmem:[#allocation2 + $0x30] sm:$0xff] }
 0x117   : > { %2079 = vmatprep.subr.bf16.mxu0 %v3201_v17  ;;  %2283 = vmatprep.subr.bf16.mxu1 %v3204_v18 }
 0x11a   : > { %2080 = vmatpush1.bf16.msra.mxu0 %v3199_v19  ;;  %2284 = vmatpush1.bf16.msra.mxu1 %v3202_v20 }
 0x11b   : > { %2081 = vmatprep.subr.bf16.mxu0 %v3207_v21  ;;  %2285 = vmatprep.subr.bf16.mxu1 %v3210_v22  ;;  %v281_v21 = vld [vmem:[#allocation2 + $0x28] sm:$0xff]  ;;  %v283_v22 = vld [vmem:[#allocation2 + $0x38] sm:$0xff] }
 0x11e   : > { %2082 = vmatpush1.bf16.msra.mxu0 %v3205_v23  ;;  %2286 = vmatpush1.bf16.msra.mxu1 %v3208_v24 }
 0x11f   : > { %2083 = vmatprep.subr.bf16.mxu0 %v3213_v25  ;;  %2287 = vmatprep.subr.bf16.mxu1 %v3216_v26 }
 0x122   : > { %2084 = vmatpush1.bf16.msra.mxu0 %v3211_v27  ;;  %2288 = vmatpush1.bf16.msra.mxu1 %v3214_v28 }
 0x123   : > { %2085 = vmatprep.subr.bf16.mxu0 %v3219_v29  ;;  %2289 = vmatprep.subr.bf16.mxu1 %v3222_v30 }
 0x126   : > { %2086 = vmatpush1.bf16.msra.mxu0 %v3217_v31  ;;  %2290 = vmatpush1.bf16.msra.mxu1 %v3220_v32 }
 0x127   : > { %2087 = vmatprep.subr.bf16.mxu0 %v3225_v33  ;;  %2291 = vmatprep.subr.bf16.mxu1 %v3228_v34  ;;  %v284_v33 = vld [vmem:[#allocation2 + $0x40] sm:$0xff] }
 0x12a   : > { %2088 = vmatpush1.bf16.msra.mxu0 %v3223_v35  ;;  %2292 = vmatpush1.bf16.msra.mxu1 %v3226_v36  ;;  %v286_v35 = vld [vmem:[#allocation2 + $0x50] sm:$0xff] }
 0x12d   : > { %2090 = vmatmul.mubr.bf16.vlgmr.msra.gmra.mrb[0].mxu0 %v2499_v40  ;;  %2294 = vmatmul.mubr.bf16.vlgmr.msra.gmra.mrb[0].mxu1 %v2499_v40 }
 0x12e   : > { %2099 = vmatprep.mubr.bf16.mxu0 %v2508_v38  ;;  %2303 = vmatprep.mubr.bf16.mxu1 %v2508_v38  ;;  %v285_v38 = vld [vmem:[#allocation2 + $0x48] sm:$0xff] }
 0x135   : > { %2100 = vmatmul.mubr.bf16.gmra.mrb[16].mxu0 %v2507_v39  ;;  %2304 = vmatmul.mubr.bf16.gmra.mrb[16].mxu1 %v2507_v39 }
 0x148   : > { %v1948_v41 = vpop.f32.mrb[4].mxu0  ;;  %v2152_v42 = vpop.f32.mrb[4].mxu1 }
 0x149   : > { %v1950_v43 = vpop.f32.mrb[5].mxu0  ;;  %v2154_v46 = vpop.f32.mrb[5].mxu1 }
 0x14a   : > { %v1952_v47 = vpop.f32.mrb[6].mxu0  ;;  %v2156_v48 = vpop.f32.mrb[6].mxu1 }
 0x14b   : > { %v1953_v49 = vpop.f32.mrb[7].mxu0  ;;  %v2157_v50 = vpop.f32.mrb[7].mxu1 }
 0x188   : > { %v1999_v51 = vpop.f32.mrb[8].mxu0  ;;  %v2203_v44 = vpop.f32.mrb[8].mxu1 }
 0x189   : > { %v2000_v45 = vadd.f32 %v1999_v51, %v1948_v41  ;;  %v2204_v52 = vadd.f32 %v2203_v44, %v2152_v42  ;;  %v2001_v53 = vpop.f32.mrb[9].mxu0  ;;  %v2205_v54 = vpop.f32.mrb[9].mxu1  ;;  %v287_v41 = vld [vmem:[#allocation2 + $0x58] sm:$0xff] }
 0x18a   : > { %v2002_v55 = vadd.f32 %v2001_v53, %v1950_v43  ;;  %v2206_v56 = vadd.f32 %v2205_v54, %v2154_v46  ;;  %v2003_v57 = vpop.f32.mrb[10].mxu0  ;;  %v2207_v58 = vpop.f32.mrb[10].mxu1  ;;  %v2354_v53 = vlaneseq (!%p2765_p11) }
 0x18b   : > { %v2004_v59 = vpop.f32.mrb[11].mxu0  ;;  %v2208_v60 = vpop.f32.mrb[11].mxu1 }
 0x18c   : > { %v2355_v54 = vshrl.u32 (!%p2765_p11), %v2354_v53, 7 }
 0x18e   : > { %v2356_v57 = vsub.s32 (!%p2765_p11), 0, %v2355_v54  ;;  %v2360_v59 = vsub.s32 (!%p2765_p11), 1, %v2355_v54 }
 0x1c8   : > { %v2050_v61 = vpop.f32.mrb[12].mxu0  ;;  %v2254_v62 = vpop.f32.mrb[12].mxu1 }
 0x1c9   : > { %v2051_v63 = vadd.f32 %v2050_v61, %v2000_v45  ;;  %v2255_v0 = vadd.f32 %v2254_v62, %v2204_v52  ;;  %v2052_v1 = vpop.f32.mrb[13].mxu0  ;;  %v2256_v2 = vpop.f32.mrb[13].mxu1  ;;  %v2364_v61 = vsub.s32 (!%p2765_p11), 2, %v2355_v54  ;;  %v2368_v62 = vsub.s32 (!%p2765_p11), 3, %v2355_v54 }
 0x1ca   : > { %v2053_v3 = vadd.f32 %v2052_v1, %v2002_v55  ;;  %v2257_v4 = vadd.f32 %v2256_v2, %v2206_v56  ;;  %v2054_v5 = vpop.f32.mrb[14].mxu0  ;;  %v2258_v6 = vpop.f32.mrb[14].mxu1  ;;  %v2352_v56 = vld [vmem:[%s3696_s2] sm:$0xf] (!%p2765_p11) }
 0x1cb   : > { %v2055_v7 = vpop.f32.mrb[15].mxu0  ;;  %v2259_v8 = vpop.f32.mrb[15].mxu1  ;;  %v2357_v2 = vrot.slane (!%p2765_p11), %v2352_v56, %v2356_v57  ;;  %v2369_v5 = vrot.slane (!%p2765_p11), %v2352_v56, %v2368_v62 }
 0x200   : > { %v2091_v13 = vpop.f32.mrb[0].mxu0  ;;  %v2295_v14 = vpop.f32.mrb[0].mxu1 }
 0x201   : > { %v2312_v17 = vadd.f32 %v2091_v13, %v276_v9  ;;  %v2314_v18 = vadd.f32 %v2295_v14, %v278_v10  ;;  %v2093_v19 = vpop.f32.mrb[1].mxu0  ;;  %v2297_v20 = vpop.f32.mrb[1].mxu1 }
 0x202   : > { %v2313_v23 = vadd.f32 %v2093_v19, %v277_v11  ;;  %v2315_v24 = vadd.f32 %v2297_v20, %v279_v12  ;;  %v2095_v25 = vpop.f32.mrb[2].mxu0  ;;  %v2299_v26 = vpop.f32.mrb[2].mxu1 }
 0x203   : > { %2324 = vst [vmem:[#allocation2] sm:$0xff] %v2312_v17  ;;  %2326 = vst [vmem:[#allocation2 + $0x10] sm:$0xff] %v2314_v18  ;;  %v2316_v27 = vadd.f32 %v2095_v25, %v280_v15  ;;  %v2318_v28 = vadd.f32 %v2299_v26, %v282_v16  ;;  %v2097_v29 = vpop.f32.mrb[3].mxu0  ;;  %v2301_v30 = vpop.f32.mrb[3].mxu1 }
 0x204   : > { %2325 = vst [vmem:[#allocation2 + $0x8] sm:$0xff] %v2313_v23  ;;  %2327 = vst [vmem:[#allocation2 + $0x18] sm:$0xff] %v2315_v24  ;;  %v2317_v31 = vadd.f32 %v2097_v29, %v281_v21  ;;  %v2319_v32 = vadd.f32 %v2301_v30, %v283_v22 }
 0x205   : > { %2328 = vst [vmem:[#allocation2 + $0x20] sm:$0xff] %v2316_v27  ;;  %2330 = vst [vmem:[#allocation2 + $0x30] sm:$0xff] %v2318_v28 }
 0x206   : > { %2329 = vst [vmem:[#allocation2 + $0x28] sm:$0xff] %v2317_v31  ;;  %2331 = vst [vmem:[#allocation2 + $0x38] sm:$0xff] %v2319_v32 }
 0x208   : > { %v2101_v34 = vpop.f32.mrb[16].mxu0  ;;  %v2305_v36 = vpop.f32.mrb[16].mxu1  ;;  %2339 = sbr.rel (%p2765_p11) target bundleno = 537 (0x219), region = 63 }
 0x209   : > { %v2102_v37 = vadd.f32 %v2101_v34, %v2051_v63  ;;  %v2306_v40 = vadd.f32 %v2305_v36, %v2255_v0  ;;  %v2103_v39 = vpop.f32.mrb[17].mxu0  ;;  %v2307_v42 = vpop.f32.mrb[17].mxu1 }
 0x20a   : > { %v2104_v43 = vadd.f32 %v2103_v39, %v2053_v3  ;;  %v2308_v46 = vadd.f32 %v2307_v42, %v2257_v4  ;;  %v2105_v47 = vpop.f32.mrb[18].mxu0  ;;  %v2309_v48 = vpop.f32.mrb[18].mxu1  ;;  %v2340_v55 = vld [vmem:[#allocation2] sm:$0xff] (!%p2765_p11)  ;;  %v2342_v60 = vld [vmem:[#allocation2 + $0x10] sm:$0xff] (!%p2765_p11)  ;;  %v2361_v3 = vrot.slane (!%p2765_p11), %v2352_v56, %v2360_v59  ;;  %v2365_v4 = vrot.slane (!%p2765_p11), %v2352_v56, %v2364_v61 }
 0x20b   : > { %v2320_v49 = vadd.f32 %v2102_v37, %v284_v33  ;;  %v2322_v50 = vadd.f32 %v2306_v40, %v286_v35  ;;  %v2106_v51 = vpop.f32.mrb[19].mxu0  ;;  %v2310_v44 = vpop.f32.mrb[19].mxu1  ;;  %v2341_v58 = vld [vmem:[#allocation2 + $0x8] sm:$0xff] (!%p2765_p11)  ;;  %v2343_v63 = vld [vmem:[#allocation2 + $0x18] sm:$0xff] (!%p2765_p11)  ;;  %v2374_v12 = vadd.f32 (!%p2765_p11), %v2357_v2, %v2340_v55 }
 0x20c   : > { %v2321_v45 = vadd.f32 %v2104_v43, %v285_v38  ;;  %v2323_v52 = vadd.f32 %v2308_v46, %v287_v41  ;;  %v2344_v0 = vld [vmem:[#allocation2 + $0x20] sm:$0xff] (!%p2765_p11)  ;;  %v2346_v6 = vld [vmem:[#allocation2 + $0x30] sm:$0xff] (!%p2765_p11)  ;;  %v2375_v13 = vadd.f32 (!%p2765_p11), %v2361_v3, %v2341_v58  ;;  %v2376_v14 = vadd.f32 (!%p2765_p11), %v2365_v4, %v2342_v60 }
 0x20d   : > { %2332 = vst [vmem:[#allocation2 + $0x40] sm:$0xff] %v2320_v49  ;;  %2334 = vst [vmem:[#allocation2 + $0x50] sm:$0xff] %v2322_v50  ;;  %v2345_v1 = vld [vmem:[#allocation2 + $0x28] sm:$0xff] (!%p2765_p11)  ;;  %v2347_v7 = vld [vmem:[#allocation2 + $0x38] sm:$0xff] (!%p2765_p11)  ;;  %v2377_v15 = vadd.f32 (!%p2765_p11), %v2369_v5, %v2343_v63  ;;  %v2378_v16 = vadd.f32 (!%p2765_p11), %v2357_v2, %v2344_v0  ;;  %v2380_v18 = vadd.f32 (!%p2765_p11), %v2365_v4, %v2346_v6 }
 0x20e   : > { %2333 = vst [vmem:[#allocation2 + $0x48] sm:$0xff] %v2321_v45  ;;  %2335 = vst [vmem:[#allocation2 + $0x58] sm:$0xff] %v2323_v52  ;;  %v2379_v17 = vadd.f32 (!%p2765_p11), %v2361_v3, %v2345_v1  ;;  %v2381_v19 = vadd.f32 (!%p2765_p11), %v2369_v5, %v2347_v7 }
 0x20f   : > { %2386 = vst [vmem:[%s3697_s3] sm:$0xff] %v2374_v12  ;;  %2387 = vst [vmem:[%s3697_s3 + $0x8] sm:$0xff] %v2375_v13 }
 0x210   : > { %2388 = vst [vmem:[%s3697_s3 + $0x10] sm:$0xff] %v2376_v14  ;;  %2389 = vst [vmem:[%s3697_s3 + $0x18] sm:$0xff] %v2377_v15 }
 0x211   : > { %2390 = vst [vmem:[%s3697_s3 + $0x20] sm:$0xff] %v2378_v16  ;;  %2391 = vst [vmem:[%s3697_s3 + $0x28] sm:$0xff] %v2379_v17 }
 0x212   : > { %2392 = vst [vmem:[%s3697_s3 + $0x30] sm:$0xff] %v2380_v18  ;;  %2393 = vst [vmem:[%s3697_s3 + $0x38] sm:$0xff] %v2381_v19 }
 0x214   : > { %v2348_v8 = vld [vmem:[#allocation2 + $0x40] sm:$0xff]  ;;  %v2350_v10 = vld [vmem:[#allocation2 + $0x50] sm:$0xff] }
 0x215   : > { %v2349_v9 = vld [vmem:[#allocation2 + $0x48] sm:$0xff]  ;;  %v2351_v11 = vld [vmem:[#allocation2 + $0x58] sm:$0xff]  ;;  %v2382_v20 = vadd.f32 %v2357_v2, %v2348_v8  ;;  %v2384_v22 = vadd.f32 %v2365_v4, %v2350_v10 }
 0x216   : > { %v2383_v21 = vadd.f32 %v2361_v3, %v2349_v9  ;;  %v2385_v23 = vadd.f32 %v2369_v5, %v2351_v11 }
 0x217   : > { %2394 = vst [vmem:[%s3697_s3 + $0x40] sm:$0xff] %v2382_v20  ;;  %2396 = vst [vmem:[%s3697_s3 + $0x50] sm:$0xff] %v2384_v22 }
 0x218   : > { %2395 = vst [vmem:[%s3697_s3 + $0x48] sm:$0xff] %v2383_v21  ;;  %2397 = vst [vmem:[%s3697_s3 + $0x58] sm:$0xff] %v2385_v23 }
 0x219 PF: > { %s13_s16 = sadd.s32 1, %s3269_s16   ;;  %s3698_s12 = smov %s3257_s13 }
 0x21a   : > { %p10_p12 = scmp.ge.s32.totalorder %s13_s16, 6   ;;  %s3699_s13 = smov %s3327_s20 }
 0x21b   : > { %s3700_s14 = smov %s3265_s15  ;;  %s3701_s15 = smov %s3703_s17 }
 0x21c   :  { %12 = sbr.rel (!%p10_p12) target bundleno = 3 (0x3), region = 101 }

// kernel: discriminator_forward.15
= control target key start
LH: loop header
LB: loop body
LE: loop exit
PB: predicated region body
PF: predicated region fallthrough
CT: control target
= control target key end

     0   :  { %s1339_s12 = smov 0   ;;  %s1341_s13 = smov 0   ;;  %s1456_s0 = inlined_call_operand.vmem [shape: bf16[8,8192], index: 0, kind: input, shape index: {}]   ;;  %s1457_s1 = inlined_call_operand.vmem [shape: bf16[8192,128], index: 1, kind: input, shape index: {}]   ;;  %s1458_s2 = inlined_call_operand.vmem [shape: f32[1,128], index: 2, kind: input, shape index: {}]   ;;  %s1459_s3 = inlined_call_operand.vmem [shape: f32[8,128], index: 3, kind: output, shape index: {}]  }
   0x1   :  { %s1343_s14 = smov 0  }
   0x2 LB: > { %s22_s15 = sadd.s32 1, %s1312_s13  ;;  %p1026_p0 = scmp.ge.s32.totalorder %s1316_s14, 1  ;;  %s1316_s14 = sphi %s1343_s14, %s13_s14   ;;  %s1312_s13 = sphi %s1341_s13, %s1461_s13   ;;  %s1308_s12 = sphi %s1339_s12, %s1460_s12  }
   0x3   : > { %p23_p1 = scmp.ge.s32.totalorder %s22_s15, 8  ;;  %p167_p2 = scmp.lt.s32.totalorder %s1316_s14, 9 }
   0x5   : > { %s1463_s15 = smov (%p23_p1, %s22_s15), 0  ;;  %p168_p3 = pnand %p1026_p0, %p167_p2 }
   0x6   : > { %s1027_s16 = sshll.u32 (!%p168_p3), %s1308_s12, 3  ;;  %s1029_s17 = sshll.u32 (!%p168_p3), %s1308_s12, 7 }
   0x7   : > { %171 = sbr.rel (%p168_p3) target bundleno = 322 (0x142), region = 32  ;;  %p202_p4 = scmp.lt.s32.totalorder (!%p168_p3), %s1027_s16, 63 }
   0x8   : > { %p210_p5 = scmp.lt.s32.totalorder (!%p168_p3), %s1029_s17, 1023  ;;  %p1031_p6 = scmp.ne.s32.totalorder (!%p168_p3), %s1308_s12, 0 }
   0xe   : > { %s1465_s16 = smov (!%p202_p4, %s1027_s16), 63  ;;  %s1467_s17 = smov (!%p210_p5, %s1029_s17), 1023 }
   0xf   : > { %s1028_s18 = sshll.u32 %s1465_s16, 2  ;;  %s1030_s22 = sshll.u32 %s1467_s17, 2  ;;  %v1318_v0 = vmov (!%p1031_p6), 0.0  }
  0x10   : > { %s1364_s21 = scalar_lea.vmem %s1456_s0, %s1028_s18  ;;  %s1369_s25 = scalar_lea.vmem %s1457_s1, %s1030_s22  ;;  %224 = vst [vmem:[#allocation2] sm:$0xff] (!%p1031_p6), %v1318_v0 }
  0x11   : > { %223 = sbr.rel (%p1031_p6) target bundleno = 24 (0x18), region = 36 }
  0x18 PF: > { %v1222_v1 = vld [vmem:[%s1369_s25 + $0x40] sm:$0xff]   ;;  %v1226_v5 = vld [vmem:[%s1369_s25 + $0x48] sm:$0xff]   ;;  %v1230_v9 = vld [vmem:[%s1369_s25 + $0x50] sm:$0xff]   ;;  %p1104_p7 = scmp.ne.s32.totalorder %s1308_s12, 7 }
  0x19   : > { %v1223_v2 = vld [vmem:[%s1369_s25 + $0xc0] sm:$0xff]   ;;  %1109 = vmatprep.subr.bf16.mxu0 %v1222_v1  ;;  %v1227_v6 = vld [vmem:[%s1369_s25 + $0xc8] sm:$0xff]   ;;  %v1231_v10 = vld [vmem:[%s1369_s25 + $0xd0] sm:$0xff]  }
  0x1a   : > { %v1224_v3 = vld [vmem:[%s1369_s25] sm:$0xff]   ;;  %1131 = vmatprep.subr.bf16.mxu1 %v1223_v2  ;;  %v1228_v7 = vld [vmem:[%s1369_s25 + $0x8] sm:$0xff]   ;;  %v1232_v11 = vld [vmem:[%s1369_s25 + $0x10] sm:$0xff]  }
  0x1b   : > { %v1225_v4 = vld [vmem:[%s1369_s25 + $0x80] sm:$0xff]   ;;  %1110 = vmatpush3.bf16.msra.mxu0 %v1224_v3  ;;  %v1229_v8 = vld [vmem:[%s1369_s25 + $0x88] sm:$0xff]   ;;  %v1233_v12 = vld [vmem:[%s1369_s25 + $0x90] sm:$0xff]  }
  0x1c   : > { %1132 = vmatpush3.bf16.msra.mxu1 %v1225_v4  ;;  %1111 = vmatprep.subr.bf16.mxu0 %v1226_v5  ;;  %v1234_v13 = vld [vmem:[%s1369_s25 + $0x58] sm:$0xff]   ;;  %v1238_v17 = vld [vmem:[%s1369_s25 + $0x60] sm:$0xff]   ;;  %v1242_v21 = vld [vmem:[%s1369_s25 + $0x68] sm:$0xff]  }
  0x1d   : > { %1133 = vmatprep.subr.bf16.mxu1 %v1227_v6  ;;  %v1235_v14 = vld [vmem:[%s1369_s25 + $0xd8] sm:$0xff]   ;;  %v1239_v18 = vld [vmem:[%s1369_s25 + $0xe0] sm:$0xff]   ;;  %v1243_v22 = vld [vmem:[%s1369_s25 + $0xe8] sm:$0xff]  }
  0x1e   : > { %v1236_v15 = vld [vmem:[%s1369_s25 + $0x18] sm:$0xff]   ;;  %v1240_v19 = vld [vmem:[%s1369_s25 + $0x20] sm:$0xff]   ;;  %v1244_v23 = vld [vmem:[%s1369_s25 + $0x28] sm:$0xff]  }
  0x1f   : > { %1112 = vmatpush3.bf16.msra.mxu0 %v1228_v7  ;;  %v1237_v16 = vld [vmem:[%s1369_s25 + $0x98] sm:$0xff]   ;;  %v1241_v20 = vld [vmem:[%s1369_s25 + $0xa0] sm:$0xff]   ;;  %v1245_v24 = vld [vmem:[%s1369_s25 + $0xa8] sm:$0xff]  }
  0x20   : > { %1134 = vmatpush3.bf16.msra.mxu1 %v1229_v8  ;;  %1113 = vmatprep.subr.bf16.mxu0 %v1230_v9  ;;  %v1246_v25 = vld [vmem:[%s1369_s25 + $0x70] sm:$0xff]   ;;  %v1250_v29 = vld [vmem:[%s1369_s25 + $0x78] sm:$0xff]   ;;  %v226_v33 = vld [vmem:[%s1364_s21] sm:$0xff] }
  0x21   : > { %1135 = vmatprep.subr.bf16.mxu1 %v1231_v10  ;;  %v1247_v26 = vld [vmem:[%s1369_s25 + $0xf0] sm:$0xff]   ;;  %v1251_v30 = vld [vmem:[%s1369_s25 + $0xf8] sm:$0xff]   ;;  %v227_v34 = vld [vmem:[%s1364_s21 + $0x8] sm:$0xff]  ;;  %v1032_v35 = vcombine.low %v226_v33, %v226_v33  ;;  %v1033_v36 = vcombine.high %v226_v33, %v226_v33 }
  0x22   : > { %v1248_v27 = vld [vmem:[%s1369_s25 + $0x30] sm:$0xff]   ;;  %v1252_v31 = vld [vmem:[%s1369_s25 + $0x38] sm:$0xff]   ;;  %v1034_v37 = vcombine.low %v227_v34, %v227_v34  ;;  %v1035_v38 = vcombine.high %v227_v34, %v227_v34  ;;  %v1258_v39 = vld [vmem:[%s1369_s25 + $0x140] sm:$0xff]  }
  0x23   : > { %1114 = vmatpush3.bf16.msra.mxu0 %v1232_v11  ;;  %v1249_v28 = vld [vmem:[%s1369_s25 + $0xb0] sm:$0xff]   ;;  %v1253_v32 = vld [vmem:[%s1369_s25 + $0xb8] sm:$0xff]   ;;  %v1259_v40 = vld [vmem:[%s1369_s25 + $0x1c0] sm:$0xff]   ;;  %802 = vmatprep.mubr.bf16.mxu0 %v1033_v36 }
  0x24   : > { %1136 = vmatpush3.bf16.msra.mxu1 %v1233_v12  ;;  %1115 = vmatprep.subr.bf16.mxu0 %v1234_v13  ;;  %v1260_v41 = vld [vmem:[%s1369_s25 + $0x100] sm:$0xff]   ;;  %v1262_v43 = vld [vmem:[%s1369_s25 + $0x148] sm:$0xff]   ;;  %v1266_v47 = vld [vmem:[%s1369_s25 + $0x150] sm:$0xff]  }
  0x25   : > { %1137 = vmatprep.subr.bf16.mxu1 %v1235_v14  ;;  %842 = vmatprep.mubr.bf16.mxu1 %v1035_v38  ;;  %v1261_v42 = vld [vmem:[%s1369_s25 + $0x180] sm:$0xff]   ;;  %v1263_v44 = vld [vmem:[%s1369_s25 + $0x1c8] sm:$0xff]   ;;  %v1267_v48 = vld [vmem:[%s1369_s25 + $0x1d0] sm:$0xff]  }
  0x26   : > { %v1264_v45 = vld [vmem:[%s1369_s25 + $0x108] sm:$0xff]   ;;  %v1268_v49 = vld [vmem:[%s1369_s25 + $0x110] sm:$0xff]   ;;  %v1270_v51 = vld [vmem:[%s1369_s25 + $0x158] sm:$0xff]  }
  0x27   : > { %1116 = vmatpush3.bf16.msra.mxu0 %v1236_v15  ;;  %v1265_v46 = vld [vmem:[%s1369_s25 + $0x188] sm:$0xff]   ;;  %v1269_v50 = vld [vmem:[%s1369_s25 + $0x190] sm:$0xff]   ;;  %v1271_v52 = vld [vmem:[%s1369_s25 + $0x1d8] sm:$0xff]  }
  0x28   : > { %1138 = vmatpush3.bf16.msra.mxu1 %v1237_v16  ;;  %1117 = vmatprep.subr.bf16.mxu0 %v1238_v17  ;;  %v1272_v53 = vld [vmem:[%s1369_s25 + $0x118] sm:$0xff]   ;;  %v1274_v55 = vld [vmem:[%s1369_s25 + $0x160] sm:$0xff]   ;;  %v1278_v59 = vld [vmem:[%s1369_s25 + $0x168] sm:$0xff]  }
  0x29   : > { %1139 = vmatprep.subr.bf16.mxu1 %v1239_v18  ;;  %v1273_v54 = vld [vmem:[%s1369_s25 + $0x198] sm:$0xff]   ;;  %v1275_v56 = vld [vmem:[%s1369_s25 + $0x1e0] sm:$0xff]   ;;  %v1279_v60 = vld [vmem:[%s1369_s25 + $0x1e8] sm:$0xff]  }
  0x2a   : > { %v1276_v57 = vld [vmem:[%s1369_s25 + $0x120] sm:$0xff]   ;;  %v1280_v61 = vld [vmem:[%s1369_s25 + $0x128] sm:$0xff]   ;;  %v1282_v63 = vld [vmem:[%s1369_s25 + $0x170] sm:$0xff]  }
  0x2b   : > { %1118 = vmatpush3.bf16.msra.mxu0 %v1240_v19  ;;  %v1277_v58 = vld [vmem:[%s1369_s25 + $0x1a0] sm:$0xff]   ;;  %v1281_v62 = vld [vmem:[%s1369_s25 + $0x1a8] sm:$0xff]   ;;  %v1283_v0 = vld [vmem:[%s1369_s25 + $0x1f0] sm:$0xff]  }
  0x2c   : > { %1140 = vmatpush3.bf16.msra.mxu1 %v1241_v20  ;;  %1119 = vmatprep.subr.bf16.mxu0 %v1242_v21  ;;  %v1284_v1 = vld [vmem:[%s1369_s25 + $0x130] sm:$0xff]   ;;  %v1286_v3 = vld [vmem:[%s1369_s25 + $0x178] sm:$0xff]  }
  0x2d   : > { %1141 = vmatprep.subr.bf16.mxu1 %v1243_v22  ;;  %v1285_v2 = vld [vmem:[%s1369_s25 + $0x1b0] sm:$0xff]   ;;  %v1287_v4 = vld [vmem:[%s1369_s25 + $0x1f8] sm:$0xff]  }
  0x2e   : > { %v1288_v5 = vld [vmem:[%s1369_s25 + $0x138] sm:$0xff]   ;;  %v228_v7 = vld [vmem:[%s1364_s21 + $0x10] sm:$0xff] }
  0x2f   : > { %1120 = vmatpush3.bf16.msra.mxu0 %v1244_v23  ;;  %v1289_v6 = vld [vmem:[%s1369_s25 + $0x1b8] sm:$0xff]   ;;  %v1036_v8 = vcombine.low %v228_v7, %v228_v7  ;;  %v1037_v9 = vcombine.high %v228_v7, %v228_v7 }
  0x30   : > { %1142 = vmatpush3.bf16.msra.mxu1 %v1245_v24  ;;  %1121 = vmatprep.subr.bf16.mxu0 %v1246_v25  ;;  %v229_v10 = vld [vmem:[%s1364_s21 + $0x18] sm:$0xff] }
  0x31   : > { %1143 = vmatprep.subr.bf16.mxu1 %v1247_v26  ;;  %v1038_v11 = vcombine.low %v229_v10, %v229_v10  ;;  %v1039_v12 = vcombine.high %v229_v10, %v229_v10 }
  0x33   : > { %1122 = vmatpush3.bf16.msra.mxu0 %v1248_v27 }
  0x34   : > { %1144 = vmatpush3.bf16.msra.mxu1 %v1249_v28  ;;  %1123 = vmatprep.subr.bf16.mxu0 %v1250_v29 }
  0x35   : > { %1145 = vmatprep.subr.bf16.mxu1 %v1251_v30 }
  0x37   : > { %1124 = vmatpush3.bf16.msra.mxu0 %v1252_v31 }
  0x38   : > { %1146 = vmatpush3.bf16.msra.mxu1 %v1253_v32  ;;  %1153 = vmatprep.subr.bf16.mxu0 %v1258_v39  ;;  %v1105_v39 = vld [vmem:[%s1458_s2] ss:$0 sm:$0xff] (!%p1104_p7) }
  0x39   : > { %1175 = vmatprep.subr.bf16.mxu1 %v1259_v40 }
  0x3a   : > { %803 = vmatmul.mubr.bf16.vlgmr.msra.gmra.mrb[0].mxu0 %v1032_v35  ;;  %v225_v35 = vld [vmem:[#allocation2] sm:$0xff] }
  0x3b   : > { %843 = vmatmul.mubr.bf16.vlgmr.msra.gmra.mrb[0].mxu1 %v1034_v37  ;;  %1154 = vmatpush3.bf16.msra.mxu0 %v1260_v41 }
  0x3c   : > { %1176 = vmatpush3.bf16.msra.mxu1 %v1261_v42  ;;  %1155 = vmatprep.subr.bf16.mxu0 %v1262_v43 }
  0x3d   : > { %1177 = vmatprep.subr.bf16.mxu1 %v1263_v44  ;;  %882 = vmatprep.mubr.bf16.mxu0 %v1037_v9 }
  0x3e   : > { %922 = vmatprep.mubr.bf16.mxu1 %v1039_v12 }
  0x3f   : > { %1156 = vmatpush3.bf16.msra.mxu0 %v1264_v45 }
  0x40   : > { %1178 = vmatpush3.bf16.msra.mxu1 %v1265_v46  ;;  %1157 = vmatprep.subr.bf16.mxu0 %v1266_v47 }
  0x41   : > { %1179 = vmatprep.subr.bf16.mxu1 %v1267_v48 }
  0x43   : > { %1158 = vmatpush3.bf16.msra.mxu0 %v1268_v49 }
  0x44   : > { %1180 = vmatpush3.bf16.msra.mxu1 %v1269_v50  ;;  %1159 = vmatprep.subr.bf16.mxu0 %v1270_v51 }
  0x45   : > { %1181 = vmatprep.subr.bf16.mxu1 %v1271_v52 }
  0x47   : > { %1160 = vmatpush3.bf16.msra.mxu0 %v1272_v53 }
  0x48   : > { %1182 = vmatpush3.bf16.msra.mxu1 %v1273_v54  ;;  %1161 = vmatprep.subr.bf16.mxu0 %v1274_v55 }
  0x49   : > { %1183 = vmatprep.subr.bf16.mxu1 %v1275_v56 }
  0x4b   : > { %1162 = vmatpush3.bf16.msra.mxu0 %v1276_v57 }
  0x4c   : > { %1184 = vmatpush3.bf16.msra.mxu1 %v1277_v58  ;;  %1163 = vmatprep.subr.bf16.mxu0 %v1278_v59 }
  0x4d   : > { %1185 = vmatprep.subr.bf16.mxu1 %v1279_v60 }
  0x4f   : > { %1164 = vmatpush3.bf16.msra.mxu0 %v1280_v61 }
  0x50   : > { %1186 = vmatpush3.bf16.msra.mxu1 %v1281_v62  ;;  %1165 = vmatprep.subr.bf16.mxu0 %v1282_v63 }
  0x51   : > { %1187 = vmatprep.subr.bf16.mxu1 %v1283_v0 }
  0x53   : > { %1166 = vmatpush3.bf16.msra.mxu0 %v1284_v1 }
  0x54   : > { %1188 = vmatpush3.bf16.msra.mxu1 %v1285_v2  ;;  %1167 = vmatprep.subr.bf16.mxu0 %v1286_v3 }
  0x55   : > { %1189 = vmatprep.subr.bf16.mxu1 %v1287_v4 }
  0x57   : > { %1168 = vmatpush3.bf16.msra.mxu0 %v1288_v5 }
  0x58   : > { %1190 = vmatpush3.bf16.msra.mxu1 %v1289_v6 }
  0x5a   : > { %883 = vmatmul.mubr.bf16.vlgmr.msra.gmra.mrb[4].mxu0 %v1036_v8 }
  0x5b   : > { %923 = vmatmul.mubr.bf16.vlgmr.msra.gmra.mrb[4].mxu1 %v1038_v11 }
 0x10d   : > { %v1125_v13 = vpop.f32.mrb[0].mxu0 }
 0x10e   : > { %v1147_v14 = vpop.f32.mrb[0].mxu1  ;;  %v1126_v15 = vpop.f32.mrb[1].mxu0 }
 0x10f   : > { %v1148_v16 = vpop.f32.mrb[1].mxu1  ;;  %v1127_v17 = vadd.f32 %v1126_v15, %v1125_v13  ;;  %v1128_v19 = vpop.f32.mrb[2].mxu0 }
 0x110   : > { %v1149_v18 = vadd.f32 %v1148_v16, %v1147_v14  ;;  %v1150_v20 = vpop.f32.mrb[2].mxu1  ;;  %v1129_v21 = vpop.f32.mrb[3].mxu0 }
 0x111   : > { %v1151_v22 = vpop.f32.mrb[3].mxu1 }
 0x112   : > { %v845_v23 = vadd.f32 %v1149_v18, %v1127_v17 }
 0x12d   : > { %v1169_v24 = vpop.f32.mrb[4].mxu0 }
 0x12e   : > { %v1191_v25 = vpop.f32.mrb[4].mxu1  ;;  %v1170_v26 = vpop.f32.mrb[5].mxu0 }
 0x12f   : > { %v1192_v27 = vpop.f32.mrb[5].mxu1  ;;  %v1171_v28 = vadd.f32 %v1170_v26, %v1169_v24  ;;  %v1172_v30 = vpop.f32.mrb[6].mxu0 }
 0x130   : > { %v1193_v29 = vadd.f32 %v1192_v27, %v1191_v25  ;;  %v1194_v31 = vpop.f32.mrb[6].mxu1  ;;  %v1173_v32 = vpop.f32.mrb[7].mxu0 }
 0x131   : > { %v1195_v33 = vpop.f32.mrb[7].mxu1  ;;  %v885_v34 = vadd.f32 %v1171_v28, %v845_v23  ;;  %935 = sbr.rel (%p1104_p7) target bundleno = 322 (0x142), region = 40 }
 0x133   : > { %v925_v36 = vadd.f32 %v1193_v29, %v885_v34 }
 0x135   : > { %v930_v37 = vadd.f32 %v925_v36, %v225_v35 }
 0x137   : > { %931 = vst [vmem:[#allocation2] sm:$0xff] %v930_v37 }
 0x13e   : > { %v936_v38 = vld [vmem:[#allocation2] sm:$0xff] }
 0x13f   : > { %v944_v40 = vadd.f32 %v1105_v39, %v936_v38 }
 0x141   : > { %945 = vst [vmem:[%s1459_s3] sm:$0xff] %v944_v40 }
 0x142 PF: > { %s13_s14 = sadd.s32 1, %s1316_s14   ;;  %s1460_s12 = smov %s1312_s13 }
 0x143   : > { %p10_p8 = scmp.ge.s32.totalorder %s13_s14, 10   ;;  %s1461_s13 = smov %s1463_s15 }
 0x145   :  { %12 = sbr.rel (!%p10_p8) target bundleno = 2 (0x2), region = 73 }

</bundles_post_ra>
